<compile_context>
chip_gen: v5e
topology: v5e:2x2
jax: 0.10.0
libtpu: 0.0.40
codegen_flags: <defaults>
</compile_context>

<pallas_src>
import functools

import jax
import jax.numpy as jnp
import numpy as np
from jax.experimental import pallas as pl
from jax.experimental.pallas import tpu as pltpu

EPS = 1e-6  # nn.LayerNorm(d_model, eps=1e-6)


def _erf(x):
    # Abramowitz & Stegun 7.1.26, |err| <= 1.5e-7.  exp/mul/add only.
    a1, a2, a3, a4, a5 = 0.254829592, -0.284496736, 1.421413741, -1.453152027, 1.061405429
    p = 0.3275911
    s = jnp.where(x >= 0, 1.0, -1.0).astype(x.dtype)
    ax = jnp.abs(x)
    t = 1.0 / (1.0 + p * ax)
    poly = ((((a5 * t + a4) * t + a3) * t + a2) * t + a1) * t
    return s * (1.0 - poly * jnp.exp(-ax * ax))


def _gelu_exact(x):
    # torch.nn.functional.gelu default = exact erf formulation.
    # TODO(synk): if the FFN region shows VALU as the binding slot, switch to a tanh-GELU
    #             so the transcendental lands on the (otherwise idle) EUP.
    return 0.5 * x * (1.0 + _erf(x * 0.7071067811865476))


def _layer_norm(x, gamma, beta):
    # rsqrt -> EUP slot instead of a VALU divide.
    mu = jnp.mean(x, axis=-1, keepdims=True)
    var = jnp.mean((x - mu) ** 2, axis=-1, keepdims=True)
    return (x - mu) * jax.lax.rsqrt(var + EPS) * gamma + beta


def _layer_norm_ref(x, gamma, beta):
    mu = jnp.mean(x, axis=-1, keepdims=True)
    var = jnp.mean((x - mu) ** 2, axis=-1, keepdims=True)
    return (x - mu) / jnp.sqrt(var + EPS) * gamma + beta


# --------------------------------------------------------------------------------------
# Kernel
# --------------------------------------------------------------------------------------
def encoder_layer_kernel(
    lens_ref,                                    # scalar prefetch (SMEM): (B,) int32
    x_ref,
    ln1_g_ref, ln1_b_ref,
    wq_ref, wk_ref, wv_ref, wo_ref, bo_ref,
    ln2_g_ref, ln2_b_ref,
    w1_ref, b1_ref, w2_ref, b2_ref,
    out_ref, *rest,
    n_head, d_k, d_v, block_b, seq_len, compute_dtype, return_attn,
):
    if return_attn:
        attn_ref, ctx_scratch = rest
    else:
        (ctx_scratch,) = rest

    Bb, L = block_b, seq_len
    cdt = compute_dtype
    b = pl.program_id(0)

    x = x_ref[...]                               # (Bb, L, D) f32
    D = x.shape[-1]
    x2 = x.reshape(Bb * L, D)

    # ---- Rebuild causal | key-pad mask and non_pad_mask in-kernel from lengths ----
    row2 = jax.lax.broadcasted_iota(jnp.int32, (L, L), 0)   # query position
    col2 = jax.lax.broadcasted_iota(jnp.int32, (L, L), 1)   # key position
    pos2 = jax.lax.broadcasted_iota(jnp.int32, (L, 1), 0)
    mask_rows, npad_rows = [], []
    for i in range(Bb):
        ln = lens_ref[b * Bb + i]
        mask_rows.append(((col2 > row2) | (col2 >= ln)).astype(jnp.float32))
        npad_rows.append((pos2 < ln).astype(jnp.float32))
    mask_bool = jnp.stack(mask_rows, axis=0) > 0.5          # (Bb, L, L), hoisted compare
    npad = jnp.concatenate(npad_rows, axis=0)               # (Bb*L, 1) non_pad_mask

    approx_recip = cdt != jnp.float32  # exact divide keeps the strict f32 check intact

    # -------------- MultiHeadAttention (normalize_before=True) --------------
    residual = x2
    xn = _layer_norm(x2, ln1_g_ref[0], ln1_b_ref[0])
    xn_c = xn.astype(cdt)

    # Fused, MXU-wide QKV projections.  1/sqrt(d_k) was folded into W_q on the host.
    q_all = jnp.dot(xn_c, wq_ref[...], preferred_element_type=jnp.float32)
    k_all = jnp.dot(xn_c, wk_ref[...], preferred_element_type=jnp.float32)
    v_all = jnp.dot(xn_c, wv_ref[...], preferred_element_type=jnp.float32)
    # Cast once so Q.K^T and attn.V run the MXU at the compute dtype (bf16 path).
    q3 = q_all.reshape(Bb, L, n_head * d_k).astype(cdt)
    k3 = k_all.reshape(Bb, L, n_head * d_k).astype(cdt)
    v3 = v_all.reshape(Bb, L, n_head * d_v).astype(cdt)

    # TODO(synk): d_k/d_v < 128 lane slices force relayouts; a head-tile-aligned host-side
    #             QKV weight layout would remove them if bundles show per-head XLU traffic.
    for h in range(n_head):
        qh = q3[:, :, h * d_k:(h + 1) * d_k]                 # (Bb, L, d_k), static slices
        kh = k3[:, :, h * d_k:(h + 1) * d_k]
        vh = v3[:, :, h * d_v:(h + 1) * d_v]
        scores = jnp.einsum("bqd,bkd->bqk", qh, kh,
                            preferred_element_type=jnp.float32)
        scores = jnp.where(mask_bool, jnp.float32(-1e9), scores)   # masked_fill semantics
        m = jnp.max(scores, axis=-1, keepdims=True)
        e = jnp.exp(scores - m)
        denom = jnp.sum(e, axis=-1, keepdims=True)
        attn = e * pl.reciprocal(denom, approx=approx_recip)
        if return_attn:
            attn_ref[:, h, :, :] = attn.astype(attn_ref.dtype)     # per-head direct store
        ctx = jnp.einsum("bqk,bkd->bqd", attn.astype(cdt), vh,
                         preferred_element_type=jnp.float32)
        # Write this head's context into the VMEM slab (frees vregs between heads).
        ctx_scratch[:, h * d_v:(h + 1) * d_v] = ctx.reshape(Bb * L, d_v)

    # Single output projection on the concatenated head contexts.
    proj = jnp.dot(ctx_scratch[...].astype(cdt), wo_ref[...],
                   preferred_element_type=jnp.float32)
    mha = (proj + bo_ref[0] + residual) * npad   # fc bias + residual, then *= non_pad_mask

    # -------------- PositionwiseFeedForward (normalize_before=True) ---------
    residual2 = mha
    hn = _layer_norm(mha, ln2_g_ref[0], ln2_b_ref[0])
    h1 = jnp.dot(hn.astype(cdt), w1_ref[...], preferred_element_type=jnp.float32) + b1_ref[0]
    h1 = _gelu_exact(h1)
    h2 = jnp.dot(h1.astype(cdt), w2_ref[...], preferred_element_type=jnp.float32) + b2_ref[0]
    y = (h2 + residual2) * npad                  # residual, then *= non_pad_mask
    out_ref[...] = y.reshape(Bb, L, D)


# --------------------------------------------------------------------------------------
# Host wrapper
# --------------------------------------------------------------------------------------
def _pick_block_b(B, L, return_attn):
    # ~256 rows per step when the (B,H,L,L) attn output is kept, ~512 otherwise.
    target_rows = 256 if return_attn else 512
    target = max(1, target_rows // max(L, 1))
    divisors = [c for c in range(1, B + 1) if B % c == 0]
    fits = [c for c in divisors if c <= target]
    bb = max(fits) if fits else 1
    # v7x has 2 TensorCores: keep the "parallel" grid length >= 2 when possible.
    if B >= 2 and B // bb < 2:
        smaller = [c for c in divisors if B // c >= 2]
        if smaller:
            bb = max(smaller)
    return bb


def _pick_vmem_limit():
    try:
        cap = int(pltpu.get_tpu_info().vmem_capacity_bytes)
    except Exception:
        cap = 64 * 1024 * 1024
    # Leave headroom below physical capacity; never ask for more than ~100 MiB.
    return max(32 * 1024 * 1024, min(cap - 8 * 1024 * 1024, 100 * 1024 * 1024))


def encoder_layer(enc_input, lengths, params, *, n_head, d_k, d_v,
                  compute_dtype=jnp.float32, return_attn=True, block_b=None):
    B, L, D = enc_input.shape
    d_inner = params["w1"].shape[1]

    # Host-side prep: fold the 1/sqrt(d_k) scale into W_q; cast matmul weights to the MXU
    # compute dtype (bf16 halves weight DMA and runs the MXU at native rate).
    scale = 1.0 / float(np.sqrt(d_k))
    wq = (params["wq"] * scale).astype(compute_dtype)
    wk = params["wk"].astype(compute_dtype)
    wv = params["wv"].astype(compute_dtype)
    wo = params["wo"].astype(compute_dtype)
    w1 = params["w1"].astype(compute_dtype)
    w2 = params["w2"].astype(compute_dtype)

    if block_b is None:
        block_b = _pick_block_b(B, L, return_attn)
    assert B % block_b == 0
    grid = (B // block_b,)

    attn_dtype = jnp.float32 if compute_dtype == jnp.float32 else jnp.bfloat16
    lengths = jnp.asarray(lengths, dtype=jnp.int32).reshape(B)

    kernel = functools.partial(
        encoder_layer_kernel,
        n_head=n_head, d_k=d_k, d_v=d_v, block_b=block_b, seq_len=L,
        compute_dtype=compute_dtype, return_attn=return_attn,
    )

    def build(single_buffer_weights):
        pm = pl.Buffered(1) if single_buffer_weights else None

        def inv(shape):
            zeros = (0,) * len(shape)
            if pm is None:
                return pl.BlockSpec(shape, lambda b, lens, _z=zeros: _z)
            return pl.BlockSpec(shape, lambda b, lens, _z=zeros: _z, pipeline_mode=pm)

        in_specs = [
            pl.BlockSpec((block_b, L, D), lambda b, lens: (b, 0, 0)),   # enc_input
            inv((1, D)), inv((1, D)),                                   # ln1 gamma/beta
            inv((D, n_head * d_k)),                                     # W_q (pre-scaled)
            inv((D, n_head * d_k)),                                     # W_k
            inv((D, n_head * d_v)),                                     # W_v
            inv((n_head * d_v, D)),                                     # W_o (fc)
            inv((1, D)),                                                # fc bias
            inv((1, D)), inv((1, D)),                                   # ln2 gamma/beta
            inv((D, d_inner)), inv((1, d_inner)),                       # w_1, b_1
            inv((d_inner, D)), inv((1, D)),                             # w_2, b_2
        ]
        out_spec_y = pl.BlockSpec((block_b, L, D), lambda b, lens: (b, 0, 0))
        out_shape_y = jax.ShapeDtypeStruct((B, L, D), jnp.float32)
        if return_attn:
            out_specs = (out_spec_y,
                         pl.BlockSpec((block_b, n_head, L, L),
                                      lambda b, lens: (b, 0, 0, 0)))
            out_shape = (out_shape_y,
                         jax.ShapeDtypeStruct((B, n_head, L, L), attn_dtype))
        else:
            out_specs = out_spec_y
            out_shape = out_shape_y

        grid_spec = pltpu.PrefetchScalarGridSpec(
            num_scalar_prefetch=1,
            grid=grid,
            in_specs=in_specs,
            out_specs=out_specs,
            scratch_shapes=[pltpu.VMEM((block_b * L, n_head * d_v), jnp.float32)],
        )
        return pl.pallas_call(
            kernel,
            grid_spec=grid_spec,
            out_shape=out_shape,
            compiler_params=pltpu.CompilerParams(
                dimension_semantics=("parallel",),
                vmem_limit_bytes=_pick_vmem_limit(),
            ),
        )

    args = (lengths, enc_input,
            params["ln1_g"], params["ln1_b"],
            wq, wk, wv, wo, params["bo"],
            params["ln2_g"], params["ln2_b"],
            w1, params["b1"], w2, params["b2"])
    try:
        return build(True)(*args)
    except Exception:
        # Fallback if pipeline_mode=pl.Buffered(1) is unsupported in this jax build.
        return build(False)(*args)


# --------------------------------------------------------------------------------------
# Pure-JAX reference (mirrors the PyTorch EncoderLayer forward, eval mode)
# --------------------------------------------------------------------------------------
def build_masks(lengths, L):
    pos = jnp.arange(L)
    non_pad = (pos[None, :] < lengths[:, None]).astype(jnp.float32)[..., None]  # (B,L,1)
    causal = (pos[None, :] > pos[:, None])[None]                                # (1,L,L)
    key_pad = (pos[None, :] >= lengths[:, None])[:, None, :]                    # (B,1,L)
    return non_pad, (causal | key_pad).astype(jnp.float32)                      # (B,L,L)


def reference(enc_input, lengths, p, *, n_head, d_k, d_v):
    HP = jax.lax.Precision.HIGHEST  # match the kernel's exact-f32 MXU path
    B, L, D = enc_input.shape
    non_pad_mask, slf_attn_mask_f = build_masks(lengths, L)
    x = enc_input
    residual = x
    xn = _layer_norm_ref(x, p["ln1_g"][0], p["ln1_b"][0])
    q = jnp.dot(xn, p["wq"], precision=HP).reshape(B, L, n_head, d_k).transpose(0, 2, 1, 3)
    k = jnp.dot(xn, p["wk"], precision=HP).reshape(B, L, n_head, d_k).transpose(0, 2, 1, 3)
    v = jnp.dot(xn, p["wv"], precision=HP).reshape(B, L, n_head, d_v).transpose(0, 2, 1, 3)
    scores = jnp.einsum("bhqd,bhkd->bhqk", q / (d_k ** 0.5), k, precision=HP)
    scores = jnp.where(slf_attn_mask_f[:, None] > 0.5, -1e9, scores)
    attn = jax.nn.softmax(scores, axis=-1)
    o = jnp.einsum("bhqk,bhkd->bhqd", attn, v, precision=HP)
    o = o.transpose(0, 2, 1, 3).reshape(B, L, n_head * d_v)
    o = jnp.dot(o, p["wo"], precision=HP) + p["bo"][0]
    o = (o + residual) * non_pad_mask
    residual2 = o
    on = _layer_norm_ref(o, p["ln2_g"][0], p["ln2_b"][0])
    h1 = jax.nn.gelu(jnp.dot(on, p["w1"], precision=HP) + p["b1"][0], approximate=False)
    y = jnp.dot(h1, p["w2"], precision=HP) + p["b2"][0] + residual2
    y = y * non_pad_mask
    return y, attn


if __name__ == "__main__":
    B, L = 2, 8
    d_model, d_inner, n_head, d_k, d_v = 32, 64, 4, 8, 8

    key = jax.random.PRNGKey(0)
    ks = jax.random.split(key, 16)

    def xavier(k, shape):
        lim = float(np.sqrt(6.0 / (shape[0] + shape[1])))
        return jax.random.uniform(k, shape, jnp.float32, -lim, lim)

    params = dict(
        wq=xavier(ks[0], (d_model, n_head * d_k)),
        wk=xavier(ks[1], (d_model, n_head * d_k)),
        wv=xavier(ks[2], (d_model, n_head * d_v)),
        wo=xavier(ks[3], (n_head * d_v, d_model)),
        bo=0.02 * jax.random.normal(ks[4], (1, d_model), jnp.float32),
        w1=xavier(ks[5], (d_model, d_inner)),
        b1=0.02 * jax.random.normal(ks[6], (1, d_inner), jnp.float32),
        w2=xavier(ks[7], (d_inner, d_model)),
        b2=0.02 * jax.random.normal(ks[8], (1, d_model), jnp.float32),
        ln1_g=1.0 + 0.1 * jax.random.normal(ks[9], (1, d_model), jnp.float32),
        ln1_b=0.05 * jax.random.normal(ks[10], (1, d_model), jnp.float32),
        ln2_g=1.0 + 0.1 * jax.random.normal(ks[11], (1, d_model), jnp.float32),
        ln2_b=0.05 * jax.random.normal(ks[12], (1, d_model), jnp.float32),
    )

    enc_input = jax.random.normal(ks[13], (B, L, d_model), jnp.float32)
    lengths = jnp.array([L, L - 3], dtype=jnp.int32)   # second sequence has padding

    ref_out, ref_attn = reference(enc_input, lengths, params,
                                  n_head=n_head, d_k=d_k, d_v=d_v)

    # ---- f32 MXU path, auto block_b (grid of 2 -> both TCs on v7x): strict check ----
    out, attn = encoder_layer(enc_input, lengths, params,
                              n_head=n_head, d_k=d_k, d_v=d_v,
                              compute_dtype=jnp.float32, return_attn=True)
    jax.block_until_ready((out, attn))
    np.testing.assert_allclose(np.asarray(out), np.asarray(ref_out), atol=1e-4, rtol=1e-4)
    np.testing.assert_allclose(np.asarray(attn), np.asarray(ref_attn), atol=1e-5, rtol=1e-4)

    # ---- f32 path with block_b=2 (multi-batch block code path): strict check ----
    out2, attn2 = encoder_layer(enc_input, lengths, params,
                                n_head=n_head, d_k=d_k, d_v=d_v,
                                compute_dtype=jnp.float32, return_attn=True, block_b=2)
    jax.block_until_ready((out2, attn2))
    np.testing.assert_allclose(np.asarray(out2), np.asarray(ref_out), atol=1e-4, rtol=1e-4)
    np.testing.assert_allclose(np.asarray(attn2), np.asarray(ref_attn), atol=1e-5, rtol=1e-4)

    # ---- return_attn=False path (skips the (B,H,L,L) output entirely) ----
    out3 = encoder_layer(enc_input, lengths, params,
                         n_head=n_head, d_k=d_k, d_v=d_v,
                         compute_dtype=jnp.float32, return_attn=False)
    jax.block_until_ready(out3)
    np.testing.assert_allclose(np.asarray(out3), np.asarray(ref_out), atol=1e-4, rtol=1e-4)

    # ---- bf16 MXU path (bf16 attn output, approx softmax reciprocal): loose check ----
    out_bf, attn_bf = encoder_layer(enc_input, lengths, params,
                                    n_head=n_head, d_k=d_k, d_v=d_v,
                                    compute_dtype=jnp.bfloat16, return_attn=True)
    jax.block_until_ready((out_bf, attn_bf))
    np.testing.assert_allclose(np.asarray(out_bf.astype(jnp.float32)), np.asarray(ref_out),
                               atol=1e-1, rtol=1e-1)
    np.testing.assert_allclose(np.asarray(attn_bf.astype(jnp.float32)), np.asarray(ref_attn),
                               atol=1e-1, rtol=1e-1)

    print("KERNEL_OK")
</pallas_src>

<mosaic_0001>
module attributes {stable_mosaic.version = 11 : i64} {
  func.func @encoder_layer_kernel(%arg0: i32, %arg1: memref<2xi32, #tpu.memory_space<smem>>, %arg2: memref<1x8x32xf32, #tpu.memory_space<vmem>>, %arg3: memref<1x32xf32, #tpu.memory_space<vmem>>, %arg4: memref<1x32xf32, #tpu.memory_space<vmem>>, %arg5: memref<32x32xf32, #tpu.memory_space<vmem>>, %arg6: memref<32x32xf32, #tpu.memory_space<vmem>>, %arg7: memref<32x32xf32, #tpu.memory_space<vmem>>, %arg8: memref<32x32xf32, #tpu.memory_space<vmem>>, %arg9: memref<1x32xf32, #tpu.memory_space<vmem>>, %arg10: memref<1x32xf32, #tpu.memory_space<vmem>>, %arg11: memref<1x32xf32, #tpu.memory_space<vmem>>, %arg12: memref<32x64xf32, #tpu.memory_space<vmem>>, %arg13: memref<1x64xf32, #tpu.memory_space<vmem>>, %arg14: memref<64x32xf32, #tpu.memory_space<vmem>>, %arg15: memref<1x32xf32, #tpu.memory_space<vmem>>, %arg16: memref<1x8x32xf32, #tpu.memory_space<vmem>>, %arg17: memref<1x4x8x8xf32, #tpu.memory_space<vmem>>, %arg18: memref<8x32xf32, #tpu.memory_space<vmem>>) attributes {dimension_semantics = [#tpu.dimension_semantics<parallel>], iteration_bounds = array<i64: 2>, scalar_prefetch = 1 : i64, scratch_operands = 1 : i64, tpu.core_type = #tpu.core_type<tc>, window_params = [{transform_indices = @transform_0, window_bounds = array<i64: 1, 8, 32>}, {pipeline_mode = #tpu.pipeline_mode<synchronous>, transform_indices = @transform_1, window_bounds = array<i64: 1, 32>}, {pipeline_mode = #tpu.pipeline_mode<synchronous>, transform_indices = @transform_2, window_bounds = array<i64: 1, 32>}, {pipeline_mode = #tpu.pipeline_mode<synchronous>, transform_indices = @transform_3, window_bounds = array<i64: 32, 32>}, {pipeline_mode = #tpu.pipeline_mode<synchronous>, transform_indices = @transform_4, window_bounds = array<i64: 32, 32>}, {pipeline_mode = #tpu.pipeline_mode<synchronous>, transform_indices = @transform_5, window_bounds = array<i64: 32, 32>}, {pipeline_mode = #tpu.pipeline_mode<synchronous>, transform_indices = @transform_6, window_bounds = array<i64: 32, 32>}, {pipeline_mode = #tpu.pipeline_mode<synchronous>, transform_indices = @transform_7, window_bounds = array<i64: 1, 32>}, {pipeline_mode = #tpu.pipeline_mode<synchronous>, transform_indices = @transform_8, window_bounds = array<i64: 1, 32>}, {pipeline_mode = #tpu.pipeline_mode<synchronous>, transform_indices = @transform_9, window_bounds = array<i64: 1, 32>}, {pipeline_mode = #tpu.pipeline_mode<synchronous>, transform_indices = @transform_10, window_bounds = array<i64: 32, 64>}, {pipeline_mode = #tpu.pipeline_mode<synchronous>, transform_indices = @transform_11, window_bounds = array<i64: 1, 64>}, {pipeline_mode = #tpu.pipeline_mode<synchronous>, transform_indices = @transform_12, window_bounds = array<i64: 64, 32>}, {pipeline_mode = #tpu.pipeline_mode<synchronous>, transform_indices = @transform_13, window_bounds = array<i64: 1, 32>}, {transform_indices = @transform_14, window_bounds = array<i64: 1, 8, 32>}, {transform_indices = @transform_15, window_bounds = array<i64: 1, 4, 8, 8>}]} {
    %c0 = arith.constant 0 : index
    %c0_0 = arith.constant 0 : index
    %c0_1 = arith.constant 0 : index
    %0 = vector.load %arg2[%c0, %c0_0, %c0_1] : memref<1x8x32xf32, #tpu.memory_space<vmem>>, vector<1x8x32xf32>
    %1 = vector.shape_cast %0 : vector<1x8x32xf32> to vector<8x32xf32>
    %2 = tpu.iota {dimensions = array<i32: 0>} : vector<8x8xi32>
    %3 = tpu.iota {dimensions = array<i32: 1>} : vector<8x8xi32>
    %4 = tpu.iota {dimensions = array<i32: 0>} : vector<8x1xi32>
    %c1_i32 = arith.constant 1 : i32
    %5 = arith.muli %arg0, %c1_i32 : i32
    %c0_i32 = arith.constant 0 : i32
    %6 = arith.addi %5, %c0_i32 : i32
    %7 = arith.index_cast %6 : i32 to index
    %8 = memref.load %arg1[%7] : memref<2xi32, #tpu.memory_space<smem>>
    %9 = arith.cmpi sgt, %3, %2 : vector<8x8xi32>
    %10 = vector.broadcast %8 : i32 to vector<8x8xi32>
    %11 = arith.cmpi sge, %3, %10 : vector<8x8xi32>
    %12 = arith.ori %9, %11 : vector<8x8xi1>
    %13 = arith.extui %12 : vector<8x8xi1> to vector<8x8xi32>
    %14 = arith.sitofp %13 : vector<8x8xi32> to vector<8x8xf32>
    %15 = vector.broadcast %8 : i32 to vector<8x1xi32>
    %16 = arith.cmpi slt, %4, %15 : vector<8x1xi32>
    %17 = arith.extui %16 : vector<8x1xi1> to vector<8x1xi32>
    %18 = arith.sitofp %17 : vector<8x1xi32> to vector<8x1xf32>
    %19 = vector.shape_cast %14 : vector<8x8xf32> to vector<1x8x8xf32>
    %cst = arith.constant 5.000000e-01 : f32
    %20 = vector.broadcast %cst : f32 to vector<1x8x8xf32>
    %21 = arith.cmpf ogt, %19, %20 : vector<1x8x8xf32>
    %c0_2 = arith.constant 0 : index
    %c0_3 = arith.constant 0 : index
    %22 = vector.load %arg3[%c0_2, %c0_3] : memref<1x32xf32, #tpu.memory_space<vmem>>, vector<1x32xf32>
    %23 = vector.shape_cast %22 : vector<1x32xf32> to vector<32xf32>
    %c0_4 = arith.constant 0 : index
    %c0_5 = arith.constant 0 : index
    %24 = vector.load %arg4[%c0_4, %c0_5] : memref<1x32xf32, #tpu.memory_space<vmem>>, vector<1x32xf32>
    %25 = vector.shape_cast %24 : vector<1x32xf32> to vector<32xf32>
    %cst_6 = arith.constant dense<0.000000e+00> : vector<8xf32>
    %26 = vector.multi_reduction <add>, %1, %cst_6 [1] : vector<8x32xf32> to vector<8xf32>
    %27 = vector.shape_cast %26 : vector<8xf32> to vector<8x1xf32>
    %cst_7 = arith.constant 3.200000e+01 : f32
    %28 = vector.broadcast %cst_7 : f32 to vector<8x1xf32>
    %29 = arith.divf %27, %28 : vector<8x1xf32>
    %30 = vector.broadcast %29 : vector<8x1xf32> to vector<8x32xf32>
    %31 = arith.subf %1, %30 : vector<8x32xf32>
    %32 = arith.mulf %31, %31 : vector<8x32xf32>
    %cst_8 = arith.constant dense<0.000000e+00> : vector<8xf32>
    %33 = vector.multi_reduction <add>, %32, %cst_8 [1] : vector<8x32xf32> to vector<8xf32>
    %34 = vector.shape_cast %33 : vector<8xf32> to vector<8x1xf32>
    %cst_9 = arith.constant 3.200000e+01 : f32
    %35 = vector.broadcast %cst_9 : f32 to vector<8x1xf32>
    %36 = arith.divf %34, %35 : vector<8x1xf32>
    %37 = vector.broadcast %29 : vector<8x1xf32> to vector<8x32xf32>
    %38 = arith.subf %1, %37 : vector<8x32xf32>
    %cst_10 = arith.constant 9.99999997E-7 : f32
    %39 = vector.broadcast %cst_10 : f32 to vector<8x1xf32>
    %40 = arith.addf %36, %39 : vector<8x1xf32>
    %41 = math.rsqrt %40 : vector<8x1xf32>
    %42 = vector.broadcast %41 : vector<8x1xf32> to vector<8x32xf32>
    %43 = arith.mulf %38, %42 : vector<8x32xf32>
    %44 = vector.shape_cast %23 : vector<32xf32> to vector<1x32xf32>
    %45 = vector.broadcast %44 : vector<1x32xf32> to vector<8x32xf32>
    %46 = arith.mulf %43, %45 : vector<8x32xf32>
    %47 = vector.shape_cast %25 : vector<32xf32> to vector<1x32xf32>
    %48 = vector.broadcast %47 : vector<1x32xf32> to vector<8x32xf32>
    %49 = arith.addf %46, %48 : vector<8x32xf32>
    %c0_11 = arith.constant 0 : index
    %c0_12 = arith.constant 0 : index
    %50 = vector.load %arg5[%c0_11, %c0_12] : memref<32x32xf32, #tpu.memory_space<vmem>>, vector<32x32xf32>
    %cst_13 = arith.constant dense<0.000000e+00> : vector<8x32xf32>
    %51 = tpu.matmul %49, %50, %cst_13 {dimension_numbers = #tpu.dot_dimension_numbers<[1], [0], [0], [1], [0, 0, 1, 1], [], []>} : vector<8x32xf32>, vector<32x32xf32>, vector<8x32xf32> -> vector<8x32xf32>
    %c0_14 = arith.constant 0 : index
    %c0_15 = arith.constant 0 : index
    %52 = vector.load %arg6[%c0_14, %c0_15] : memref<32x32xf32, #tpu.memory_space<vmem>>, vector<32x32xf32>
    %cst_16 = arith.constant dense<0.000000e+00> : vector<8x32xf32>
    %53 = tpu.matmul %49, %52, %cst_16 {dimension_numbers = #tpu.dot_dimension_numbers<[1], [0], [0], [1], [0, 0, 1, 1], [], []>} : vector<8x32xf32>, vector<32x32xf32>, vector<8x32xf32> -> vector<8x32xf32>
    %c0_17 = arith.constant 0 : index
    %c0_18 = arith.constant 0 : index
    %54 = vector.load %arg7[%c0_17, %c0_18] : memref<32x32xf32, #tpu.memory_space<vmem>>, vector<32x32xf32>
    %cst_19 = arith.constant dense<0.000000e+00> : vector<8x32xf32>
    %55 = tpu.matmul %49, %54, %cst_19 {dimension_numbers = #tpu.dot_dimension_numbers<[1], [0], [0], [1], [0, 0, 1, 1], [], []>} : vector<8x32xf32>, vector<32x32xf32>, vector<8x32xf32> -> vector<8x32xf32>
    %56 = vector.shape_cast %51 : vector<8x32xf32> to vector<1x8x32xf32>
    %57 = vector.shape_cast %53 : vector<8x32xf32> to vector<1x8x32xf32>
    %58 = vector.shape_cast %55 : vector<8x32xf32> to vector<1x8x32xf32>
    %59 = vector.extract_strided_slice %56 {offsets = [0, 0, 0], sizes = [1, 8, 8], strides = [1, 1, 1]} : vector<1x8x32xf32> to vector<1x8x8xf32>
    %60 = vector.extract_strided_slice %57 {offsets = [0, 0, 0], sizes = [1, 8, 8], strides = [1, 1, 1]} : vector<1x8x32xf32> to vector<1x8x8xf32>
    %61 = vector.extract_strided_slice %58 {offsets = [0, 0, 0], sizes = [1, 8, 8], strides = [1, 1, 1]} : vector<1x8x32xf32> to vector<1x8x8xf32>
    "tpu.trace_start"() <{level = 10 : i32, message = "bqd,bkd->bqk"}> : () -> ()
    %cst_20 = arith.constant dense<0.000000e+00> : vector<1x8x8xf32>
    %62 = tpu.matmul %59, %60, %cst_20 {dimension_numbers = #tpu.dot_dimension_numbers<[2], [2], [1], [1], [0, 0, 0, 1, 1, 1], [0], [0]>} : vector<1x8x8xf32>, vector<1x8x8xf32>, vector<1x8x8xf32> -> vector<1x8x8xf32>
    %cst_21 = arith.constant -1.000000e+09 : f32
    "tpu.trace_stop"() : () -> ()
    %63 = vector.broadcast %cst_21 : f32 to vector<1x8x8xf32>
    %64 = arith.select %21, %63, %62 : vector<1x8x8xi1>, vector<1x8x8xf32>
    %cst_22 = arith.constant dense<0xFF800000> : vector<1x8xf32>
    %65 = vector.multi_reduction <maximumf>, %64, %cst_22 [2] : vector<1x8x8xf32> to vector<1x8xf32>
    %66 = vector.shape_cast %65 : vector<1x8xf32> to vector<1x8x1xf32>
    %67 = vector.broadcast %66 : vector<1x8x1xf32> to vector<1x8x8xf32>
    %68 = arith.subf %64, %67 : vector<1x8x8xf32>
    %69 = math.exp %68 : vector<1x8x8xf32>
    %cst_23 = arith.constant dense<0.000000e+00> : vector<1x8xf32>
    %70 = vector.multi_reduction <add>, %69, %cst_23 [2] : vector<1x8x8xf32> to vector<1x8xf32>
    %71 = vector.shape_cast %70 : vector<1x8xf32> to vector<1x8x1xf32>
    %72 = tpu.reciprocal %71 : vector<1x8x1xf32> -> vector<1x8x1xf32>
    %73 = vector.broadcast %72 : vector<1x8x1xf32> to vector<1x8x8xf32>
    %74 = arith.mulf %69, %73 : vector<1x8x8xf32>
    %c0_24 = arith.constant 0 : index
    %c0_25 = arith.constant 0 : index
    %c0_26 = arith.constant 0 : index
    %c0_27 = arith.constant 0 : index
    %75 = vector.load %arg17[%c0_24, %c0_25, %c0_26, %c0_27] : memref<1x4x8x8xf32, #tpu.memory_space<vmem>>, vector<1x1x8x8xf32>
    %76 = vector.shape_cast %75 : vector<1x1x8x8xf32> to vector<1x8x8xf32>
    %77 = vector.shape_cast %74 : vector<1x8x8xf32> to vector<1x1x8x8xf32>
    tpu.vector_store %arg17[%c0_24, %c0_25, %c0_26, %c0_27], %77 {strides = array<i32>} : memref<1x4x8x8xf32, #tpu.memory_space<vmem>>, vector<1x1x8x8xf32>,
    "tpu.trace_start"() <{level = 10 : i32, message = "bqk,bkd->bqd"}> : () -> ()
    %cst_28 = arith.constant dense<0.000000e+00> : vector<1x8x8xf32>
    %78 = tpu.matmul %74, %61, %cst_28 {dimension_numbers = #tpu.dot_dimension_numbers<[2], [1], [1], [2], [0, 0, 0, 1, 1, 2], [0], [0]>} : vector<1x8x8xf32>, vector<1x8x8xf32>, vector<1x8x8xf32> -> vector<1x8x8xf32>
    "tpu.trace_stop"() : () -> ()
    %79 = vector.shape_cast %78 : vector<1x8x8xf32> to vector<8x8xf32>
    %c0_29 = arith.constant 0 : index
    %c0_30 = arith.constant 0 : index
    %80 = vector.load %arg18[%c0_29, %c0_30] : memref<8x32xf32, #tpu.memory_space<vmem>>, vector<8x8xf32>
    tpu.vector_store %arg18[%c0_29, %c0_30], %79 {strides = array<i32>} : memref<8x32xf32, #tpu.memory_space<vmem>>, vector<8x8xf32>,
    %81 = vector.extract_strided_slice %56 {offsets = [0, 0, 8], sizes = [1, 8, 8], strides = [1, 1, 1]} : vector<1x8x32xf32> to vector<1x8x8xf32>
    %82 = vector.extract_strided_slice %57 {offsets = [0, 0, 8], sizes = [1, 8, 8], strides = [1, 1, 1]} : vector<1x8x32xf32> to vector<1x8x8xf32>
    %83 = vector.extract_strided_slice %58 {offsets = [0, 0, 8], sizes = [1, 8, 8], strides = [1, 1, 1]} : vector<1x8x32xf32> to vector<1x8x8xf32>
    "tpu.trace_start"() <{level = 10 : i32, message = "bqd,bkd->bqk"}> : () -> ()
    %cst_31 = arith.constant dense<0.000000e+00> : vector<1x8x8xf32>
    %84 = tpu.matmul %81, %82, %cst_31 {dimension_numbers = #tpu.dot_dimension_numbers<[2], [2], [1], [1], [0, 0, 0, 1, 1, 1], [0], [0]>} : vector<1x8x8xf32>, vector<1x8x8xf32>, vector<1x8x8xf32> -> vector<1x8x8xf32>
    %cst_32 = arith.constant -1.000000e+09 : f32
    "tpu.trace_stop"() : () -> ()
    %85 = vector.broadcast %cst_32 : f32 to vector<1x8x8xf32>
    %86 = arith.select %21, %85, %84 : vector<1x8x8xi1>, vector<1x8x8xf32>
    %cst_33 = arith.constant dense<0xFF800000> : vector<1x8xf32>
    %87 = vector.multi_reduction <maximumf>, %86, %cst_33 [2] : vector<1x8x8xf32> to vector<1x8xf32>
    %88 = vector.shape_cast %87 : vector<1x8xf32> to vector<1x8x1xf32>
    %89 = vector.broadcast %88 : vector<1x8x1xf32> to vector<1x8x8xf32>
    %90 = arith.subf %86, %89 : vector<1x8x8xf32>
    %91 = math.exp %90 : vector<1x8x8xf32>
    %cst_34 = arith.constant dense<0.000000e+00> : vector<1x8xf32>
    %92 = vector.multi_reduction <add>, %91, %cst_34 [2] : vector<1x8x8xf32> to vector<1x8xf32>
    %93 = vector.shape_cast %92 : vector<1x8xf32> to vector<1x8x1xf32>
    %94 = tpu.reciprocal %93 : vector<1x8x1xf32> -> vector<1x8x1xf32>
    %95 = vector.broadcast %94 : vector<1x8x1xf32> to vector<1x8x8xf32>
    %96 = arith.mulf %91, %95 : vector<1x8x8xf32>
    %c0_35 = arith.constant 0 : index
    %c1 = arith.constant 1 : index
    %c0_36 = arith.constant 0 : index
    %c0_37 = arith.constant 0 : index
    %97 = vector.load %arg17[%c0_35, %c1, %c0_36, %c0_37] : memref<1x4x8x8xf32, #tpu.memory_space<vmem>>, vector<1x1x8x8xf32>
    %98 = vector.shape_cast %97 : vector<1x1x8x8xf32> to vector<1x8x8xf32>
    %99 = vector.shape_cast %96 : vector<1x8x8xf32> to vector<1x1x8x8xf32>
    tpu.vector_store %arg17[%c0_35, %c1, %c0_36, %c0_37], %99 {strides = array<i32>} : memref<1x4x8x8xf32, #tpu.memory_space<vmem>>, vector<1x1x8x8xf32>,
    "tpu.trace_start"() <{level = 10 : i32, message = "bqk,bkd->bqd"}> : () -> ()
    %cst_38 = arith.constant dense<0.000000e+00> : vector<1x8x8xf32>
    %100 = tpu.matmul %96, %83, %cst_38 {dimension_numbers = #tpu.dot_dimension_numbers<[2], [1], [1], [2], [0, 0, 0, 1, 1, 2], [0], [0]>} : vector<1x8x8xf32>, vector<1x8x8xf32>, vector<1x8x8xf32> -> vector<1x8x8xf32>
    "tpu.trace_stop"() : () -> ()
    %101 = vector.shape_cast %100 : vector<1x8x8xf32> to vector<8x8xf32>
    %c0_39 = arith.constant 0 : index
    %c8 = arith.constant 8 : index
    %102 = vector.load %arg18[%c0_39, %c8] : memref<8x32xf32, #tpu.memory_space<vmem>>, vector<8x8xf32>
    tpu.vector_store %arg18[%c0_39, %c8], %101 {strides = array<i32>} : memref<8x32xf32, #tpu.memory_space<vmem>>, vector<8x8xf32>,
    %103 = vector.extract_strided_slice %56 {offsets = [0, 0, 16], sizes = [1, 8, 8], strides = [1, 1, 1]} : vector<1x8x32xf32> to vector<1x8x8xf32>
    %104 = vector.extract_strided_slice %57 {offsets = [0, 0, 16], sizes = [1, 8, 8], strides = [1, 1, 1]} : vector<1x8x32xf32> to vector<1x8x8xf32>
    %105 = vector.extract_strided_slice %58 {offsets = [0, 0, 16], sizes = [1, 8, 8], strides = [1, 1, 1]} : vector<1x8x32xf32> to vector<1x8x8xf32>
    "tpu.trace_start"() <{level = 10 : i32, message = "bqd,bkd->bqk"}> : () -> ()
    %cst_40 = arith.constant dense<0.000000e+00> : vector<1x8x8xf32>
    %106 = tpu.matmul %103, %104, %cst_40 {dimension_numbers = #tpu.dot_dimension_numbers<[2], [2], [1], [1], [0, 0, 0, 1, 1, 1], [0], [0]>} : vector<1x8x8xf32>, vector<1x8x8xf32>, vector<1x8x8xf32> -> vector<1x8x8xf32>
    %cst_41 = arith.constant -1.000000e+09 : f32
    "tpu.trace_stop"() : () -> ()
    %107 = vector.broadcast %cst_41 : f32 to vector<1x8x8xf32>
    %108 = arith.select %21, %107, %106 : vector<1x8x8xi1>, vector<1x8x8xf32>
    %cst_42 = arith.constant dense<0xFF800000> : vector<1x8xf32>
    %109 = vector.multi_reduction <maximumf>, %108, %cst_42 [2] : vector<1x8x8xf32> to vector<1x8xf32>
    %110 = vector.shape_cast %109 : vector<1x8xf32> to vector<1x8x1xf32>
    %111 = vector.broadcast %110 : vector<1x8x1xf32> to vector<1x8x8xf32>
    %112 = arith.subf %108, %111 : vector<1x8x8xf32>
    %113 = math.exp %112 : vector<1x8x8xf32>
    %cst_43 = arith.constant dense<0.000000e+00> : vector<1x8xf32>
    %114 = vector.multi_reduction <add>, %113, %cst_43 [2] : vector<1x8x8xf32> to vector<1x8xf32>
    %115 = vector.shape_cast %114 : vector<1x8xf32> to vector<1x8x1xf32>
    %116 = tpu.reciprocal %115 : vector<1x8x1xf32> -> vector<1x8x1xf32>
    %117 = vector.broadcast %116 : vector<1x8x1xf32> to vector<1x8x8xf32>
    %118 = arith.mulf %113, %117 : vector<1x8x8xf32>
    %c0_44 = arith.constant 0 : index
    %c2 = arith.constant 2 : index
    %c0_45 = arith.constant 0 : index
    %c0_46 = arith.constant 0 : index
    %119 = vector.load %arg17[%c0_44, %c2, %c0_45, %c0_46] : memref<1x4x8x8xf32, #tpu.memory_space<vmem>>, vector<1x1x8x8xf32>
    %120 = vector.shape_cast %119 : vector<1x1x8x8xf32> to vector<1x8x8xf32>
    %121 = vector.shape_cast %118 : vector<1x8x8xf32> to vector<1x1x8x8xf32>
    tpu.vector_store %arg17[%c0_44, %c2, %c0_45, %c0_46], %121 {strides = array<i32>} : memref<1x4x8x8xf32, #tpu.memory_space<vmem>>, vector<1x1x8x8xf32>,
    "tpu.trace_start"() <{level = 10 : i32, message = "bqk,bkd->bqd"}> : () -> ()
    %cst_47 = arith.constant dense<0.000000e+00> : vector<1x8x8xf32>
    %122 = tpu.matmul %118, %105, %cst_47 {dimension_numbers = #tpu.dot_dimension_numbers<[2], [1], [1], [2], [0, 0, 0, 1, 1, 2], [0], [0]>} : vector<1x8x8xf32>, vector<1x8x8xf32>, vector<1x8x8xf32> -> vector<1x8x8xf32>
    "tpu.trace_stop"() : () -> ()
    %123 = vector.shape_cast %122 : vector<1x8x8xf32> to vector<8x8xf32>
    %c0_48 = arith.constant 0 : index
    %c16 = arith.constant 16 : index
    %124 = vector.load %arg18[%c0_48, %c16] : memref<8x32xf32, #tpu.memory_space<vmem>>, vector<8x8xf32>
    tpu.vector_store %arg18[%c0_48, %c16], %123 {strides = array<i32>} : memref<8x32xf32, #tpu.memory_space<vmem>>, vector<8x8xf32>,
    %125 = vector.extract_strided_slice %56 {offsets = [0, 0, 24], sizes = [1, 8, 8], strides = [1, 1, 1]} : vector<1x8x32xf32> to vector<1x8x8xf32>
    %126 = vector.extract_strided_slice %57 {offsets = [0, 0, 24], sizes = [1, 8, 8], strides = [1, 1, 1]} : vector<1x8x32xf32> to vector<1x8x8xf32>
    %127 = vector.extract_strided_slice %58 {offsets = [0, 0, 24], sizes = [1, 8, 8], strides = [1, 1, 1]} : vector<1x8x32xf32> to vector<1x8x8xf32>
    "tpu.trace_start"() <{level = 10 : i32, message = "bqd,bkd->bqk"}> : () -> ()
    %cst_49 = arith.constant dense<0.000000e+00> : vector<1x8x8xf32>
    %128 = tpu.matmul %125, %126, %cst_49 {dimension_numbers = #tpu.dot_dimension_numbers<[2], [2], [1], [1], [0, 0, 0, 1, 1, 1], [0], [0]>} : vector<1x8x8xf32>, vector<1x8x8xf32>, vector<1x8x8xf32> -> vector<1x8x8xf32>
    %cst_50 = arith.constant -1.000000e+09 : f32
    "tpu.trace_stop"() : () -> ()
    %129 = vector.broadcast %cst_50 : f32 to vector<1x8x8xf32>
    %130 = arith.select %21, %129, %128 : vector<1x8x8xi1>, vector<1x8x8xf32>
    %cst_51 = arith.constant dense<0xFF800000> : vector<1x8xf32>
    %131 = vector.multi_reduction <maximumf>, %130, %cst_51 [2] : vector<1x8x8xf32> to vector<1x8xf32>
    %132 = vector.shape_cast %131 : vector<1x8xf32> to vector<1x8x1xf32>
    %133 = vector.broadcast %132 : vector<1x8x1xf32> to vector<1x8x8xf32>
    %134 = arith.subf %130, %133 : vector<1x8x8xf32>
    %135 = math.exp %134 : vector<1x8x8xf32>
    %cst_52 = arith.constant dense<0.000000e+00> : vector<1x8xf32>
    %136 = vector.multi_reduction <add>, %135, %cst_52 [2] : vector<1x8x8xf32> to vector<1x8xf32>
    %137 = vector.shape_cast %136 : vector<1x8xf32> to vector<1x8x1xf32>
    %138 = tpu.reciprocal %137 : vector<1x8x1xf32> -> vector<1x8x1xf32>
    %139 = vector.broadcast %138 : vector<1x8x1xf32> to vector<1x8x8xf32>
    %140 = arith.mulf %135, %139 : vector<1x8x8xf32>
    %c0_53 = arith.constant 0 : index
    %c3 = arith.constant 3 : index
    %c0_54 = arith.constant 0 : index
    %c0_55 = arith.constant 0 : index
    %141 = vector.load %arg17[%c0_53, %c3, %c0_54, %c0_55] : memref<1x4x8x8xf32, #tpu.memory_space<vmem>>, vector<1x1x8x8xf32>
    %142 = vector.shape_cast %141 : vector<1x1x8x8xf32> to vector<1x8x8xf32>
    %143 = vector.shape_cast %140 : vector<1x8x8xf32> to vector<1x1x8x8xf32>
    tpu.vector_store %arg17[%c0_53, %c3, %c0_54, %c0_55], %143 {strides = array<i32>} : memref<1x4x8x8xf32, #tpu.memory_space<vmem>>, vector<1x1x8x8xf32>,
    "tpu.trace_start"() <{level = 10 : i32, message = "bqk,bkd->bqd"}> : () -> ()
    %cst_56 = arith.constant dense<0.000000e+00> : vector<1x8x8xf32>
    %144 = tpu.matmul %140, %127, %cst_56 {dimension_numbers = #tpu.dot_dimension_numbers<[2], [1], [1], [2], [0, 0, 0, 1, 1, 2], [0], [0]>} : vector<1x8x8xf32>, vector<1x8x8xf32>, vector<1x8x8xf32> -> vector<1x8x8xf32>
    "tpu.trace_stop"() : () -> ()
    %145 = vector.shape_cast %144 : vector<1x8x8xf32> to vector<8x8xf32>
    %c0_57 = arith.constant 0 : index
    %c24 = arith.constant 24 : index
    %146 = vector.load %arg18[%c0_57, %c24] : memref<8x32xf32, #tpu.memory_space<vmem>>, vector<8x8xf32>
    tpu.vector_store %arg18[%c0_57, %c24], %145 {strides = array<i32>} : memref<8x32xf32, #tpu.memory_space<vmem>>, vector<8x8xf32>,
    %c0_58 = arith.constant 0 : index
    %c0_59 = arith.constant 0 : index
    %147 = vector.load %arg18[%c0_58, %c0_59] : memref<8x32xf32, #tpu.memory_space<vmem>>, vector<8x32xf32>
    %c0_60 = arith.constant 0 : index
    %c0_61 = arith.constant 0 : index
    %148 = vector.load %arg8[%c0_60, %c0_61] : memref<32x32xf32, #tpu.memory_space<vmem>>, vector<32x32xf32>
    %cst_62 = arith.constant dense<0.000000e+00> : vector<8x32xf32>
    %149 = tpu.matmul %147, %148, %cst_62 {dimension_numbers = #tpu.dot_dimension_numbers<[1], [0], [0], [1], [0, 0, 1, 1], [], []>} : vector<8x32xf32>, vector<32x32xf32>, vector<8x32xf32> -> vector<8x32xf32>
    %c0_63 = arith.constant 0 : index
    %c0_64 = arith.constant 0 : index
    %150 = vector.load %arg9[%c0_63, %c0_64] : memref<1x32xf32, #tpu.memory_space<vmem>>, vector<1x32xf32>
    %151 = vector.shape_cast %150 : vector<1x32xf32> to vector<32xf32>
    %152 = vector.shape_cast %151 : vector<32xf32> to vector<1x32xf32>
    %153 = vector.broadcast %152 : vector<1x32xf32> to vector<8x32xf32>
    %154 = arith.addf %149, %153 : vector<8x32xf32>
    %155 = arith.addf %154, %1 : vector<8x32xf32>
    %156 = vector.broadcast %18 : vector<8x1xf32> to vector<8x32xf32>
    %157 = arith.mulf %155, %156 : vector<8x32xf32>
    %c0_65 = arith.constant 0 : index
    %c0_66 = arith.constant 0 : index
    %158 = vector.load %arg10[%c0_65, %c0_66] : memref<1x32xf32, #tpu.memory_space<vmem>>, vector<1x32xf32>
    %159 = vector.shape_cast %158 : vector<1x32xf32> to vector<32xf32>
    %c0_67 = arith.constant 0 : index
    %c0_68 = arith.constant 0 : index
    %160 = vector.load %arg11[%c0_67, %c0_68] : memref<1x32xf32, #tpu.memory_space<vmem>>, vector<1x32xf32>
    %161 = vector.shape_cast %160 : vector<1x32xf32> to vector<32xf32>
    %cst_69 = arith.constant dense<0.000000e+00> : vector<8xf32>
    %162 = vector.multi_reduction <add>, %157, %cst_69 [1] : vector<8x32xf32> to vector<8xf32>
    %163 = vector.shape_cast %162 : vector<8xf32> to vector<8x1xf32>
    %cst_70 = arith.constant 3.200000e+01 : f32
    %164 = vector.broadcast %cst_70 : f32 to vector<8x1xf32>
    %165 = arith.divf %163, %164 : vector<8x1xf32>
    %166 = vector.broadcast %165 : vector<8x1xf32> to vector<8x32xf32>
    %167 = arith.subf %157, %166 : vector<8x32xf32>
    %168 = arith.mulf %167, %167 : vector<8x32xf32>
    %cst_71 = arith.constant dense<0.000000e+00> : vector<8xf32>
    %169 = vector.multi_reduction <add>, %168, %cst_71 [1] : vector<8x32xf32> to vector<8xf32>
    %170 = vector.shape_cast %169 : vector<8xf32> to vector<8x1xf32>
    %cst_72 = arith.constant 3.200000e+01 : f32
    %171 = vector.broadcast %cst_72 : f32 to vector<8x1xf32>
    %172 = arith.divf %170, %171 : vector<8x1xf32>
    %173 = vector.broadcast %165 : vector<8x1xf32> to vector<8x32xf32>
    %174 = arith.subf %157, %173 : vector<8x32xf32>
    %cst_73 = arith.constant 9.99999997E-7 : f32
    %175 = vector.broadcast %cst_73 : f32 to vector<8x1xf32>
    %176 = arith.addf %172, %175 : vector<8x1xf32>
    %177 = math.rsqrt %176 : vector<8x1xf32>
    %178 = vector.broadcast %177 : vector<8x1xf32> to vector<8x32xf32>
    %179 = arith.mulf %174, %178 : vector<8x32xf32>
    %180 = vector.shape_cast %159 : vector<32xf32> to vector<1x32xf32>
    %181 = vector.broadcast %180 : vector<1x32xf32> to vector<8x32xf32>
    %182 = arith.mulf %179, %181 : vector<8x32xf32>
    %183 = vector.shape_cast %161 : vector<32xf32> to vector<1x32xf32>
    %184 = vector.broadcast %183 : vector<1x32xf32> to vector<8x32xf32>
    %185 = arith.addf %182, %184 : vector<8x32xf32>
    %c0_74 = arith.constant 0 : index
    %c0_75 = arith.constant 0 : index
    %186 = vector.load %arg12[%c0_74, %c0_75] : memref<32x64xf32, #tpu.memory_space<vmem>>, vector<32x64xf32>
    %cst_76 = arith.constant dense<0.000000e+00> : vector<8x64xf32>
    %187 = tpu.matmul %185, %186, %cst_76 {dimension_numbers = #tpu.dot_dimension_numbers<[1], [0], [0], [1], [0, 0, 1, 1], [], []>} : vector<8x32xf32>, vector<32x64xf32>, vector<8x64xf32> -> vector<8x64xf32>
    %c0_77 = arith.constant 0 : index
    %c0_78 = arith.constant 0 : index
    %188 = vector.load %arg13[%c0_77, %c0_78] : memref<1x64xf32, #tpu.memory_space<vmem>>, vector<1x64xf32>
    %189 = vector.shape_cast %188 : vector<1x64xf32> to vector<64xf32>
    %190 = vector.shape_cast %189 : vector<64xf32> to vector<1x64xf32>
    %191 = vector.broadcast %190 : vector<1x64xf32> to vector<8x64xf32>
    %192 = arith.addf %187, %191 : vector<8x64xf32>
    %cst_79 = arith.constant 5.000000e-01 : f32
    %193 = vector.broadcast %cst_79 : f32 to vector<8x64xf32>
    %194 = arith.mulf %193, %192 : vector<8x64xf32>
    %cst_80 = arith.constant 0.707106769 : f32
    %195 = vector.broadcast %cst_80 : f32 to vector<8x64xf32>
    %196 = arith.mulf %192, %195 : vector<8x64xf32>
    %cst_81 = arith.constant 0.000000e+00 : f32
    %197 = vector.broadcast %cst_81 : f32 to vector<8x64xf32>
    %198 = arith.cmpf oge, %196, %197 : vector<8x64xf32>
    %cst_82 = arith.constant 1.000000e+00 : f32
    %cst_83 = arith.constant -1.000000e+00 : f32
    %199 = vector.broadcast %cst_82 : f32 to vector<8x64xf32>
    %200 = vector.broadcast %cst_83 : f32 to vector<8x64xf32>
    %201 = arith.select %198, %199, %200 : vector<8x64xi1>, vector<8x64xf32>
    %202 = math.absf %196 : vector<8x64xf32>
    %cst_84 = arith.constant 0.327591091 : f32
    %203 = vector.broadcast %cst_84 : f32 to vector<8x64xf32>
    %204 = arith.mulf %203, %202 : vector<8x64xf32>
    %cst_85 = arith.constant 1.000000e+00 : f32
    %205 = vector.broadcast %cst_85 : f32 to vector<8x64xf32>
    %206 = arith.addf %205, %204 : vector<8x64xf32>
    %cst_86 = arith.constant 1.000000e+00 : f32
    %207 = vector.broadcast %cst_86 : f32 to vector<8x64xf32>
    %208 = arith.divf %207, %206 : vector<8x64xf32>
    %cst_87 = arith.constant 1.06140542 : f32
    %209 = vector.broadcast %cst_87 : f32 to vector<8x64xf32>
    %210 = arith.mulf %209, %208 : vector<8x64xf32>
    %cst_88 = arith.constant -1.45315206 : f32
    %211 = vector.broadcast %cst_88 : f32 to vector<8x64xf32>
    %212 = arith.addf %210, %211 : vector<8x64xf32>
    %213 = arith.mulf %212, %208 : vector<8x64xf32>
    %cst_89 = arith.constant 1.42141378 : f32
    %214 = vector.broadcast %cst_89 : f32 to vector<8x64xf32>
    %215 = arith.addf %213, %214 : vector<8x64xf32>
    %216 = arith.mulf %215, %208 : vector<8x64xf32>
    %cst_90 = arith.constant -0.284496725 : f32
    %217 = vector.broadcast %cst_90 : f32 to vector<8x64xf32>
    %218 = arith.addf %216, %217 : vector<8x64xf32>
    %219 = arith.mulf %218, %208 : vector<8x64xf32>
    %cst_91 = arith.constant 0.254829586 : f32
    %220 = vector.broadcast %cst_91 : f32 to vector<8x64xf32>
    %221 = arith.addf %219, %220 : vector<8x64xf32>
    %222 = arith.mulf %221, %208 : vector<8x64xf32>
    %cst_92 = arith.constant 0.000000e+00 : f32
    %223 = vector.broadcast %cst_92 : f32 to vector<8x64xf32>
    %224 = arith.subf %223, %202 : vector<8x64xf32>
    %225 = arith.mulf %224, %202 : vector<8x64xf32>
    %226 = math.exp %225 : vector<8x64xf32>
    %227 = arith.mulf %222, %226 : vector<8x64xf32>
    %cst_93 = arith.constant 1.000000e+00 : f32
    %228 = vector.broadcast %cst_93 : f32 to vector<8x64xf32>
    %229 = arith.subf %228, %227 : vector<8x64xf32>
    %230 = arith.mulf %201, %229 : vector<8x64xf32>
    %cst_94 = arith.constant 1.000000e+00 : f32
    %231 = vector.broadcast %cst_94 : f32 to vector<8x64xf32>
    %232 = arith.addf %231, %230 : vector<8x64xf32>
    %233 = arith.mulf %194, %232 : vector<8x64xf32>
    %c0_95 = arith.constant 0 : index
    %c0_96 = arith.constant 0 : index
    %234 = vector.load %arg14[%c0_95, %c0_96] : memref<64x32xf32, #tpu.memory_space<vmem>>, vector<64x32xf32>
    %cst_97 = arith.constant dense<0.000000e+00> : vector<8x32xf32>
    %235 = tpu.matmul %233, %234, %cst_97 {dimension_numbers = #tpu.dot_dimension_numbers<[1], [0], [0], [1], [0, 0, 1, 1], [], []>} : vector<8x64xf32>, vector<64x32xf32>, vector<8x32xf32> -> vector<8x32xf32>
    %c0_98 = arith.constant 0 : index
    %c0_99 = arith.constant 0 : index
    %236 = vector.load %arg15[%c0_98, %c0_99] : memref<1x32xf32, #tpu.memory_space<vmem>>, vector<1x32xf32>
    %237 = vector.shape_cast %236 : vector<1x32xf32> to vector<32xf32>
    %238 = vector.shape_cast %237 : vector<32xf32> to vector<1x32xf32>
    %239 = vector.broadcast %238 : vector<1x32xf32> to vector<8x32xf32>
    %240 = arith.addf %235, %239 : vector<8x32xf32>
    %241 = arith.addf %240, %157 : vector<8x32xf32>
    %242 = vector.broadcast %18 : vector<8x1xf32> to vector<8x32xf32>
    %243 = arith.mulf %241, %242 : vector<8x32xf32>
    %244 = vector.shape_cast %243 : vector<8x32xf32> to vector<1x8x32xf32>
    %c0_100 = arith.constant 0 : index
    %c0_101 = arith.constant 0 : index
    %c0_102 = arith.constant 0 : index
    %245 = vector.load %arg16[%c0_100, %c0_101, %c0_102] : memref<1x8x32xf32, #tpu.memory_space<vmem>>, vector<1x8x32xf32>
    tpu.vector_store %arg16[%c0_100, %c0_101, %c0_102], %244 {strides = array<i32>} : memref<1x8x32xf32, #tpu.memory_space<vmem>>, vector<1x8x32xf32>,
    return
  }
  func.func @transform_0(%arg0: i32, %arg1: memref<2xi32, #tpu.memory_space<smem>>) -> (i32, i32, i32) {
    %c0_i32 = arith.constant 0 : i32
    %c0_i32_0 = arith.constant 0 : i32
    %c0_i32_1 = arith.constant 0 : i32
    return %arg0, %c0_i32, %c0_i32_0 : i32, i32, i32
  }
  func.func @transform_1(%arg0: i32, %arg1: memref<2xi32, #tpu.memory_space<smem>>) -> (i32, i32) {
    %c0_i32 = arith.constant 0 : i32
    %c0_i32_0 = arith.constant 0 : i32
    %c0_i32_1 = arith.constant 0 : i32
    return %c0_i32, %c0_i32_0 : i32, i32
  }
  func.func @transform_2(%arg0: i32, %arg1: memref<2xi32, #tpu.memory_space<smem>>) -> (i32, i32) {
    %c0_i32 = arith.constant 0 : i32
    %c0_i32_0 = arith.constant 0 : i32
    %c0_i32_1 = arith.constant 0 : i32
    return %c0_i32, %c0_i32_0 : i32, i32
  }
  func.func @transform_3(%arg0: i32, %arg1: memref<2xi32, #tpu.memory_space<smem>>) -> (i32, i32) {
    %c0_i32 = arith.constant 0 : i32
    %c0_i32_0 = arith.constant 0 : i32
    %c0_i32_1 = arith.constant 0 : i32
    return %c0_i32, %c0_i32_0 : i32, i32
  }
  func.func @transform_4(%arg0: i32, %arg1: memref<2xi32, #tpu.memory_space<smem>>) -> (i32, i32) {
    %c0_i32 = arith.constant 0 : i32
    %c0_i32_0 = arith.constant 0 : i32
    %c0_i32_1 = arith.constant 0 : i32
    return %c0_i32, %c0_i32_0 : i32, i32
  }
  func.func @transform_5(%arg0: i32, %arg1: memref<2xi32, #tpu.memory_space<smem>>) -> (i32, i32) {
    %c0_i32 = arith.constant 0 : i32
    %c0_i32_0 = arith.constant 0 : i32
    %c0_i32_1 = arith.constant 0 : i32
    return %c0_i32, %c0_i32_0 : i32, i32
  }
  func.func @transform_6(%arg0: i32, %arg1: memref<2xi32, #tpu.memory_space<smem>>) -> (i32, i32) {
    %c0_i32 = arith.constant 0 : i32
    %c0_i32_0 = arith.constant 0 : i32
    %c0_i32_1 = arith.constant 0 : i32
    return %c0_i32, %c0_i32_0 : i32, i32
  }
  func.func @transform_7(%arg0: i32, %arg1: memref<2xi32, #tpu.memory_space<smem>>) -> (i32, i32) {
    %c0_i32 = arith.constant 0 : i32
    %c0_i32_0 = arith.constant 0 : i32
    %c0_i32_1 = arith.constant 0 : i32
    return %c0_i32, %c0_i32_0 : i32, i32
  }
  func.func @transform_8(%arg0: i32, %arg1: memref<2xi32, #tpu.memory_space<smem>>) -> (i32, i32) {
    %c0_i32 = arith.constant 0 : i32
    %c0_i32_0 = arith.constant 0 : i32
    %c0_i32_1 = arith.constant 0 : i32
    return %c0_i32, %c0_i32_0 : i32, i32
  }
  func.func @transform_9(%arg0: i32, %arg1: memref<2xi32, #tpu.memory_space<smem>>) -> (i32, i32) {
    %c0_i32 = arith.constant 0 : i32
    %c0_i32_0 = arith.constant 0 : i32
    %c0_i32_1 = arith.constant 0 : i32
    return %c0_i32, %c0_i32_0 : i32, i32
  }
  func.func @transform_10(%arg0: i32, %arg1: memref<2xi32, #tpu.memory_space<smem>>) -> (i32, i32) {
    %c0_i32 = arith.constant 0 : i32
    %c0_i32_0 = arith.constant 0 : i32
    %c0_i32_1 = arith.constant 0 : i32
    return %c0_i32, %c0_i32_0 : i32, i32
  }
  func.func @transform_11(%arg0: i32, %arg1: memref<2xi32, #tpu.memory_space<smem>>) -> (i32, i32) {
    %c0_i32 = arith.constant 0 : i32
    %c0_i32_0 = arith.constant 0 : i32
    %c0_i32_1 = arith.constant 0 : i32
    return %c0_i32, %c0_i32_0 : i32, i32
  }
  func.func @transform_12(%arg0: i32, %arg1: memref<2xi32, #tpu.memory_space<smem>>) -> (i32, i32) {
    %c0_i32 = arith.constant 0 : i32
    %c0_i32_0 = arith.constant 0 : i32
    %c0_i32_1 = arith.constant 0 : i32
    return %c0_i32, %c0_i32_0 : i32, i32
  }
  func.func @transform_13(%arg0: i32, %arg1: memref<2xi32, #tpu.memory_space<smem>>) -> (i32, i32) {
    %c0_i32 = arith.constant 0 : i32
    %c0_i32_0 = arith.constant 0 : i32
    %c0_i32_1 = arith.constant 0 : i32
    return %c0_i32, %c0_i32_0 : i32, i32
  }
  func.func @transform_14(%arg0: i32, %arg1: memref<2xi32, #tpu.memory_space<smem>>) -> (i32, i32, i32) {
    %c0_i32 = arith.constant 0 : i32
    %c0_i32_0 = arith.constant 0 : i32
    %c0_i32_1 = arith.constant 0 : i32
    return %arg0, %c0_i32, %c0_i32_0 : i32, i32, i32
  }
  func.func @transform_15(%arg0: i32, %arg1: memref<2xi32, #tpu.memory_space<smem>>) -> (i32, i32, i32, i32) {
    %c0_i32 = arith.constant 0 : i32
    %c0_i32_0 = arith.constant 0 : i32
    %c0_i32_1 = arith.constant 0 : i32
    %c0_i32_2 = arith.constant 0 : i32
    return %arg0, %c0_i32, %c0_i32_0, %c0_i32_1 : i32, i32, i32, i32
  }
}

module attributes {stable_mosaic.version = 11 : i64} {
  func.func @encoder_layer_kernel(%arg0: i32, %arg1: memref<2xi32, #tpu.memory_space<smem>>, %arg2: memref<1x8x32xf32, #tpu.memory_space<vmem>>, %arg3: memref<1x32xf32, #tpu.memory_space<vmem>>, %arg4: memref<1x32xf32, #tpu.memory_space<vmem>>, %arg5: memref<32x32xf32, #tpu.memory_space<vmem>>, %arg6: memref<32x32xf32, #tpu.memory_space<vmem>>, %arg7: memref<32x32xf32, #tpu.memory_space<vmem>>, %arg8: memref<32x32xf32, #tpu.memory_space<vmem>>, %arg9: memref<1x32xf32, #tpu.memory_space<vmem>>, %arg10: memref<1x32xf32, #tpu.memory_space<vmem>>, %arg11: memref<1x32xf32, #tpu.memory_space<vmem>>, %arg12: memref<32x64xf32, #tpu.memory_space<vmem>>, %arg13: memref<1x64xf32, #tpu.memory_space<vmem>>, %arg14: memref<64x32xf32, #tpu.memory_space<vmem>>, %arg15: memref<1x32xf32, #tpu.memory_space<vmem>>, %arg16: memref<1x8x32xf32, #tpu.memory_space<vmem>>, %arg17: memref<1x4x8x8xf32, #tpu.memory_space<vmem>>, %arg18: memref<8x32xf32, #tpu.memory_space<vmem>>) attributes {dimension_semantics = [#tpu.dimension_semantics<parallel>], iteration_bounds = array<i64: 2>, scalar_prefetch = 1 : i64, scratch_operands = 1 : i64, tpu.core_type = #tpu.core_type<tc>, window_params = [{transform_indices = @transform_0, window_bounds = array<i64: 1, 8, 32>}, {pipeline_mode = #tpu.pipeline_mode<synchronous>, transform_indices = @transform_1, window_bounds = array<i64: 1, 32>}, {pipeline_mode = #tpu.pipeline_mode<synchronous>, transform_indices = @transform_2, window_bounds = array<i64: 1, 32>}, {pipeline_mode = #tpu.pipeline_mode<synchronous>, transform_indices = @transform_3, window_bounds = array<i64: 32, 32>}, {pipeline_mode = #tpu.pipeline_mode<synchronous>, transform_indices = @transform_4, window_bounds = array<i64: 32, 32>}, {pipeline_mode = #tpu.pipeline_mode<synchronous>, transform_indices = @transform_5, window_bounds = array<i64: 32, 32>}, {pipeline_mode = #tpu.pipeline_mode<synchronous>, transform_indices = @transform_6, window_bounds = array<i64: 32, 32>}, {pipeline_mode = #tpu.pipeline_mode<synchronous>, transform_indices = @transform_7, window_bounds = array<i64: 1, 32>}, {pipeline_mode = #tpu.pipeline_mode<synchronous>, transform_indices = @transform_8, window_bounds = array<i64: 1, 32>}, {pipeline_mode = #tpu.pipeline_mode<synchronous>, transform_indices = @transform_9, window_bounds = array<i64: 1, 32>}, {pipeline_mode = #tpu.pipeline_mode<synchronous>, transform_indices = @transform_10, window_bounds = array<i64: 32, 64>}, {pipeline_mode = #tpu.pipeline_mode<synchronous>, transform_indices = @transform_11, window_bounds = array<i64: 1, 64>}, {pipeline_mode = #tpu.pipeline_mode<synchronous>, transform_indices = @transform_12, window_bounds = array<i64: 64, 32>}, {pipeline_mode = #tpu.pipeline_mode<synchronous>, transform_indices = @transform_13, window_bounds = array<i64: 1, 32>}, {transform_indices = @transform_14, window_bounds = array<i64: 1, 8, 32>}, {transform_indices = @transform_15, window_bounds = array<i64: 1, 4, 8, 8>}]} {
    %c0 = arith.constant 0 : index
    %c0_0 = arith.constant 0 : index
    %c0_1 = arith.constant 0 : index
    %0 = vector.load %arg2[%c0, %c0_0, %c0_1] : memref<1x8x32xf32, #tpu.memory_space<vmem>>, vector<1x8x32xf32>
    %1 = vector.shape_cast %0 : vector<1x8x32xf32> to vector<8x32xf32>
    %2 = tpu.iota {dimensions = array<i32: 0>} : vector<8x8xi32>
    %3 = tpu.iota {dimensions = array<i32: 1>} : vector<8x8xi32>
    %4 = tpu.iota {dimensions = array<i32: 0>} : vector<8x1xi32>
    %c1_i32 = arith.constant 1 : i32
    %5 = arith.muli %arg0, %c1_i32 : i32
    %c0_i32 = arith.constant 0 : i32
    %6 = arith.addi %5, %c0_i32 : i32
    %7 = arith.index_cast %6 : i32 to index
    %8 = memref.load %arg1[%7] : memref<2xi32, #tpu.memory_space<smem>>
    %9 = arith.cmpi sgt, %3, %2 : vector<8x8xi32>
    %10 = vector.broadcast %8 : i32 to vector<8x8xi32>
    %11 = arith.cmpi sge, %3, %10 : vector<8x8xi32>
    %12 = arith.ori %9, %11 : vector<8x8xi1>
    %13 = arith.extui %12 : vector<8x8xi1> to vector<8x8xi32>
    %14 = arith.sitofp %13 : vector<8x8xi32> to vector<8x8xf32>
    %15 = vector.broadcast %8 : i32 to vector<8x1xi32>
    %16 = arith.cmpi slt, %4, %15 : vector<8x1xi32>
    %17 = arith.extui %16 : vector<8x1xi1> to vector<8x1xi32>
    %18 = arith.sitofp %17 : vector<8x1xi32> to vector<8x1xf32>
    %19 = vector.shape_cast %14 : vector<8x8xf32> to vector<1x8x8xf32>
    %cst = arith.constant 5.000000e-01 : f32
    %20 = vector.broadcast %cst : f32 to vector<1x8x8xf32>
    %21 = arith.cmpf ogt, %19, %20 : vector<1x8x8xf32>
    %c0_2 = arith.constant 0 : index
    %c0_3 = arith.constant 0 : index
    %22 = vector.load %arg3[%c0_2, %c0_3] : memref<1x32xf32, #tpu.memory_space<vmem>>, vector<1x32xf32>
    %23 = vector.shape_cast %22 : vector<1x32xf32> to vector<32xf32>
    %c0_4 = arith.constant 0 : index
    %c0_5 = arith.constant 0 : index
    %24 = vector.load %arg4[%c0_4, %c0_5] : memref<1x32xf32, #tpu.memory_space<vmem>>, vector<1x32xf32>
    %25 = vector.shape_cast %24 : vector<1x32xf32> to vector<32xf32>
    %cst_6 = arith.constant dense<0.000000e+00> : vector<8xf32>
    %26 = vector.multi_reduction <add>, %1, %cst_6 [1] : vector<8x32xf32> to vector<8xf32>
    %27 = vector.shape_cast %26 : vector<8xf32> to vector<8x1xf32>
    %cst_7 = arith.constant 3.200000e+01 : f32
    %28 = vector.broadcast %cst_7 : f32 to vector<8x1xf32>
    %29 = arith.divf %27, %28 : vector<8x1xf32>
    %30 = vector.broadcast %29 : vector<8x1xf32> to vector<8x32xf32>
    %31 = arith.subf %1, %30 : vector<8x32xf32>
    %32 = arith.mulf %31, %31 : vector<8x32xf32>
    %cst_8 = arith.constant dense<0.000000e+00> : vector<8xf32>
    %33 = vector.multi_reduction <add>, %32, %cst_8 [1] : vector<8x32xf32> to vector<8xf32>
    %34 = vector.shape_cast %33 : vector<8xf32> to vector<8x1xf32>
    %cst_9 = arith.constant 3.200000e+01 : f32
    %35 = vector.broadcast %cst_9 : f32 to vector<8x1xf32>
    %36 = arith.divf %34, %35 : vector<8x1xf32>
    %37 = vector.broadcast %29 : vector<8x1xf32> to vector<8x32xf32>
    %38 = arith.subf %1, %37 : vector<8x32xf32>
    %cst_10 = arith.constant 9.99999997E-7 : f32
    %39 = vector.broadcast %cst_10 : f32 to vector<8x1xf32>
    %40 = arith.addf %36, %39 : vector<8x1xf32>
    %41 = math.rsqrt %40 : vector<8x1xf32>
    %42 = vector.broadcast %41 : vector<8x1xf32> to vector<8x32xf32>
    %43 = arith.mulf %38, %42 : vector<8x32xf32>
    %44 = vector.shape_cast %23 : vector<32xf32> to vector<1x32xf32>
    %45 = vector.broadcast %44 : vector<1x32xf32> to vector<8x32xf32>
    %46 = arith.mulf %43, %45 : vector<8x32xf32>
    %47 = vector.shape_cast %25 : vector<32xf32> to vector<1x32xf32>
    %48 = vector.broadcast %47 : vector<1x32xf32> to vector<8x32xf32>
    %49 = arith.addf %46, %48 : vector<8x32xf32>
    %c0_11 = arith.constant 0 : index
    %c0_12 = arith.constant 0 : index
    %50 = vector.load %arg5[%c0_11, %c0_12] : memref<32x32xf32, #tpu.memory_space<vmem>>, vector<32x32xf32>
    %cst_13 = arith.constant dense<0.000000e+00> : vector<8x32xf32>
    %51 = tpu.matmul %49, %50, %cst_13 {dimension_numbers = #tpu.dot_dimension_numbers<[1], [0], [0], [1], [0, 0, 1, 1], [], []>} : vector<8x32xf32>, vector<32x32xf32>, vector<8x32xf32> -> vector<8x32xf32>
    %c0_14 = arith.constant 0 : index
    %c0_15 = arith.constant 0 : index
    %52 = vector.load %arg6[%c0_14, %c0_15] : memref<32x32xf32, #tpu.memory_space<vmem>>, vector<32x32xf32>
    %cst_16 = arith.constant dense<0.000000e+00> : vector<8x32xf32>
    %53 = tpu.matmul %49, %52, %cst_16 {dimension_numbers = #tpu.dot_dimension_numbers<[1], [0], [0], [1], [0, 0, 1, 1], [], []>} : vector<8x32xf32>, vector<32x32xf32>, vector<8x32xf32> -> vector<8x32xf32>
    %c0_17 = arith.constant 0 : index
    %c0_18 = arith.constant 0 : index
    %54 = vector.load %arg7[%c0_17, %c0_18] : memref<32x32xf32, #tpu.memory_space<vmem>>, vector<32x32xf32>
    %cst_19 = arith.constant dense<0.000000e+00> : vector<8x32xf32>
    %55 = tpu.matmul %49, %54, %cst_19 {dimension_numbers = #tpu.dot_dimension_numbers<[1], [0], [0], [1], [0, 0, 1, 1], [], []>} : vector<8x32xf32>, vector<32x32xf32>, vector<8x32xf32> -> vector<8x32xf32>
    %56 = vector.shape_cast %51 : vector<8x32xf32> to vector<1x8x32xf32>
    %57 = vector.shape_cast %53 : vector<8x32xf32> to vector<1x8x32xf32>
    %58 = vector.shape_cast %55 : vector<8x32xf32> to vector<1x8x32xf32>
    %59 = vector.extract_strided_slice %56 {offsets = [0, 0, 0], sizes = [1, 8, 8], strides = [1, 1, 1]} : vector<1x8x32xf32> to vector<1x8x8xf32>
    %60 = vector.extract_strided_slice %57 {offsets = [0, 0, 0], sizes = [1, 8, 8], strides = [1, 1, 1]} : vector<1x8x32xf32> to vector<1x8x8xf32>
    %61 = vector.extract_strided_slice %58 {offsets = [0, 0, 0], sizes = [1, 8, 8], strides = [1, 1, 1]} : vector<1x8x32xf32> to vector<1x8x8xf32>
    "tpu.trace_start"() <{level = 10 : i32, message = "bqd,bkd->bqk"}> : () -> ()
    %cst_20 = arith.constant dense<0.000000e+00> : vector<1x8x8xf32>
    %62 = tpu.matmul %59, %60, %cst_20 {dimension_numbers = #tpu.dot_dimension_numbers<[2], [2], [1], [1], [0, 0, 0, 1, 1, 1], [0], [0]>} : vector<1x8x8xf32>, vector<1x8x8xf32>, vector<1x8x8xf32> -> vector<1x8x8xf32>
    %cst_21 = arith.constant -1.000000e+09 : f32
    "tpu.trace_stop"() : () -> ()
    %63 = vector.broadcast %cst_21 : f32 to vector<1x8x8xf32>
    %64 = arith.select %21, %63, %62 : vector<1x8x8xi1>, vector<1x8x8xf32>
    %cst_22 = arith.constant dense<0xFF800000> : vector<1x8xf32>
    %65 = vector.multi_reduction <maximumf>, %64, %cst_22 [2] : vector<1x8x8xf32> to vector<1x8xf32>
    %66 = vector.shape_cast %65 : vector<1x8xf32> to vector<1x8x1xf32>
    %67 = vector.broadcast %66 : vector<1x8x1xf32> to vector<1x8x8xf32>
    %68 = arith.subf %64, %67 : vector<1x8x8xf32>
    %69 = math.exp %68 : vector<1x8x8xf32>
    %cst_23 = arith.constant dense<0.000000e+00> : vector<1x8xf32>
    %70 = vector.multi_reduction <add>, %69, %cst_23 [2] : vector<1x8x8xf32> to vector<1x8xf32>
    %71 = vector.shape_cast %70 : vector<1x8xf32> to vector<1x8x1xf32>
    %72 = tpu.reciprocal %71 : vector<1x8x1xf32> -> vector<1x8x1xf32>
    %73 = vector.broadcast %72 : vector<1x8x1xf32> to vector<1x8x8xf32>
    %74 = arith.mulf %69, %73 : vector<1x8x8xf32>
    %c0_24 = arith.constant 0 : index
    %c0_25 = arith.constant 0 : index
    %c0_26 = arith.constant 0 : index
    %c0_27 = arith.constant 0 : index
    %75 = vector.load %arg17[%c0_24, %c0_25, %c0_26, %c0_27] : memref<1x4x8x8xf32, #tpu.memory_space<vmem>>, vector<1x1x8x8xf32>
    %76 = vector.shape_cast %75 : vector<1x1x8x8xf32> to vector<1x8x8xf32>
    %77 = vector.shape_cast %74 : vector<1x8x8xf32> to vector<1x1x8x8xf32>
    tpu.vector_store %arg17[%c0_24, %c0_25, %c0_26, %c0_27], %77 {strides = array<i32>} : memref<1x4x8x8xf32, #tpu.memory_space<vmem>>, vector<1x1x8x8xf32>,
    "tpu.trace_start"() <{level = 10 : i32, message = "bqk,bkd->bqd"}> : () -> ()
    %cst_28 = arith.constant dense<0.000000e+00> : vector<1x8x8xf32>
    %78 = tpu.matmul %74, %61, %cst_28 {dimension_numbers = #tpu.dot_dimension_numbers<[2], [1], [1], [2], [0, 0, 0, 1, 1, 2], [0], [0]>} : vector<1x8x8xf32>, vector<1x8x8xf32>, vector<1x8x8xf32> -> vector<1x8x8xf32>
    "tpu.trace_stop"() : () -> ()
    %79 = vector.shape_cast %78 : vector<1x8x8xf32> to vector<8x8xf32>
    %c0_29 = arith.constant 0 : index
    %c0_30 = arith.constant 0 : index
    %80 = vector.load %arg18[%c0_29, %c0_30] : memref<8x32xf32, #tpu.memory_space<vmem>>, vector<8x8xf32>
    tpu.vector_store %arg18[%c0_29, %c0_30], %79 {strides = array<i32>} : memref<8x32xf32, #tpu.memory_space<vmem>>, vector<8x8xf32>,
    %81 = vector.extract_strided_slice %56 {offsets = [0, 0, 8], sizes = [1, 8, 8], strides = [1, 1, 1]} : vector<1x8x32xf32> to vector<1x8x8xf32>
    %82 = vector.extract_strided_slice %57 {offsets = [0, 0, 8], sizes = [1, 8, 8], strides = [1, 1, 1]} : vector<1x8x32xf32> to vector<1x8x8xf32>
    %83 = vector.extract_strided_slice %58 {offsets = [0, 0, 8], sizes = [1, 8, 8], strides = [1, 1, 1]} : vector<1x8x32xf32> to vector<1x8x8xf32>
    "tpu.trace_start"() <{level = 10 : i32, message = "bqd,bkd->bqk"}> : () -> ()
    %cst_31 = arith.constant dense<0.000000e+00> : vector<1x8x8xf32>
    %84 = tpu.matmul %81, %82, %cst_31 {dimension_numbers = #tpu.dot_dimension_numbers<[2], [2], [1], [1], [0, 0, 0, 1, 1, 1], [0], [0]>} : vector<1x8x8xf32>, vector<1x8x8xf32>, vector<1x8x8xf32> -> vector<1x8x8xf32>
    %cst_32 = arith.constant -1.000000e+09 : f32
    "tpu.trace_stop"() : () -> ()
    %85 = vector.broadcast %cst_32 : f32 to vector<1x8x8xf32>
    %86 = arith.select %21, %85, %84 : vector<1x8x8xi1>, vector<1x8x8xf32>
    %cst_33 = arith.constant dense<0xFF800000> : vector<1x8xf32>
    %87 = vector.multi_reduction <maximumf>, %86, %cst_33 [2] : vector<1x8x8xf32> to vector<1x8xf32>
    %88 = vector.shape_cast %87 : vector<1x8xf32> to vector<1x8x1xf32>
    %89 = vector.broadcast %88 : vector<1x8x1xf32> to vector<1x8x8xf32>
    %90 = arith.subf %86, %89 : vector<1x8x8xf32>
    %91 = math.exp %90 : vector<1x8x8xf32>
    %cst_34 = arith.constant dense<0.000000e+00> : vector<1x8xf32>
    %92 = vector.multi_reduction <add>, %91, %cst_34 [2] : vector<1x8x8xf32> to vector<1x8xf32>
    %93 = vector.shape_cast %92 : vector<1x8xf32> to vector<1x8x1xf32>
    %94 = tpu.reciprocal %93 : vector<1x8x1xf32> -> vector<1x8x1xf32>
    %95 = vector.broadcast %94 : vector<1x8x1xf32> to vector<1x8x8xf32>
    %96 = arith.mulf %91, %95 : vector<1x8x8xf32>
    %c0_35 = arith.constant 0 : index
    %c1 = arith.constant 1 : index
    %c0_36 = arith.constant 0 : index
    %c0_37 = arith.constant 0 : index
    %97 = vector.load %arg17[%c0_35, %c1, %c0_36, %c0_37] : memref<1x4x8x8xf32, #tpu.memory_space<vmem>>, vector<1x1x8x8xf32>
    %98 = vector.shape_cast %97 : vector<1x1x8x8xf32> to vector<1x8x8xf32>
    %99 = vector.shape_cast %96 : vector<1x8x8xf32> to vector<1x1x8x8xf32>
    tpu.vector_store %arg17[%c0_35, %c1, %c0_36, %c0_37], %99 {strides = array<i32>} : memref<1x4x8x8xf32, #tpu.memory_space<vmem>>, vector<1x1x8x8xf32>,
    "tpu.trace_start"() <{level = 10 : i32, message = "bqk,bkd->bqd"}> : () -> ()
    %cst_38 = arith.constant dense<0.000000e+00> : vector<1x8x8xf32>
    %100 = tpu.matmul %96, %83, %cst_38 {dimension_numbers = #tpu.dot_dimension_numbers<[2], [1], [1], [2], [0, 0, 0, 1, 1, 2], [0], [0]>} : vector<1x8x8xf32>, vector<1x8x8xf32>, vector<1x8x8xf32> -> vector<1x8x8xf32>
    "tpu.trace_stop"() : () -> ()
    %101 = vector.shape_cast %100 : vector<1x8x8xf32> to vector<8x8xf32>
    %c0_39 = arith.constant 0 : index
    %c8 = arith.constant 8 : index
    %102 = vector.load %arg18[%c0_39, %c8] : memref<8x32xf32, #tpu.memory_space<vmem>>, vector<8x8xf32>
    tpu.vector_store %arg18[%c0_39, %c8], %101 {strides = array<i32>} : memref<8x32xf32, #tpu.memory_space<vmem>>, vector<8x8xf32>,
    %103 = vector.extract_strided_slice %56 {offsets = [0, 0, 16], sizes = [1, 8, 8], strides = [1, 1, 1]} : vector<1x8x32xf32> to vector<1x8x8xf32>
    %104 = vector.extract_strided_slice %57 {offsets = [0, 0, 16], sizes = [1, 8, 8], strides = [1, 1, 1]} : vector<1x8x32xf32> to vector<1x8x8xf32>
    %105 = vector.extract_strided_slice %58 {offsets = [0, 0, 16], sizes = [1, 8, 8], strides = [1, 1, 1]} : vector<1x8x32xf32> to vector<1x8x8xf32>
    "tpu.trace_start"() <{level = 10 : i32, message = "bqd,bkd->bqk"}> : () -> ()
    %cst_40 = arith.constant dense<0.000000e+00> : vector<1x8x8xf32>
    %106 = tpu.matmul %103, %104, %cst_40 {dimension_numbers = #tpu.dot_dimension_numbers<[2], [2], [1], [1], [0, 0, 0, 1, 1, 1], [0], [0]>} : vector<1x8x8xf32>, vector<1x8x8xf32>, vector<1x8x8xf32> -> vector<1x8x8xf32>
    %cst_41 = arith.constant -1.000000e+09 : f32
    "tpu.trace_stop"() : () -> ()
    %107 = vector.broadcast %cst_41 : f32 to vector<1x8x8xf32>
    %108 = arith.select %21, %107, %106 : vector<1x8x8xi1>, vector<1x8x8xf32>
    %cst_42 = arith.constant dense<0xFF800000> : vector<1x8xf32>
    %109 = vector.multi_reduction <maximumf>, %108, %cst_42 [2] : vector<1x8x8xf32> to vector<1x8xf32>
    %110 = vector.shape_cast %109 : vector<1x8xf32> to vector<1x8x1xf32>
    %111 = vector.broadcast %110 : vector<1x8x1xf32> to vector<1x8x8xf32>
    %112 = arith.subf %108, %111 : vector<1x8x8xf32>
    %113 = math.exp %112 : vector<1x8x8xf32>
    %cst_43 = arith.constant dense<0.000000e+00> : vector<1x8xf32>
    %114 = vector.multi_reduction <add>, %113, %cst_43 [2] : vector<1x8x8xf32> to vector<1x8xf32>
    %115 = vector.shape_cast %114 : vector<1x8xf32> to vector<1x8x1xf32>
    %116 = tpu.reciprocal %115 : vector<1x8x1xf32> -> vector<1x8x1xf32>
    %117 = vector.broadcast %116 : vector<1x8x1xf32> to vector<1x8x8xf32>
    %118 = arith.mulf %113, %117 : vector<1x8x8xf32>
    %c0_44 = arith.constant 0 : index
    %c2 = arith.constant 2 : index
    %c0_45 = arith.constant 0 : index
    %c0_46 = arith.constant 0 : index
    %119 = vector.load %arg17[%c0_44, %c2, %c0_45, %c0_46] : memref<1x4x8x8xf32, #tpu.memory_space<vmem>>, vector<1x1x8x8xf32>
    %120 = vector.shape_cast %119 : vector<1x1x8x8xf32> to vector<1x8x8xf32>
    %121 = vector.shape_cast %118 : vector<1x8x8xf32> to vector<1x1x8x8xf32>
    tpu.vector_store %arg17[%c0_44, %c2, %c0_45, %c0_46], %121 {strides = array<i32>} : memref<1x4x8x8xf32, #tpu.memory_space<vmem>>, vector<1x1x8x8xf32>,
    "tpu.trace_start"() <{level = 10 : i32, message = "bqk,bkd->bqd"}> : () -> ()
    %cst_47 = arith.constant dense<0.000000e+00> : vector<1x8x8xf32>
    %122 = tpu.matmul %118, %105, %cst_47 {dimension_numbers = #tpu.dot_dimension_numbers<[2], [1], [1], [2], [0, 0, 0, 1, 1, 2], [0], [0]>} : vector<1x8x8xf32>, vector<1x8x8xf32>, vector<1x8x8xf32> -> vector<1x8x8xf32>
    "tpu.trace_stop"() : () -> ()
    %123 = vector.shape_cast %122 : vector<1x8x8xf32> to vector<8x8xf32>
    %c0_48 = arith.constant 0 : index
    %c16 = arith.constant 16 : index
    %124 = vector.load %arg18[%c0_48, %c16] : memref<8x32xf32, #tpu.memory_space<vmem>>, vector<8x8xf32>
    tpu.vector_store %arg18[%c0_48, %c16], %123 {strides = array<i32>} : memref<8x32xf32, #tpu.memory_space<vmem>>, vector<8x8xf32>,
    %125 = vector.extract_strided_slice %56 {offsets = [0, 0, 24], sizes = [1, 8, 8], strides = [1, 1, 1]} : vector<1x8x32xf32> to vector<1x8x8xf32>
    %126 = vector.extract_strided_slice %57 {offsets = [0, 0, 24], sizes = [1, 8, 8], strides = [1, 1, 1]} : vector<1x8x32xf32> to vector<1x8x8xf32>
    %127 = vector.extract_strided_slice %58 {offsets = [0, 0, 24], sizes = [1, 8, 8], strides = [1, 1, 1]} : vector<1x8x32xf32> to vector<1x8x8xf32>
    "tpu.trace_start"() <{level = 10 : i32, message = "bqd,bkd->bqk"}> : () -> ()
    %cst_49 = arith.constant dense<0.000000e+00> : vector<1x8x8xf32>
    %128 = tpu.matmul %125, %126, %cst_49 {dimension_numbers = #tpu.dot_dimension_numbers<[2], [2], [1], [1], [0, 0, 0, 1, 1, 1], [0], [0]>} : vector<1x8x8xf32>, vector<1x8x8xf32>, vector<1x8x8xf32> -> vector<1x8x8xf32>
    %cst_50 = arith.constant -1.000000e+09 : f32
    "tpu.trace_stop"() : () -> ()
    %129 = vector.broadcast %cst_50 : f32 to vector<1x8x8xf32>
    %130 = arith.select %21, %129, %128 : vector<1x8x8xi1>, vector<1x8x8xf32>
    %cst_51 = arith.constant dense<0xFF800000> : vector<1x8xf32>
    %131 = vector.multi_reduction <maximumf>, %130, %cst_51 [2] : vector<1x8x8xf32> to vector<1x8xf32>
    %132 = vector.shape_cast %131 : vector<1x8xf32> to vector<1x8x1xf32>
    %133 = vector.broadcast %132 : vector<1x8x1xf32> to vector<1x8x8xf32>
    %134 = arith.subf %130, %133 : vector<1x8x8xf32>
    %135 = math.exp %134 : vector<1x8x8xf32>
    %cst_52 = arith.constant dense<0.000000e+00> : vector<1x8xf32>
    %136 = vector.multi_reduction <add>, %135, %cst_52 [2] : vector<1x8x8xf32> to vector<1x8xf32>
    %137 = vector.shape_cast %136 : vector<1x8xf32> to vector<1x8x1xf32>
    %138 = tpu.reciprocal %137 : vector<1x8x1xf32> -> vector<1x8x1xf32>
    %139 = vector.broadcast %138 : vector<1x8x1xf32> to vector<1x8x8xf32>
    %140 = arith.mulf %135, %139 : vector<1x8x8xf32>
    %c0_53 = arith.constant 0 : index
    %c3 = arith.constant 3 : index
    %c0_54 = arith.constant 0 : index
    %c0_55 = arith.constant 0 : index
    %141 = vector.load %arg17[%c0_53, %c3, %c0_54, %c0_55] : memref<1x4x8x8xf32, #tpu.memory_space<vmem>>, vector<1x1x8x8xf32>
    %142 = vector.shape_cast %141 : vector<1x1x8x8xf32> to vector<1x8x8xf32>
    %143 = vector.shape_cast %140 : vector<1x8x8xf32> to vector<1x1x8x8xf32>
    tpu.vector_store %arg17[%c0_53, %c3, %c0_54, %c0_55], %143 {strides = array<i32>} : memref<1x4x8x8xf32, #tpu.memory_space<vmem>>, vector<1x1x8x8xf32>,
    "tpu.trace_start"() <{level = 10 : i32, message = "bqk,bkd->bqd"}> : () -> ()
    %cst_56 = arith.constant dense<0.000000e+00> : vector<1x8x8xf32>
    %144 = tpu.matmul %140, %127, %cst_56 {dimension_numbers = #tpu.dot_dimension_numbers<[2], [1], [1], [2], [0, 0, 0, 1, 1, 2], [0], [0]>} : vector<1x8x8xf32>, vector<1x8x8xf32>, vector<1x8x8xf32> -> vector<1x8x8xf32>
    "tpu.trace_stop"() : () -> ()
    %145 = vector.shape_cast %144 : vector<1x8x8xf32> to vector<8x8xf32>
    %c0_57 = arith.constant 0 : index
    %c24 = arith.constant 24 : index
    %146 = vector.load %arg18[%c0_57, %c24] : memref<8x32xf32, #tpu.memory_space<vmem>>, vector<8x8xf32>
    tpu.vector_store %arg18[%c0_57, %c24], %145 {strides = array<i32>} : memref<8x32xf32, #tpu.memory_space<vmem>>, vector<8x8xf32>,
    %c0_58 = arith.constant 0 : index
    %c0_59 = arith.constant 0 : index
    %147 = vector.load %arg18[%c0_58, %c0_59] : memref<8x32xf32, #tpu.memory_space<vmem>>, vector<8x32xf32>
    %c0_60 = arith.constant 0 : index
    %c0_61 = arith.constant 0 : index
    %148 = vector.load %arg8[%c0_60, %c0_61] : memref<32x32xf32, #tpu.memory_space<vmem>>, vector<32x32xf32>
    %cst_62 = arith.constant dense<0.000000e+00> : vector<8x32xf32>
    %149 = tpu.matmul %147, %148, %cst_62 {dimension_numbers = #tpu.dot_dimension_numbers<[1], [0], [0], [1], [0, 0, 1, 1], [], []>} : vector<8x32xf32>, vector<32x32xf32>, vector<8x32xf32> -> vector<8x32xf32>
    %c0_63 = arith.constant 0 : index
    %c0_64 = arith.constant 0 : index
    %150 = vector.load %arg9[%c0_63, %c0_64] : memref<1x32xf32, #tpu.memory_space<vmem>>, vector<1x32xf32>
    %151 = vector.shape_cast %150 : vector<1x32xf32> to vector<32xf32>
    %152 = vector.shape_cast %151 : vector<32xf32> to vector<1x32xf32>
    %153 = vector.broadcast %152 : vector<1x32xf32> to vector<8x32xf32>
    %154 = arith.addf %149, %153 : vector<8x32xf32>
    %155 = arith.addf %154, %1 : vector<8x32xf32>
    %156 = vector.broadcast %18 : vector<8x1xf32> to vector<8x32xf32>
    %157 = arith.mulf %155, %156 : vector<8x32xf32>
    %c0_65 = arith.constant 0 : index
    %c0_66 = arith.constant 0 : index
    %158 = vector.load %arg10[%c0_65, %c0_66] : memref<1x32xf32, #tpu.memory_space<vmem>>, vector<1x32xf32>
    %159 = vector.shape_cast %158 : vector<1x32xf32> to vector<32xf32>
    %c0_67 = arith.constant 0 : index
    %c0_68 = arith.constant 0 : index
    %160 = vector.load %arg11[%c0_67, %c0_68] : memref<1x32xf32, #tpu.memory_space<vmem>>, vector<1x32xf32>
    %161 = vector.shape_cast %160 : vector<1x32xf32> to vector<32xf32>
    %cst_69 = arith.constant dense<0.000000e+00> : vector<8xf32>
    %162 = vector.multi_reduction <add>, %157, %cst_69 [1] : vector<8x32xf32> to vector<8xf32>
    %163 = vector.shape_cast %162 : vector<8xf32> to vector<8x1xf32>
    %cst_70 = arith.constant 3.200000e+01 : f32
    %164 = vector.broadcast %cst_70 : f32 to vector<8x1xf32>
    %165 = arith.divf %163, %164 : vector<8x1xf32>
    %166 = vector.broadcast %165 : vector<8x1xf32> to vector<8x32xf32>
    %167 = arith.subf %157, %166 : vector<8x32xf32>
    %168 = arith.mulf %167, %167 : vector<8x32xf32>
    %cst_71 = arith.constant dense<0.000000e+00> : vector<8xf32>
    %169 = vector.multi_reduction <add>, %168, %cst_71 [1] : vector<8x32xf32> to vector<8xf32>
    %170 = vector.shape_cast %169 : vector<8xf32> to vector<8x1xf32>
    %cst_72 = arith.constant 3.200000e+01 : f32
    %171 = vector.broadcast %cst_72 : f32 to vector<8x1xf32>
    %172 = arith.divf %170, %171 : vector<8x1xf32>
    %173 = vector.broadcast %165 : vector<8x1xf32> to vector<8x32xf32>
    %174 = arith.subf %157, %173 : vector<8x32xf32>
    %cst_73 = arith.constant 9.99999997E-7 : f32
    %175 = vector.broadcast %cst_73 : f32 to vector<8x1xf32>
    %176 = arith.addf %172, %175 : vector<8x1xf32>
    %177 = math.rsqrt %176 : vector<8x1xf32>
    %178 = vector.broadcast %177 : vector<8x1xf32> to vector<8x32xf32>
    %179 = arith.mulf %174, %178 : vector<8x32xf32>
    %180 = vector.shape_cast %159 : vector<32xf32> to vector<1x32xf32>
    %181 = vector.broadcast %180 : vector<1x32xf32> to vector<8x32xf32>
    %182 = arith.mulf %179, %181 : vector<8x32xf32>
    %183 = vector.shape_cast %161 : vector<32xf32> to vector<1x32xf32>
    %184 = vector.broadcast %183 : vector<1x32xf32> to vector<8x32xf32>
    %185 = arith.addf %182, %184 : vector<8x32xf32>
    %c0_74 = arith.constant 0 : index
    %c0_75 = arith.constant 0 : index
    %186 = vector.load %arg12[%c0_74, %c0_75] : memref<32x64xf32, #tpu.memory_space<vmem>>, vector<32x64xf32>
    %cst_76 = arith.constant dense<0.000000e+00> : vector<8x64xf32>
    %187 = tpu.matmul %185, %186, %cst_76 {dimension_numbers = #tpu.dot_dimension_numbers<[1], [0], [0], [1], [0, 0, 1, 1], [], []>} : vector<8x32xf32>, vector<32x64xf32>, vector<8x64xf32> -> vector<8x64xf32>
    %c0_77 = arith.constant 0 : index
    %c0_78 = arith.constant 0 : index
    %188 = vector.load %arg13[%c0_77, %c0_78] : memref<1x64xf32, #tpu.memory_space<vmem>>, vector<1x64xf32>
    %189 = vector.shape_cast %188 : vector<1x64xf32> to vector<64xf32>
    %190 = vector.shape_cast %189 : vector<64xf32> to vector<1x64xf32>
    %191 = vector.broadcast %190 : vector<1x64xf32> to vector<8x64xf32>
    %192 = arith.addf %187, %191 : vector<8x64xf32>
    %cst_79 = arith.constant 5.000000e-01 : f32
    %193 = vector.broadcast %cst_79 : f32 to vector<8x64xf32>
    %194 = arith.mulf %193, %192 : vector<8x64xf32>
    %cst_80 = arith.constant 0.707106769 : f32
    %195 = vector.broadcast %cst_80 : f32 to vector<8x64xf32>
    %196 = arith.mulf %192, %195 : vector<8x64xf32>
    %cst_81 = arith.constant 0.000000e+00 : f32
    %197 = vector.broadcast %cst_81 : f32 to vector<8x64xf32>
    %198 = arith.cmpf oge, %196, %197 : vector<8x64xf32>
    %cst_82 = arith.constant 1.000000e+00 : f32
    %cst_83 = arith.constant -1.000000e+00 : f32
    %199 = vector.broadcast %cst_82 : f32 to vector<8x64xf32>
    %200 = vector.broadcast %cst_83 : f32 to vector<8x64xf32>
    %201 = arith.select %198, %199, %200 : vector<8x64xi1>, vector<8x64xf32>
    %202 = math.absf %196 : vector<8x64xf32>
    %cst_84 = arith.constant 0.327591091 : f32
    %203 = vector.broadcast %cst_84 : f32 to vector<8x64xf32>
    %204 = arith.mulf %203, %202 : vector<8x64xf32>
    %cst_85 = arith.constant 1.000000e+00 : f32
    %205 = vector.broadcast %cst_85 : f32 to vector<8x64xf32>
    %206 = arith.addf %205, %204 : vector<8x64xf32>
    %cst_86 = arith.constant 1.000000e+00 : f32
    %207 = vector.broadcast %cst_86 : f32 to vector<8x64xf32>
    %208 = arith.divf %207, %206 : vector<8x64xf32>
    %cst_87 = arith.constant 1.06140542 : f32
    %209 = vector.broadcast %cst_87 : f32 to vector<8x64xf32>
    %210 = arith.mulf %209, %208 : vector<8x64xf32>
    %cst_88 = arith.constant -1.45315206 : f32
    %211 = vector.broadcast %cst_88 : f32 to vector<8x64xf32>
    %212 = arith.addf %210, %211 : vector<8x64xf32>
    %213 = arith.mulf %212, %208 : vector<8x64xf32>
    %cst_89 = arith.constant 1.42141378 : f32
    %214 = vector.broadcast %cst_89 : f32 to vector<8x64xf32>
    %215 = arith.addf %213, %214 : vector<8x64xf32>
    %216 = arith.mulf %215, %208 : vector<8x64xf32>
    %cst_90 = arith.constant -0.284496725 : f32
    %217 = vector.broadcast %cst_90 : f32 to vector<8x64xf32>
    %218 = arith.addf %216, %217 : vector<8x64xf32>
    %219 = arith.mulf %218, %208 : vector<8x64xf32>
    %cst_91 = arith.constant 0.254829586 : f32
    %220 = vector.broadcast %cst_91 : f32 to vector<8x64xf32>
    %221 = arith.addf %219, %220 : vector<8x64xf32>
    %222 = arith.mulf %221, %208 : vector<8x64xf32>
    %cst_92 = arith.constant 0.000000e+00 : f32
    %223 = vector.broadcast %cst_92 : f32 to vector<8x64xf32>
    %224 = arith.subf %223, %202 : vector<8x64xf32>
    %225 = arith.mulf %224, %202 : vector<8x64xf32>
    %226 = math.exp %225 : vector<8x64xf32>
    %227 = arith.mulf %222, %226 : vector<8x64xf32>
    %cst_93 = arith.constant 1.000000e+00 : f32
    %228 = vector.broadcast %cst_93 : f32 to vector<8x64xf32>
    %229 = arith.subf %228, %227 : vector<8x64xf32>
    %230 = arith.mulf %201, %229 : vector<8x64xf32>
    %cst_94 = arith.constant 1.000000e+00 : f32
    %231 = vector.broadcast %cst_94 : f32 to vector<8x64xf32>
    %232 = arith.addf %231, %230 : vector<8x64xf32>
    %233 = arith.mulf %194, %232 : vector<8x64xf32>
    %c0_95 = arith.constant 0 : index
    %c0_96 = arith.constant 0 : index
    %234 = vector.load %arg14[%c0_95, %c0_96] : memref<64x32xf32, #tpu.memory_space<vmem>>, vector<64x32xf32>
    %cst_97 = arith.constant dense<0.000000e+00> : vector<8x32xf32>
    %235 = tpu.matmul %233, %234, %cst_97 {dimension_numbers = #tpu.dot_dimension_numbers<[1], [0], [0], [1], [0, 0, 1, 1], [], []>} : vector<8x64xf32>, vector<64x32xf32>, vector<8x32xf32> -> vector<8x32xf32>
    %c0_98 = arith.constant 0 : index
    %c0_99 = arith.constant 0 : index
    %236 = vector.load %arg15[%c0_98, %c0_99] : memref<1x32xf32, #tpu.memory_space<vmem>>, vector<1x32xf32>
    %237 = vector.shape_cast %236 : vector<1x32xf32> to vector<32xf32>
    %238 = vector.shape_cast %237 : vector<32xf32> to vector<1x32xf32>
    %239 = vector.broadcast %238 : vector<1x32xf32> to vector<8x32xf32>
    %240 = arith.addf %235, %239 : vector<8x32xf32>
    %241 = arith.addf %240, %157 : vector<8x32xf32>
    %242 = vector.broadcast %18 : vector<8x1xf32> to vector<8x32xf32>
    %243 = arith.mulf %241, %242 : vector<8x32xf32>
    %244 = vector.shape_cast %243 : vector<8x32xf32> to vector<1x8x32xf32>
    %c0_100 = arith.constant 0 : index
    %c0_101 = arith.constant 0 : index
    %c0_102 = arith.constant 0 : index
    %245 = vector.load %arg16[%c0_100, %c0_101, %c0_102] : memref<1x8x32xf32, #tpu.memory_space<vmem>>, vector<1x8x32xf32>
    tpu.vector_store %arg16[%c0_100, %c0_101, %c0_102], %244 {strides = array<i32>} : memref<1x8x32xf32, #tpu.memory_space<vmem>>, vector<1x8x32xf32>,
    return
  }
  func.func @transform_0(%arg0: i32, %arg1: memref<2xi32, #tpu.memory_space<smem>>) -> (i32, i32, i32) {
    %c0_i32 = arith.constant 0 : i32
    %c0_i32_0 = arith.constant 0 : i32
    %c0_i32_1 = arith.constant 0 : i32
    return %arg0, %c0_i32, %c0_i32_0 : i32, i32, i32
  }
  func.func @transform_1(%arg0: i32, %arg1: memref<2xi32, #tpu.memory_space<smem>>) -> (i32, i32) {
    %c0_i32 = arith.constant 0 : i32
    %c0_i32_0 = arith.constant 0 : i32
    %c0_i32_1 = arith.constant 0 : i32
    return %c0_i32, %c0_i32_0 : i32, i32
  }
  func.func @transform_2(%arg0: i32, %arg1: memref<2xi32, #tpu.memory_space<smem>>) -> (i32, i32) {
    %c0_i32 = arith.constant 0 : i32
    %c0_i32_0 = arith.constant 0 : i32
    %c0_i32_1 = arith.constant 0 : i32
    return %c0_i32, %c0_i32_0 : i32, i32
  }
  func.func @transform_3(%arg0: i32, %arg1: memref<2xi32, #tpu.memory_space<smem>>) -> (i32, i32) {
    %c0_i32 = arith.constant 0 : i32
    %c0_i32_0 = arith.constant 0 : i32
    %c0_i32_1 = arith.constant 0 : i32
    return %c0_i32, %c0_i32_0 : i32, i32
  }
  func.func @transform_4(%arg0: i32, %arg1: memref<2xi32, #tpu.memory_space<smem>>) -> (i32, i32) {
    %c0_i32 = arith.constant 0 : i32
    %c0_i32_0 = arith.constant 0 : i32
    %c0_i32_1 = arith.constant 0 : i32
    return %c0_i32, %c0_i32_0 : i32, i32
  }
  func.func @transform_5(%arg0: i32, %arg1: memref<2xi32, #tpu.memory_space<smem>>) -> (i32, i32) {
    %c0_i32 = arith.constant 0 : i32
    %c0_i32_0 = arith.constant 0 : i32
    %c0_i32_1 = arith.constant 0 : i32
    return %c0_i32, %c0_i32_0 : i32, i32
  }
  func.func @transform_6(%arg0: i32, %arg1: memref<2xi32, #tpu.memory_space<smem>>) -> (i32, i32) {
    %c0_i32 = arith.constant 0 : i32
    %c0_i32_0 = arith.constant 0 : i32
    %c0_i32_1 = arith.constant 0 : i32
    return %c0_i32, %c0_i32_0 : i32, i32
  }
  func.func @transform_7(%arg0: i32, %arg1: memref<2xi32, #tpu.memory_space<smem>>) -> (i32, i32) {
    %c0_i32 = arith.constant 0 : i32
    %c0_i32_0 = arith.constant 0 : i32
    %c0_i32_1 = arith.constant 0 : i32
    return %c0_i32, %c0_i32_0 : i32, i32
  }
  func.func @transform_8(%arg0: i32, %arg1: memref<2xi32, #tpu.memory_space<smem>>) -> (i32, i32) {
    %c0_i32 = arith.constant 0 : i32
    %c0_i32_0 = arith.constant 0 : i32
    %c0_i32_1 = arith.constant 0 : i32
    return %c0_i32, %c0_i32_0 : i32, i32
  }
  func.func @transform_9(%arg0: i32, %arg1: memref<2xi32, #tpu.memory_space<smem>>) -> (i32, i32) {
    %c0_i32 = arith.constant 0 : i32
    %c0_i32_0 = arith.constant 0 : i32
    %c0_i32_1 = arith.constant 0 : i32
    return %c0_i32, %c0_i32_0 : i32, i32
  }
  func.func @transform_10(%arg0: i32, %arg1: memref<2xi32, #tpu.memory_space<smem>>) -> (i32, i32) {
    %c0_i32 = arith.constant 0 : i32
    %c0_i32_0 = arith.constant 0 : i32
    %c0_i32_1 = arith.constant 0 : i32
    return %c0_i32, %c0_i32_0 : i32, i32
  }
  func.func @transform_11(%arg0: i32, %arg1: memref<2xi32, #tpu.memory_space<smem>>) -> (i32, i32) {
    %c0_i32 = arith.constant 0 : i32
    %c0_i32_0 = arith.constant 0 : i32
    %c0_i32_1 = arith.constant 0 : i32
    return %c0_i32, %c0_i32_0 : i32, i32
  }
  func.func @transform_12(%arg0: i32, %arg1: memref<2xi32, #tpu.memory_space<smem>>) -> (i32, i32) {
    %c0_i32 = arith.constant 0 : i32
    %c0_i32_0 = arith.constant 0 : i32
    %c0_i32_1 = arith.constant 0 : i32
    return %c0_i32, %c0_i32_0 : i32, i32
  }
  func.func @transform_13(%arg0: i32, %arg1: memref<2xi32, #tpu.memory_space<smem>>) -> (i32, i32) {
    %c0_i32 = arith.constant 0 : i32
    %c0_i32_0 = arith.constant 0 : i32
    %c0_i32_1 = arith.constant 0 : i32
    return %c0_i32, %c0_i32_0 : i32, i32
  }
  func.func @transform_14(%arg0: i32, %arg1: memref<2xi32, #tpu.memory_space<smem>>) -> (i32, i32, i32) {
    %c0_i32 = arith.constant 0 : i32
    %c0_i32_0 = arith.constant 0 : i32
    %c0_i32_1 = arith.constant 0 : i32
    return %arg0, %c0_i32, %c0_i32_0 : i32, i32, i32
  }
  func.func @transform_15(%arg0: i32, %arg1: memref<2xi32, #tpu.memory_space<smem>>) -> (i32, i32, i32, i32) {
    %c0_i32 = arith.constant 0 : i32
    %c0_i32_0 = arith.constant 0 : i32
    %c0_i32_1 = arith.constant 0 : i32
    %c0_i32_2 = arith.constant 0 : i32
    return %arg0, %c0_i32, %c0_i32_0, %c0_i32_1 : i32, i32, i32, i32
  }
}

</mosaic_0001>

<bundles_post_ra>
// kernel: tpu_custom_call.1
= control target key start
LH: loop header
LB: loop body
LE: loop exit
PB: predicated region body
PF: predicated region fallthrough
CT: control target
= control target key end

     0   :  { %s1812_s24 = smov [#allocation4]   ;;  %s2277_s0 = inlined_call_operand.hbm [shape: s32[2], index: 0, kind: input, shape index: {}]   ;;  %s2278_s1 = inlined_call_operand.hbm [shape: f32[2,8,32], index: 1, kind: input, shape index: {}]   ;;  %s2279_s2 = inlined_call_operand.vmem [shape: f32[1,32], index: 2, kind: input, shape index: {}]   ;;  %s2280_s3 = inlined_call_operand.hbm [shape: f32[1,32], index: 3, kind: input, shape index: {}]   ;;  %s2281_s4 = inlined_call_operand.vmem [shape: f32[32,32], index: 4, kind: input, shape index: {}]   ;;  %s2282_s5 = inlined_call_operand.vmem [shape: f32[32,32], index: 5, kind: input, shape index: {}]   ;;  %s2283_s6 = inlined_call_operand.vmem [shape: f32[32,32], index: 6, kind: input, shape index: {}]   ;;  %s2284_s7 = inlined_call_operand.hbm [shape: f32[32,32], index: 7, kind: input, shape index: {}]   ;;  %s2285_s8 = inlined_call_operand.vmem [shape: f32[1,32], index: 8, kind: input, shape index: {}]   ;;  %s2286_s9 = inlined_call_operand.vmem [shape: f32[1,32], index: 9, kind: input, shape index: {}]   ;;  %s2287_s10 = inlined_call_operand.vmem [shape: f32[1,32], index: 10, kind: input, shape index: {}]   ;;  %s2288_s11 = inlined_call_operand.hbm [shape: f32[32,64], index: 11, kind: input, shape index: {}]   ;;  %s2289_s12 = inlined_call_operand.vmem [shape: f32[1,64], index: 12, kind: input, shape index: {}]   ;;  %s2290_s13 = inlined_call_operand.vmem [shape: f32[64,32], index: 13, kind: input, shape index: {}]   ;;  %s2291_s14 = inlined_call_operand.vmem [shape: f32[1,32], index: 14, kind: input, shape index: {}]   ;;  %s2292_s15 = inlined_call_operand.hbm [shape: f32[2,8,32], index: 15, kind: output, shape index: {0}]   ;;  %s2293_s16 = inlined_call_operand.hbm [shape: f32[2,4,8,8], index: 16, kind: output, shape index: {1}]  }
   0x1   :  { %2300 = sst [smem:[#allocation26_spill]] %s2277_s0 }
   0x2   :  { %2301 = sst [smem:[#allocation27_spill]] %s2278_s1 }
   0x3   :  { %2302 = sst [smem:[#allocation28_spill]] %s2279_s2 }
   0x4   :  { %2303 = sst [smem:[#allocation29_spill]] %s2280_s3 }
   0x5   :  { %2304 = sst [smem:[#allocation30_spill]] %s2284_s7 }
   0x6   :  { %2305 = sst [smem:[#allocation31_spill]] %s2287_s10 }
   0x7   :  { %2306 = sst [smem:[#allocation32_spill]] %s2288_s11 }
   0x8   :  { %2307 = sst [smem:[#allocation33_spill]] %s2292_s15 }
   0x9   :  { %s2308_s23 = sld [smem:[#allocation26_spill]] }
   0xf   :  { %s23_s10 = sshll.u32 %s2308_s23, 4  ;;  %s24_s10 = int_to_ptr.hbm [resolvable:$true] %s23_s10 }
  0x10   :  { %26 = dma.hbm_to_smem %s24_s10, 16, %s1812_s24, [#allocation3] }
  0x11   :  { %1774 = dma.done.wait [#allocation3], 16 }
  0x12   :  { %1775 = vsyncadd [#allocation3], 4294967280 }
  0x13   :  { %29 = sfence }
  0x14   :  { %30 = vsyncpa [#allocation6], 0 }
  0x15   :  { %32 = vsyncpa [#allocation6 + $0x1], 0 }
  0x16   :  { %33 = vsyncpa [#allocation9], 0 }
  0x17   :  { %34 = vsyncpa [#allocation12], 0 }
  0x18   :  { %35 = vsyncpa [#allocation7], 0 }
  0x19   :  { %37 = vsyncpa [#allocation7 + $0x1], 0 }
  0x1a   :  { %38 = vsyncpa [#allocation15], 0 }
  0x1b   :  { %40 = vsyncpa [#allocation15 + $0x1], 0  ;;  %s1916_s25 = smov 0   ;;  %s1918_s26 = smov 0  }
  0x1c   :  { %s1920_s27 = smov 0   ;;  %s1922_s28 = smov 0  }
  0x1d LB: > { %2309 = sst [smem:[#allocation22_spill]] %s1798_s25  ;;  %s1937_s10 = sadd.s32 4294967295, %s1810_s28   ;;  %s1810_s28 = sphi %s1922_s28, %s2335_s28   ;;  %s1806_s27 = sphi %s1920_s27, %s2332_s27   ;;  %s1802_s26 = sphi %s1918_s26, %s2334_s26   ;;  %s1798_s25 = sphi %s1916_s25, %s2333_s25  }
  0x1e   : > { %2310 = sst [smem:[#allocation23_spill]] %s1806_s27  ;;  %s1396_s29 = sadd.s32 4294967294, %s1810_s28  }
  0x1f   : > { %p66_p0 = scmp.ne.s32.totalorder %s1802_s26, %s1798_s25  ;;  %p67_p1 = scmp.eq.s32.totalorder %s1937_s10, 0 }
  0x20   : > { %p363_p2 = scmp.eq.s32.totalorder %s1937_s10, 1  ;;  %p369_p3 = scmp.eq.s32.totalorder %s1396_s29, 1 }
  0x21   : > { %p1946_p4 = por %p67_p1, %p66_p0  ;;  %p1397_p5 = scmp.ge.s32.totalorder %s1810_s28, 1 }
  0x22   : > { %p1951_p6 = por %p369_p3, %p66_p0  ;;  %p402_p7 = scmp.lt.s32.totalorder %s1810_s28, 3 }
  0x23   : > { %s2314_s3 = sld [smem:[#allocation29_spill]]  ;;  %s1813_s21 = smov [#allocation8]  }
  0x24   : > { %s2312_s0 = scalar_select %p1951_p6, 1, 0 }
  0x25   : > { %p1959_p8 = pnand %p1397_p5, %p402_p7  ;;  %s419_s22 = sshll.u32 %s1813_s21, 4  ;;  %s420_s22 = int_to_ptr.vmem [resolvable:$true] %s419_s22 }
  0x26   : > { %2313 = sst [smem:[#allocation24_spill]] %s2312_s0  ;;  %s1814_s18 = smov [#allocation10]  }
  0x27   : > { %p1460_p10 = pneg %p1959_p8  ;;  %s2316_s7 = sld [smem:[#allocation30_spill]] }
  0x28   : > { %s1815_s21 = smov 128   ;;  %s1816_s23 = smov 8  }
  0x29   : > { %s417_s19 = sshll.u32 %s2314_s3, 4  ;;  %p1971_p11 = pnand %p1460_p10, %p67_p1  ;;  %s418_s19 = int_to_ptr.hbm [resolvable:$true] %s417_s19 }
  0x2a   : > { %s439_s3 = sshll.u32 %s1814_s18, 4  ;;  %s2318_s11 = sld [smem:[#allocation32_spill]]  ;;  %s440_s3 = int_to_ptr.vmem [resolvable:$true] %s439_s3 }
  0x2b   : > { %1463 = dma.hbm_to_vmem [thread:$0]  (!%p1971_p11), %s418_s19, 16, %s420_s22, [#allocation9]  }
  0x2c   : > { %s1817_s18 = smov [#allocation11]   ;;  %s1985_s19 = sadd.s32 1, %s1810_s28  }
  0x2d   : > { %s437_s29 = sshll.u32 %s2316_s7, 4  ;;  %s462_s25 = sshll.u32 %s1817_s18, 4  ;;  %s438_s29 = int_to_ptr.hbm [resolvable:$true] %s437_s29  ;;  %s463_s25 = int_to_ptr.vmem [resolvable:$true] %s462_s25 }
  0x2e   : > { %1466 = dma.hbm_to_vmem [thread:$0]  (!%p1971_p11), %s438_s29, 512, %s440_s3, [#allocation9], %s1815_s21, %s1815_s21, %s1816_s23  }
  0x2f   : > { %s50_s22 = ssub.s32 %s1810_s28, %s1985_s19  ;;  %s53_s15 = sadd.s32 1, %s1806_s27 }
  0x30   : > { %s460_s0 = sshll.u32 %s2318_s11, 4  ;;  %p51_p12 = scmp.eq.s32.totalorder %s50_s22, 0  ;;  %s461_s0 = int_to_ptr.hbm [resolvable:$true] %s460_s0 }
  0x31   : > { %1469 = dma.hbm_to_vmem [thread:$0]  (!%p1971_p11), %s461_s0, 512, %s463_s25, [#allocation12], %s1815_s21, %s1815_s21, %s1816_s23  }
  0x32   : > { %p60_p13 = scmp.ne.s32.totalorder %s1806_s27, %s1802_s26  ;;  %p61_p0 = scmp.eq.s32.totalorder %s1810_s28, 0 }
  0x33   : > { %s1994_s3 = scalar_select %p51_p12, %s1806_s27, %s53_s15  }
  0x34   : > { %p1998_p3 = por %p363_p2, %p60_p13  ;;  %p1484_p5 = scmp.lt.s32.totalorder %s1810_s28, 2 }
  0x35   : > { %2319 = sst [smem:[#allocation25_spill]] %s1994_s3  ;;  %s485_s29 = sand.u32 1, %s1806_s27  }
  0x36   : > { %s1403_s24 = sshll.u32 %s1810_s28, 3  ;;  %p62_p7 = por %p61_p0, %p60_p13 }
  0x37   : > { %s1402_s25 = sshll.u32 %s485_s29, 3  ;;  %s2321_s1 = sld [smem:[#allocation27_spill]] }
  0x38   : > { %s489_s18 = scalar_lea.vmem [#allocation5], %s1402_s25  ;;  %p2008_p10 = pnand %p1484_p5, %p62_p7 }
  0x39   : > { %s497_s22 = sshll.u32 %s489_s18, 4  ;;  %s486_s11 = scalar_lea.sflag [#allocation6], %s485_s29  ;;  %s498_s22 = int_to_ptr.vmem [resolvable:$true] %s497_s22 }
  0x3a   : > { %p1676_p11 = pneg %p2008_p10 }
  0x3d   : > { %s493_s21 = scalar_lea.hbm %s2321_s1, %s1403_s24  ;;  %s1679_s25 = scalar_lea.hbm %s2321_s1, 16 }
  0x3e   : > { %s495_s23 = sshll.u32 %s493_s21, 4  ;;  %s496_s23 = int_to_ptr.hbm [resolvable:$true] %s495_s23 }
  0x3f   : > { %s1672_s3 = sshra.s32 %s496_s23, 4  ;;  %s1673_s3 = int_to_ptr.hbm [resolvable:$true] %s1672_s3 }
  0x40   : > { %s1674_s27 = scalar_lea.hbm %s1673_s3, 8  ;;  %p1680_p0 = scmp.lt.s32.totalorder %s1673_s3, %s2321_s1 }
  0x41   : > { %p1675_p2 = scmp.ne.s32.totalorder %s1673_s3, %s1674_s27  ;;  %p1681_p5 = scmp.lt.s32.totalorder %s1679_s25, %s1674_s27 }
  0x43   : > { %p1677_p12 = pnand %p1676_p11, %p1675_p2  ;;  %p1682_p7 = por %p1681_p5, %p1680_p0 }
  0x45   : > { %p1678_p13 = pneg %p1677_p12 }
  0x47   : > { %p1683_p9 = pnand %p1682_p7, %p1678_p13 }
  0x49   : > { %1686 = shalt.err (!%p1683_p9)
}
  0x4a   : > { %1473 = dma.hbm_to_vmem [thread:$0]  (!%p2008_p10), %s496_s23, 128, %s498_s22, %s486_s11  }
  0x4b   : > { %506 = sbr.rel (%p1959_p8) target bundleno = 1994 (0x7ca), region = 76  ;;  %s2025_s29 = sand.u32 (!%p1959_p8), 1, %s1802_s26  }
  0x4c   : > { %s2298_s18 = sshll.u32 (!%p1959_p8), %s2025_s29, 3  ;;  %s509_s24 = scalar_lea.sflag (!%p1959_p8), [#allocation6], %s2025_s29 }
  0x4d   : > { %s512_s27 = scalar_lea.vmem (!%p1959_p8), [#allocation5], %s2298_s18 }
  0x50   : > { %1777 = dma.done.wait (%p1946_p4), %s509_s24, 128  }
  0x51   : > { %1779 = vsyncadd (%p1946_p4), %s509_s24, 4294967168 }
  0x52   : > { %1781 = dma.done.wait (%p67_p1), [#allocation9], 528  }
  0x53   : > { %1783 = vsyncadd (%p67_p1), [#allocation9], 4294966768 }
  0x54   : > { %1785 = dma.done.wait (%p67_p1), [#allocation12], 512  }
  0x55   : > { %1787 = vsyncadd (%p67_p1), [#allocation12], 4294966784  ;;  %vm598_vm0 = vcmask 261120   ;;  %v2043_v0 = vld [vmem:[%s512_s27] sm:$0xff]  ;;  %v1818_v2 = vmov 32.0   ;;  %v639_v14 = vld [vmem:[%s2281_s4 + $0x18] sm:$0xff]  ;;  %v581_v48 = vlaneseq }
  0x56   : > { %v599_v1 = vsel %vm598_vm0, %v2043_v0, 0.0  ;;  %1544 = vrcp.f32 %v1818_v2  ;;  %v690_v15 = vld [vmem:[%s2283_s6 + $0x18] sm:$0xff]  ;;  %655 = vmatpush.msra.mxu1 %v639_v14  ;;  %v638_v16 = vld [vmem:[%s2281_s4 + $0x10] sm:$0xff]  ;;  %v637_v18 = vld [vmem:[%s2281_s4 + $0x8] sm:$0xff]  ;;  %s2323_s2 = sld [smem:[#allocation28_spill]]  ;;  %vm711_vm5 = vcmask 64512  }
  0x57   : > { %600 = vadd.xlane.f32.xlu0 %v599_v1  ;;  %703 = vmatpush.msra.mxu2 %v690_v15  ;;  %v689_v17 = vld [vmem:[%s2283_s6 + $0x10] sm:$0xff]  ;;  %v688_v19 = vld [vmem:[%s2283_s6 + $0x8] sm:$0xff]  ;;  %v636_v20 = vld [vmem:[%s2281_s4] sm:$0xff]  ;;  %s1819_s11 = smov 104   ;;  %s1820_s30 = smov 120   ;;  %v2113_v49 = vshrl.u32 %v581_v48, 7 }
  0x58   : > { %656 = vmatpush.msra.mxu1 %v638_v16  ;;  %v687_v21 = vld [vmem:[%s2283_s6] sm:$0xff]  ;;  %v666_v22 = vld [vmem:[%s2282_s5 + $0x18] sm:$0xff]  ;;  %v665_v23 = vld [vmem:[%s2282_s5 + $0x10] sm:$0xff]  ;;  %s1821_s20 = smov 112   ;;  %s2109_s3 = sld [smem:[#allocation4 + %s1937_s10]]  ;;  %v584_v50 = vand.u32 127, %v581_v48 }
  0x59   : > { %704 = vmatpush.msra.mxu2 %v689_v17  ;;  %v664_v24 = vld [vmem:[%s2282_s5 + $0x8] sm:$0xff]  ;;  %v663_v27 = vld [vmem:[%s2282_s5] sm:$0xff]  ;;  %v1538_v38 = vld [vmem:[#allocation8] ss:$0 sm:$0xff]  ;;  %v1822_v53 = vmov 0.0   ;;  %s1410_s23 = sshll.u32 %s2025_s29, 5 }
  0x5a   : > { %657 = vmatpush.msra.mxu1 %v637_v18  ;;  %vm586_vm6 = vcmp.gt.s32.totalorder %v584_v50, %v2113_v49  ;;  %s2143_s22 = scalar_lea.vmem [#allocation14], %s1410_s23  ;;  %s2299_s15 = smov 8  }
  0x5b   : > { %705 = vmatpush.msra.mxu2 %v688_v19  ;;  %s1824_s0 = smov 16   ;;  %s1825_s25 = smov 24  }
  0x5c   : > { %v1545_v3 = vpop.eup %1544  ;;  %658 = vmatpush.msra.mxu1 %v636_v20  ;;  %v1537_v35 = vld [vmem:[%s2323_s2] ss:$0 sm:$0xff]  ;;  %s1441_s27 = sshll.u32 %s1937_s10, 5  ;;  %s1722_s18 = scalar_lea.hbm %s2293_s16, 64 }
  0x5d   : > { %v603_v4 = vmul.f32 32.0, %v1545_v3  ;;  %vm607_vm1 = vweird.f32 %v1545_v3  ;;  %706 = vmatpush.msra.mxu2 %v687_v21 }
  0x5e   : > { %679 = vmatpush.msrb.mxu1 %v666_v22  ;;  %v587_v51 = vstv %s2109_s3  ;;  %s1258_s3 = sshll.u32 %s2143_s22, 4  ;;  %s1259_s3 = int_to_ptr.vmem [resolvable:$true] %s1258_s3 }
  0x5f   : > { %v604_v5 = vsub.f32 1.0, %v603_v4  ;;  %vm588_vm7 = vcmp.ge.s32.totalorder %v584_v50, %v587_v51 }
  0x60   : > { %680 = vmatpush.msrb.mxu1 %v665_v23  ;;  %vm589_vm8 = vmor %vm586_vm6, %vm588_vm7 }
  0x61   : > { %v605_v6 = vmul.f32 %v1545_v3, %v604_v5  ;;  %v1411_v54 = vsel %vm589_vm8, 1.0, %v1822_v53 }
  0x62   : > { %681 = vmatpush.msrb.mxu1 %v664_v24  ;;  %vm595_vm9 = vcmp.gt.f32.partialorder %v1411_v54, 0.5 }
  0x63   : > { %v606_v7 = vadd.f32 %v1545_v3, %v605_v6 }
  0x64   : > { %682 = vmatpush.msrb.mxu1 %v663_v27 }
  0x65   : > { %v2047_v8 = vsel %vm607_vm1, %v1545_v3, %v606_v7 }
  0xca   : > { %v601_v9 = vpop.xlane.xlu0 %600 }
  0xcb   : > { %v609_v10 = vmul.f32 %v2047_v8, %v601_v9 }
  0xcd   : > { %v610_v11 = vsub.f32 %v2043_v0, %v609_v10 }
  0xcf   : > { %v611_v12 = vmul.f32 %v610_v11, %v610_v11 }
  0xd1   : > { %v612_v13 = vsel %vm598_vm0, %v611_v12, 0.0 }
  0xd2   : > { %613 = vadd.xlane.f32.xlu0 %v612_v13 }
 0x145   : > { %v614_v25 = vpop.xlane.xlu0 %613 }
 0x146   : > { %v615_v26 = vmul.f32 %v614_v25, %v2047_v8 }
 0x148   : > { %v616_v28 = vadd.f32 1e-06, %v615_v26 }
 0x14a   : > { %1546 = vrsqrt.f32 %v616_v28  ;;  %vm623_vm3 = vweird.f32 %v616_v28 }
 0x150   : > { %v1547_v29 = vpop.eup %1546 }
 0x151   : > { %v618_v30 = vmul.f32 %v1547_v29, %v616_v28  ;;  %vm624_vm2 = vweird.f32 %v1547_v29 }
 0x152   : > { %vm625_vm4 = vmor %vm623_vm3, %vm624_vm2 }
 0x153   : > { %v619_v31 = vmul.f32 %v1547_v29, %v618_v30 }
 0x155   : > { %v620_v32 = vmul.f32 0.5, %v619_v31 }
 0x157   : > { %v621_v33 = vsub.f32 1.5, %v620_v32 }
 0x159   : > { %v622_v34 = vmul.f32 %v1547_v29, %v621_v33 }
 0x15b   : > { %v626_v36 = vsel %vm625_vm4, %v1547_v29, %v622_v34 }
 0x15c   : > { %v627_v37 = vmul.f32 %v626_v36, %v610_v11 }
 0x15e   : > { %v631_v39 = vmul.f32 %v1537_v35, %v627_v37 }
 0x160   : > { %v635_v40 = vadd.f32 %v1538_v38, %v631_v39 }
 0x162   : > { %1413 = vmatmul.msk.f32.vlgmr.msra.gmra.mxu1 %vm598_vm0, %v635_v40  ;;  %1415 = vmatmul.msk.f32.vlgmr.msra.gmra.mxu2 %vm598_vm0, %v635_v40 }
 0x16a   : > { %1414 = vmatmul.msk.f32.vlgmr.msrb.gmra.mxu1 %vm598_vm0, %v635_v40 }
 0x1df   : > { %v660_v41 = vpop.f32.mrf.mxu1 }
 0x1e5   : > { %v2097_v43 = vpop.f32.mrf.mxu2 }
 0x1e7   : > { %v684_v42 = vpop.f32.mrf.mxu1 }
 0x1e8   : > { %965 = vrot.lane.b32.xlu0 %v684_v42, %s1819_s11  ;;  %790 = vrot.lane.b32.xlu2 %v684_v42, %s1820_s30 }
 0x1e9   : > { %878 = vrot.lane.b32.xlu1 %v684_v42, %s1821_s20  ;;  %1416 = vmatpush.xpose.msk.msra.mxu3 %vm711_vm5, %v684_v42 }
 0x1ec   : > { %1417 = vmatmul.msk.f32.vlgmr.msra.gmra.mxu3 %vm711_vm5, %v660_v41 }
 0x1ed   : > { %782 = vmatpush.msrb.mxu3 %v2097_v43 }
 0x1f0   : > { %788 = vrot.lane.b32.xlu2 %v660_v41, %s1820_s30 }
 0x1f1   : > { %876 = vrot.lane.b32.xlu1 %v660_v41, %s1821_s20 }
 0x1f9   : > { %963 = vrot.lane.b32.xlu1 %v660_v41, %s1819_s11 }
 0x242   : > { %v791_v44 = vpop.permute.xlu2 %790 }
 0x243   : > { %1419 = vmatpush.xpose.msk.msra.mxu0 %vm711_vm5, %v791_v44 }
 0x24a   : > { %v789_v45 = vpop.permute.xlu2 %788 }
 0x24b   : > { %1420 = vmatmul.msk.f32.vlgmr.msra.gmra.mxu0 %vm711_vm5, %v789_v45 }
 0x25a   : > { %v966_v46 = vpop.permute.xlu0 %965 }
 0x25b   : > { %v879_v47 = vpop.permute.xlu1 %878  ;;  %1427 = vmatpush.xpose.msk.msrb.mxu0 %vm711_vm5, %v966_v46 }
 0x25c   : > { %1423 = vmatpush.xpose.msk.msrb.mxu2 %vm711_vm5, %v879_v47 }
 0x263   : > { %v877_v52 = vpop.permute.xlu1 %876 }
 0x264   : > { %1424 = vmatmul.msk.f32.vlgmr.msrb.gmra.mxu2 %vm711_vm5, %v877_v52 }
 0x26b   : > { %v964_v55 = vpop.permute.xlu1 %963 }
 0x26c   : > { %1428 = vmatmul.msk.f32.vlgmr.msrb.gmra.mxu0 %vm711_vm5, %v964_v55 }
 0x26f   : > { %v735_v56 = vpop.f32.mrf.mxu3 }
 0x270   : > { %v738_v57 = vsel %vm595_vm9, -1e+09, %v735_v56 }
 0x271   : > { %v739_v58 = vsel %vm711_vm5, %v738_v57, -inf }
 0x272   : > { %740 = vmax.xlane.f32.xlu2 %v739_v58 }
 0x2c8   : > { %v813_v59 = vpop.f32.mrf.mxu0 }
 0x2c9   : > { %v816_v60 = vsel %vm595_vm9, -1e+09, %v813_v59 }
 0x2ca   : > { %v817_v61 = vsel %vm711_vm5, %v816_v60, -inf }
 0x2cb   : > { %818 = vmax.xlane.f32.xlu1 %v817_v61 }
 0x2e5   : > { %v741_v62 = vpop.xlane.xlu2 %740 }
 0x2e6   : > { %v742_v63 = vsub.f32 %v738_v57, %v741_v62 }
 0x2e7   : > { %v901_v1 = vpop.f32.mrf.mxu2 }
 0x2e8   : > { %v743_v2 = vmul.f32 1.442695, %v742_v63  ;;  %v904_v3 = vsel %vm595_vm9, -1e+09, %v901_v1 }
 0x2e9   : > { %v988_v4 = vpop.f32.mrf.mxu0  ;;  %v905_v5 = vsel %vm711_vm5, %v904_v3, -inf }
 0x2ea   : > { %1548 = vpow2.f32 %v743_v2  ;;  %v991_v6 = vsel %vm595_vm9, -1e+09, %v988_v4  ;;  %906 = vmax.xlane.f32.xlu0 %v905_v5 }
 0x2eb   : > { %v992_v7 = vsel %vm711_vm5, %v991_v6, -inf }
 0x2ec   : > { %993 = vmax.xlane.f32.xlu2 %v992_v7 }
 0x2f0   : > { %v1549_v9 = vpop.eup %1548 }
 0x2f1   : > { %v745_v10 = vsel %vm711_vm5, %v1549_v9, 0.0 }
 0x2f4   : > { %746 = vadd.xlane.f32.xlu2 %v745_v10 }
 0x2fe   : > { %844 = vrot.lane.b32.xlu0 %v2097_v43, %s1820_s30 }
 0x33e   : > { %v819_v11 = vpop.xlane.xlu1 %818 }
 0x33f   : > { %v820_v12 = vsub.f32 %v816_v60, %v819_v11 }
 0x341   : > { %v821_v13 = vmul.f32 1.442695, %v820_v12 }
 0x343   : > { %1550 = vpow2.f32 %v821_v13 }
 0x349   : > { %v1551_v14 = vpop.eup %1550 }
 0x34a   : > { %v823_v15 = vsel %vm711_vm5, %v1551_v14, 0.0 }
 0x34b   : > { %824 = vadd.xlane.f32.xlu1 %v823_v15 }
 0x35d   : > { %v907_v16 = vpop.xlane.xlu0 %906 }
 0x35e   : > { %v908_v17 = vsub.f32 %v904_v3, %v907_v16 }
 0x35f   : > { %v994_v18 = vpop.xlane.xlu2 %993 }
 0x360   : > { %v909_v19 = vmul.f32 1.442695, %v908_v17  ;;  %v995_v20 = vsub.f32 %v991_v6, %v994_v18 }
 0x362   : > { %1552 = vpow2.f32 %v909_v19  ;;  %v996_v21 = vmul.f32 1.442695, %v995_v20 }
 0x364   : > { %1554 = vpow2.f32 %v996_v21 }
 0x367   : > { %v747_v22 = vpop.xlane.xlu2 %746 }
 0x368   : > { %v2134_v23 = vpop.eup %1552  ;;  %1556 = vrcp.f32 %v747_v22  ;;  %v759_v31 = vand.u32 2147483648, %v747_v22  ;;  %v757_v33 = vand.u32 2147483647, %v747_v22  ;;  %vm753_vm11 = vweird.f32 %v747_v22 }
 0x369   : > { %v911_v24 = vsel %vm711_vm5, %v2134_v23, 0.0 }
 0x36a   : > { %v2138_v25 = vpop.eup %1554  ;;  %912 = vadd.xlane.f32.xlu2 %v911_v24  ;;  %v760_v35 = vor.u32 1.1754944e-38, %v759_v31  ;;  %vm758_vm13 = vcmp.eq.f32.partialorder %v757_v33, 8.507059e+37  ;;  %v1053_v24 = vld [vmem:[#allocation10 + $0x10] sm:$0xff] }
 0x36b   : > { %v998_v26 = vsel %vm711_vm5, %v2138_v25, 0.0 }
 0x36c   : > { %999 = vadd.xlane.f32.xlu1 %v998_v26  ;;  %v1051_v26 = vld [vmem:[#allocation10] sm:$0xff] }
 0x36e   : > { %v1557_v27 = vpop.eup %1556 }
 0x36f   : > { %v749_v28 = vmul.f32 %v1557_v27, %v747_v22  ;;  %vm754_vm10 = vweird.f32 %v1557_v27 }
 0x370   : > { %v845_v29 = vpop.permute.xlu0 %844  ;;  %vm755_vm12 = vmor %vm753_vm11, %vm754_vm10 }
 0x371   : > { %v750_v30 = vsub.f32 1.0, %v749_v28  ;;  %865 = vmatpush.msra.mxu1 %v845_v29 }
 0x373   : > { %v751_v32 = vmul.f32 %v1557_v27, %v750_v30  ;;  %v1539_v30 = vld [vmem:[%s2285_s8] ss:$0 sm:$0xff] }
 0x375   : > { %v752_v34 = vadd.f32 %v1557_v27, %v751_v32 }
 0x377   : > { %v756_v36 = vsel %vm755_vm12, %v1557_v27, %v752_v34  ;;  %vm874_vm12 = vcmask 130112  }
 0x378   : > { %v761_v37 = vsel %vm758_vm13, %v760_v35, %v756_v36  ;;  %vm961_vm13 = vcmask 195712  }
 0x379   : > { %v762_v38 = vmul.f32 %v1549_v9, %v761_v37 }
 0x37b   : > { %763 = vst.msk [vmem:[%s2143_s22] sm:$0xff] %vm711_vm5, %v762_v38  ;;  %1418 = vmatmul.msk.f32.vlgmr.msrb.gmra.mxu3 %vm711_vm5, %v762_v38 }
 0x382   : > { %931 = vrot.lane.b32.xlu2 %v2097_v43, %s1821_s20  ;;  %s2324_s20 = sld [smem:[#allocation31_spill]] }
 0x385   : > { %1018 = vrot.lane.b32.xlu1 %v2097_v43, %s1819_s11 }
 0x3be   : > { %v825_v39 = vpop.xlane.xlu1 %824 }
 0x3bf   : > { %1558 = vrcp.f32 %v825_v39  ;;  %v837_v44 = vand.u32 2147483648, %v825_v39  ;;  %v835_v46 = vand.u32 2147483647, %v825_v39  ;;  %vm831_vm15 = vweird.f32 %v825_v39 }
 0x3c1   : > { %v838_v48 = vor.u32 1.1754944e-38, %v837_v44  ;;  %vm836_vm2 = vcmp.eq.f32.partialorder %v835_v46, 8.507059e+37 }
 0x3c5   : > { %v1559_v40 = vpop.eup %1558 }
 0x3c6   : > { %v827_v41 = vmul.f32 %v1559_v40, %v825_v39  ;;  %vm832_vm14 = vweird.f32 %v1559_v40 }
 0x3c7   : > { %vm833_vm1 = vmor %vm831_vm15, %vm832_vm14  ;;  %vm592_vm14 = vcmp.lt.s32.totalorder %v2113_v49, %v587_v51 }
 0x3c8   : > { %v828_v42 = vsub.f32 1.0, %v827_v41  ;;  %v2173_v33 = vsel %vm592_vm14, 1.0, %v1822_v53  ;;  %v1119_v53 = vld [vmem:[#allocation11 + $0x18] sm:$0xff]  ;;  %v1116_v41 = vld [vmem:[#allocation11] sm:$0xff] }
 0x3ca   : > { %v829_v45 = vmul.f32 %v1559_v40, %v828_v42 }
 0x3cc   : > { %v830_v47 = vadd.f32 %v1559_v40, %v829_v45 }
 0x3ce   : > { %v834_v50 = vsel %vm833_vm1, %v1559_v40, %v830_v47  ;;  %v1118_v40 = vld [vmem:[#allocation11 + $0x10] sm:$0xff] }
 0x3cf   : > { %v839_v52 = vsel %vm836_vm2, %v838_v48, %v834_v50 }
 0x3d0   : > { %v840_v54 = vmul.f32 %v1551_v14, %v839_v52 }
 0x3d2   : > { %1421 = vst.msk [vmem:[%s2143_s22 + $0x8] sm:$0xff] %vm711_vm5, %v840_v54  ;;  %1422 = vmatmul.msk.f32.vlgmr.msra.gmra.mxu1 %vm711_vm5, %v840_v54 }
 0x3dd   : > { %v913_v43 = vpop.xlane.xlu2 %912 }
 0x3de   : > { %1560 = vrcp.f32 %v913_v43  ;;  %v925_v62 = vand.u32 2147483648, %v913_v43  ;;  %v923_v1 = vand.u32 2147483647, %v913_v43  ;;  %vm919_vm4 = vweird.f32 %v913_v43 }
 0x3df   : > { %v1000_v55 = vpop.xlane.xlu1 %999 }
 0x3e0   : > { %1562 = vrcp.f32 %v1000_v55  ;;  %v1012_v3 = vand.u32 2147483648, %v1000_v55  ;;  %v1010_v6 = vand.u32 2147483647, %v1000_v55  ;;  %v926_v7 = vor.u32 1.1754944e-38, %v925_v62 }
 0x3e1   : > { %vm924_vm8 = vcmp.eq.f32.partialorder %v923_v1, 8.507059e+37  ;;  %vm1006_vm9 = vweird.f32 %v1000_v55 }
 0x3e2   : > { %v1013_v12 = vor.u32 1.1754944e-38, %v1012_v3  ;;  %vm1011_vm11 = vcmp.eq.f32.partialorder %v1010_v6, 8.507059e+37  ;;  %v1194_v3 = vld [vmem:[%s2290_s13 + $0x38] sm:$0xff]  ;;  %v1191_v6 = vld [vmem:[%s2290_s13 + $0x20] sm:$0xff] }
 0x3e3   : > { %1211 = vmatpush.msra.mxu0 %v1194_v3 }
 0x3e4   : > { %v1561_v56 = vpop.eup %1560 }
 0x3e5   : > { %v915_v57 = vmul.f32 %v1561_v56, %v913_v43  ;;  %v932_v58 = vpop.permute.xlu2 %931  ;;  %vm920_vm3 = vweird.f32 %v1561_v56  ;;  %v1540_v43 = vld [vmem:[%s2286_s9] ss:$0 sm:$0xff] }
 0x3e6   : > { %v1563_v59 = vpop.eup %1562  ;;  %952 = vmatpush.msra.mxu3 %v932_v58  ;;  %vm921_vm7 = vmor %vm919_vm4, %vm920_vm3 }
 0x3e7   : > { %v916_v60 = vsub.f32 1.0, %v915_v57  ;;  %v1002_v61 = vmul.f32 %v1563_v59, %v1000_v55  ;;  %vm1007_vm6 = vweird.f32 %v1563_v59 }
 0x3e8   : > { %vm1008_vm10 = vmor %vm1006_vm9, %vm1007_vm6  ;;  %1139 = vmatpush.msrb.mxu3 %v1119_v53  ;;  %vm1199_vm9 = vcmask 523264  }
 0x3e9   : > { %v917_v63 = vmul.f32 %v1561_v56, %v916_v60  ;;  %v1003_v2 = vsub.f32 1.0, %v1002_v61 }
 0x3ea   : > { %1140 = vmatpush.msrb.mxu3 %v1118_v40 }
 0x3eb   : > { %v918_v4 = vadd.f32 %v1561_v56, %v917_v63  ;;  %v1004_v5 = vmul.f32 %v1563_v59, %v1003_v2 }
 0x3ed   : > { %v922_v9 = vsel %vm921_vm7, %v1561_v56, %v918_v4  ;;  %v1005_v10 = vadd.f32 %v1563_v59, %v1004_v5  ;;  %v1193_v4 = vld [vmem:[%s2290_s13 + $0x30] sm:$0xff]  ;;  %v1192_v5 = vld [vmem:[%s2290_s13 + $0x28] sm:$0xff] }
 0x3ee   : > { %v927_v11 = vsel %vm924_vm8, %v926_v7, %v922_v9  ;;  %1212 = vmatpush.msra.mxu0 %v1193_v4  ;;  %v1190_v9 = vld [vmem:[%s2290_s13 + $0x18] sm:$0xff] }
 0x3ef   : > { %v1009_v13 = vsel %vm1008_vm10, %v1563_v59, %v1005_v10  ;;  %v928_v14 = vmul.f32 %v2134_v23, %v927_v11  ;;  %v1054_v23 = vld [vmem:[#allocation10 + $0x18] sm:$0xff]  ;;  %v1542_v59 = vld [vmem:[%s2289_s12] ss:$0 sm:$0xff] }
 0x3f0   : > { %v1014_v15 = vsel %vm1011_vm11, %v1013_v12, %v1009_v13  ;;  %1074 = vmatpush.msra.mxu2 %v1054_v23  ;;  %1213 = vmatpush.msra.mxu0 %v1192_v5  ;;  %v1189_v11 = vld [vmem:[%s2290_s13 + $0x10] sm:$0xff] }
 0x3f1   : > { %1425 = vst.msk [vmem:[%s2143_s22 + $0x10] sm:$0xff] %vm711_vm5, %v928_v14  ;;  %1426 = vmatmul.msk.f32.vlgmr.msra.gmra.mxu3 %vm711_vm5, %v928_v14  ;;  %v1015_v16 = vmul.f32 %v2138_v25, %v1014_v15  ;;  %v1052_v25 = vld [vmem:[#allocation10 + $0x8] sm:$0xff] }
 0x3f2   : > { %1075 = vmatpush.msra.mxu2 %v1053_v24  ;;  %1214 = vmatpush.msra.mxu0 %v1191_v6  ;;  %v1188_v14 = vld [vmem:[%s2290_s13 + $0x8] sm:$0xff] }
 0x3f3   : > { %1429 = vst.msk [vmem:[%s2143_s22 + $0x18] sm:$0xff] %vm711_vm5, %v1015_v16 }
 0x3f4   : > { %1076 = vmatpush.msra.mxu2 %v1052_v25  ;;  %1215 = vmatpush.msra.mxu0 %v1190_v9 }
 0x3f6   : > { %1077 = vmatpush.msra.mxu2 %v1051_v26  ;;  %1216 = vmatpush.msra.mxu0 %v1189_v11 }
 0x3f7   : > { %v1019_v17 = vpop.permute.xlu1 %1018 }
 0x3f8   : > { %1039 = vmatpush.msrb.mxu1 %v1019_v17  ;;  %1217 = vmatpush.msra.mxu0 %v1188_v14  ;;  %v1187_v17 = vld [vmem:[%s2290_s13] sm:$0xff] }
 0x3f9   : > { %1430 = vmatmul.msk.f32.vlgmr.msrb.gmra.mxu1 %vm711_vm5, %v1015_v16 }
 0x3fa   : > { %1218 = vmatpush.msra.mxu0 %v1187_v17 }
 0x3fe   : > { %v784_v18 = vpop.f32.mrf.mxu3 }
 0x3ff   : > { %787 = vst.msk [vmem:[#allocation2] sm:$0xff] %vm711_vm5, %v784_v18  ;;  %vm1048_vm5 = vcmask 261312  }
 0x44f   : > { %v867_v19 = vpop.f32.mrf.mxu1 }
 0x450   : > { %871 = vrot.lane.b32.xlu0 %v867_v19, %s2299_s15 }
 0x474   : > { %v954_v20 = vpop.f32.mrf.mxu3 }
 0x475   : > { %958 = vrot.lane.b32.xlu2 %v954_v20, %s1824_s0  ;;  %s1232_s0 = scalar_lea.sflag [#allocation15], %s2025_s29 }
 0x476   : > { %v1041_v21 = vpop.f32.mrf.mxu1 }
 0x477   : > { %1045 = vrot.lane.b32.xlu0 %v1041_v21, %s1825_s25 }
 0x4c2   : > { %v872_v22 = vpop.permute.xlu0 %871 }
 0x4c3   : > { %875 = vst.msk [vmem:[#allocation2] sm:$0xff] %vm874_vm12, %v872_v22 }
 0x4cf   : > { %v959_v27 = vpop.permute.xlu2 %958 }
 0x4d0   : > { %962 = vst.msk [vmem:[#allocation2] sm:$0xff] %vm961_vm13, %v959_v27 }
 0x4e9   : > { %v1046_v28 = vpop.permute.xlu0 %1045 }
 0x4ea   : > { %1049 = vst.msk [vmem:[#allocation2] sm:$0xff] %vm1048_vm5, %v1046_v28 }
 0x4f1   : > { %v1050_v29 = vld [vmem:[#allocation2] sm:$0xff] }
 0x4f2   : > { %1431 = vmatmul.msk.f32.vlgmr.msra.gmra.mxu2 %vm598_vm0, %v1050_v29 }
 0x575   : > { %v1079_v31 = vpop.f32.mrf.mxu2 }
 0x576   : > { %v1080_v32 = vadd.f32 %v1539_v30, %v1079_v31 }
 0x578   : > { %v1082_v34 = vadd.f32 %v1080_v32, %v2043_v0  ;;  %v1117_v0 = vld [vmem:[#allocation11 + $0x8] sm:$0xff] }
 0x579   : > { %1141 = vmatpush.msrb.mxu3 %v1117_v0 }
 0x57a   : > { %v2177_v35 = vmul.f32 %v2173_v33, %v1082_v34 }
 0x57b   : > { %1142 = vmatpush.msrb.mxu3 %v1116_v41 }
 0x57c   : > { %v1086_v36 = vsel %vm598_vm0, %v2177_v35, 0.0 }
 0x57d   : > { %1087 = vadd.xlane.f32.xlu1 %v1086_v36 }
 0x5f0   : > { %v1088_v37 = vpop.xlane.xlu1 %1087 }
 0x5f1   : > { %v1089_v38 = vmul.f32 %v1088_v37, %v2047_v8 }
 0x5f3   : > { %v1090_v39 = vsub.f32 %v2177_v35, %v1089_v38 }
 0x5f5   : > { %v1091_v49 = vmul.f32 %v1090_v39, %v1090_v39 }
 0x5f7   : > { %v1092_v51 = vsel %vm598_vm0, %v1091_v49, 0.0 }
 0x5f8   : > { %1093 = vadd.xlane.f32.xlu2 %v1092_v51 }
 0x66b   : > { %v1094_v42 = vpop.xlane.xlu2 %1093 }
 0x66c   : > { %v1095_v44 = vmul.f32 %v1094_v42, %v2047_v8  ;;  %v1541_v8 = vld [vmem:[%s2324_s20] ss:$0 sm:$0xff]  ;;  %s1257_s20 = scalar_lea.hbm %s2293_s16, %s1441_s27 }
 0x66d   : > { %s1260_s23 = sshll.u32 %s1257_s20, 4  ;;  %s1261_s23 = int_to_ptr.hbm [resolvable:$true] %s1260_s23 }
 0x66e   : > { %v1096_v45 = vadd.f32 1e-06, %v1095_v44  ;;  %s1716_s25 = sshra.s32 %s1261_s23, 4  ;;  %s1717_s25 = int_to_ptr.hbm [resolvable:$true] %s1716_s25 }
 0x66f   : > { %s1718_s17 = scalar_lea.hbm %s1717_s25, 32  ;;  %p1723_p9 = scmp.lt.s32.totalorder %s1717_s25, %s2293_s16 }
 0x670   : > { %1564 = vrsqrt.f32 %v1096_v45  ;;  %vm1103_vm1 = vweird.f32 %v1096_v45  ;;  %p1719_p1 = scmp.ne.s32.totalorder %s1717_s25, %s1718_s17  ;;  %p1724_p10 = scmp.lt.s32.totalorder %s1722_s18, %s1718_s17 }
 0x672   : > { %p1720_p4 = pnand %p1719_p1, %p1998_p3  ;;  %p1725_p2 = por %p1724_p10, %p1723_p9 }
 0x674   : > { %p1721_p8 = pneg %p1720_p4 }
 0x676   : > { %v1565_v46 = vpop.eup %1564  ;;  %p1726_p11 = pnand %p1725_p2, %p1721_p8 }
 0x677   : > { %v1098_v47 = vmul.f32 %v1565_v46, %v1096_v45  ;;  %vm1104_vm15 = vweird.f32 %v1565_v46 }
 0x678   : > { %vm1105_vm2 = vmor %vm1103_vm1, %vm1104_vm15 }
 0x679   : > { %v1099_v48 = vmul.f32 %v1565_v46, %v1098_v47 }
 0x67b   : > { %v1100_v50 = vmul.f32 0.5, %v1099_v48 }
 0x67d   : > { %v1101_v52 = vsub.f32 1.5, %v1100_v50 }
 0x67f   : > { %v1102_v54 = vmul.f32 %v1565_v46, %v1101_v52 }
 0x681   : > { %v1106_v55 = vsel %vm1105_vm2, %v1565_v46, %v1102_v54 }
 0x682   : > { %v1107_v56 = vmul.f32 %v1106_v55, %v1090_v39  ;;  %v1826_v39 = vmov -1.0  }
 0x684   : > { %v1111_v57 = vmul.f32 %v1540_v43, %v1107_v56 }
 0x686   : > { %v1115_v58 = vadd.f32 %v1541_v8, %v1111_v57 }
 0x688   : > { %1432 = vmatmul.msk.f32.vlgmr.msrb.gmra.mxu3 %vm598_vm0, %v1115_v58 }
 0x70b   : > { %v1144_v60 = vpop.f32.mrf.mxu3 }
 0x70c   : > { %v1145_v61 = vadd.f32 %v1542_v59, %v1144_v60 }
 0x70e   : > { %v1148_v62 = vmul.f32 0.70710677, %v1145_v61  ;;  %v1147_v53 = vmul.f32 0.5, %v1145_v61 }
 0x710   : > { %v1151_v63 = vand.u32 2147483647, %v1148_v62  ;;  %vm1149_vm8 = vcmp.ge.f32.partialorder %v1148_v62, 0.0 }
 0x711   : > { %v1150_v49 = vsel %vm1149_vm8, 1.0, %v1826_v39 }
 0x712   : > { %v1152_v1 = vmul.f32 0.3275911, %v1151_v63  ;;  %v1178_v22 = vsub.f32 0.0, %v1151_v63 }
 0x714   : > { %v1153_v2 = vadd.f32 1.0, %v1152_v1  ;;  %v1179_v25 = vmul.f32 %v1178_v22, %v1151_v63 }
 0x716   : > { %1566 = vrcp.f32 %v1153_v2  ;;  %v1165_v13 = vand.u32 2147483648, %v1153_v2  ;;  %v1163_v16 = vand.u32 2147483647, %v1153_v2  ;;  %vm1159_vm4 = vweird.f32 %v1153_v2 }
 0x717   : > { %v1180_v28 = vmul.f32 1.442695, %v1179_v25 }
 0x718   : > { %v1166_v19 = vor.u32 1.1754944e-38, %v1165_v13  ;;  %vm1164_vm7 = vcmp.eq.f32.partialorder %v1163_v16, 8.507059e+37 }
 0x719   : > { %1568 = vpow2.f32 %v1180_v28 }
 0x71c   : > { %v1567_v7 = vpop.eup %1566 }
 0x71d   : > { %v1155_v10 = vmul.f32 %v1567_v7, %v1153_v2  ;;  %vm1160_vm3 = vweird.f32 %v1567_v7 }
 0x71e   : > { %vm1161_vm6 = vmor %vm1159_vm4, %vm1160_vm3 }
 0x71f   : > { %v1156_v12 = vsub.f32 1.0, %v1155_v10  ;;  %v1569_v36 = vpop.eup %1568 }
 0x721   : > { %v1157_v15 = vmul.f32 %v1567_v7, %v1156_v12 }
 0x723   : > { %v1158_v18 = vadd.f32 %v1567_v7, %v1157_v15 }
 0x725   : > { %v1162_v20 = vsel %vm1161_vm6, %v1567_v7, %v1158_v18 }
 0x726   : > { %v1167_v21 = vsel %vm1164_vm7, %v1166_v19, %v1162_v20 }
 0x727   : > { %v1169_v23 = vmul.f32 1.0614054, %v1167_v21 }
 0x729   : > { %v1170_v24 = vadd.f32 -1.4531521, %v1169_v23 }
 0x72b   : > { %v1171_v26 = vmul.f32 %v1170_v24, %v1167_v21 }
 0x72d   : > { %v1172_v27 = vadd.f32 1.4214138, %v1171_v26 }
 0x72f   : > { %v1173_v29 = vmul.f32 %v1172_v27, %v1167_v21 }
 0x731   : > { %v1174_v30 = vadd.f32 -0.28449672, %v1173_v29 }
 0x733   : > { %v1175_v31 = vmul.f32 %v1174_v30, %v1167_v21 }
 0x735   : > { %v1176_v32 = vadd.f32 0.2548296, %v1175_v31 }
 0x737   : > { %v1177_v34 = vmul.f32 %v1176_v32, %v1167_v21 }
 0x739   : > { %v1182_v37 = vmul.f32 %v1569_v36, %v1177_v34 }
 0x73b   : > { %v1183_v38 = vsub.f32 1.0, %v1182_v37 }
 0x73d   : > { %v1184_v51 = vmul.f32 %v1183_v38, %v1150_v49 }
 0x73f   : > { %v1185_v40 = vadd.f32 1.0, %v1184_v51 }
 0x741   : > { %v1186_v0 = vmul.f32 %v1185_v40, %v1147_v53 }
 0x743   : > { %1433 = vmatmul.msk.f32.vlgmr.msra.gmra.mxu0 %vm1199_vm9, %v1186_v0 }
 0x744   : > { %1729 = shalt.err (!%p1726_p11)
}
 0x745   : > { %s1827_s22 = smov 128   ;;  %s2325_s27 = smov 8   ;;  %v1543_v41 = vld [vmem:[%s2291_s14] ss:$0 sm:$0xff] }
 0x746   : > { %1457 = dma.vmem_to_hbm [thread:$0]  (%p1998_p3), %s1259_s3, 512, %s1261_s23, %s1232_s0, %s1827_s22, %s1827_s22, %s2325_s27  }
 0x747   : > { %s1436_s11 = sshll.u32 %s1937_s10, 3  ;;  %s2326_s15 = sld [smem:[#allocation33_spill]] }
 0x748   : > { %s2327_s25 = sshll.u32 %s2025_s29, 3  ;;  %s1227_s10 = scalar_lea.sflag [#allocation7], %s2025_s29 }
 0x749   : > { %s572_s17 = scalar_lea.vmem [#allocation13], %s2327_s25 }
 0x74a   : > { %s1244_s24 = sshll.u32 %s572_s17, 4  ;;  %s1245_s24 = int_to_ptr.vmem [resolvable:$true] %s1244_s24 }
 0x74d   : > { %s1242_s18 = scalar_lea.hbm %s2326_s15, %s1436_s11  ;;  %s1750_s27 = scalar_lea.hbm %s2326_s15, 16 }
 0x74e   : > { %s1246_s2 = sshll.u32 %s1242_s18, 4  ;;  %s1247_s2 = int_to_ptr.hbm [resolvable:$true] %s1246_s2 }
 0x74f   : > { %s1744_s3 = sshra.s32 %s1247_s2, 4  ;;  %s1745_s3 = int_to_ptr.hbm [resolvable:$true] %s1744_s3 }
 0x750   : > { %s1746_s23 = scalar_lea.hbm %s1745_s3, 8  ;;  %p1751_p5 = scmp.lt.s32.totalorder %s1745_s3, %s2326_s15 }
 0x751   : > { %p1747_p12 = scmp.ne.s32.totalorder %s1745_s3, %s1746_s23  ;;  %p1752_p7 = scmp.lt.s32.totalorder %s1750_s27, %s1746_s23 }
 0x753   : > { %p1748_p13 = pnand %p1747_p12, %p1998_p3  ;;  %p1753_p1 = por %p1752_p7, %p1751_p5 }
 0x755   : > { %p1749_p0 = pneg %p1748_p13 }
 0x757   : > { %p1754_p4 = pnand %p1753_p1, %p1749_p0 }
 0x7c0   : > { %v1220_v42 = vpop.f32.mrf.mxu0 }
 0x7c1   : > { %v1221_v44 = vadd.f32 %v1543_v41, %v1220_v42 }
 0x7c3   : > { %v1223_v45 = vadd.f32 %v1221_v44, %v2177_v35 }
 0x7c5   : > { %v1224_v46 = vmul.f32 %v2173_v33, %v1223_v45 }
 0x7c7   : > { %1225 = vst.msk [vmem:[%s572_s17] sm:$0xff] %vm598_vm0, %v1224_v46 }
 0x7c8   : > { %1757 = shalt.err (!%p1754_p4)
}
 0x7c9   : > { %1456 = dma.vmem_to_hbm [thread:$0]  (%p1998_p3), %s1245_s24, 128, %s1247_s2, %s1227_s10  }
 0x7ca PF: > { %s2328_s29 = sld [smem:[#allocation22_spill]]  ;;  %p2330_p8 = scmp.ge.s32.totalorder %s1810_s28, 2 }
 0x7cc   : > { %p1475_p9 = pnand %p2330_p8, %p1951_p6 }
 0x7ce   : > { %p1476_p10 = pneg %p1475_p9 }
 0x7d0   : > { %s1275_s21 = sand.u32 1, %s2328_s29  }
 0x7d1   : > { %s1276_s1 = scalar_lea.sflag [#allocation7], %s1275_s21 }
 0x7d2   : > { %1789 = dma.done.wait (%p1476_p10), %s1276_s1, 128  }
 0x7d3   : > { %1791 = vsyncadd (%p1476_p10), %s1276_s1, 4294967168  ;;  %s1286_s18 = scalar_lea.sflag [#allocation15], %s1275_s21 }
 0x7d4   : > { %1793 = dma.done.wait (%p1476_p10), %s1286_s18, 512  }
 0x7d5   : > { %1795 = vsyncadd (%p1476_p10), %s1286_s18, 4294966784  ;;  %s2331_s17 = sld [smem:[#allocation23_spill]]  ;;  %p43_p3 = scmp.ge.s32.totalorder %s1985_s19, 4  }
 0x7d6   : > { %s2332_s27 = sld [smem:[#allocation25_spill]]  ;;  %s2333_s25 = smov %s1802_s26 }
 0x7d7   : > { %s2335_s28 = smov %s1985_s19  ;;  %45 = sbr.rel (!%p43_p3) target bundleno = 29 (0x1d), region = 153 }
 0x7db   : > { %s2334_s26 = smov %s2331_s17 }
 0x7dc   :  { %1292 = vsyncpa [#allocation6], 1 }
 0x7dd   :  { %1294 = vsyncpa [#allocation6 + $0x1], 1 }
 0x7de   :  { %1295 = vsyncpa [#allocation9], 1 }
 0x7df   :  { %1296 = vsyncpa [#allocation12], 1 }
 0x7e0   :  { %1297 = vsyncpa [#allocation7], 1 }
 0x7e1   :  { %1299 = vsyncpa [#allocation7 + $0x1], 1 }
 0x7e2   :  { %1300 = vsyncpa [#allocation15], 1 }
 0x7e3   :  { %1302 = vsyncpa [#allocation15 + $0x1], 1 }

// kernel: tpu_custom_call.1
= control target key start
LH: loop header
LB: loop body
LE: loop exit
PB: predicated region body
PF: predicated region fallthrough
CT: control target
= control target key end

     0   :  { %s1812_s24 = smov [#allocation4]   ;;  %s2277_s0 = inlined_call_operand.hbm [shape: s32[2], index: 0, kind: input, shape index: {}]   ;;  %s2278_s1 = inlined_call_operand.hbm [shape: f32[2,8,32], index: 1, kind: input, shape index: {}]   ;;  %s2279_s2 = inlined_call_operand.vmem [shape: f32[1,32], index: 2, kind: input, shape index: {}]   ;;  %s2280_s3 = inlined_call_operand.hbm [shape: f32[1,32], index: 3, kind: input, shape index: {}]   ;;  %s2281_s4 = inlined_call_operand.vmem [shape: f32[32,32], index: 4, kind: input, shape index: {}]   ;;  %s2282_s5 = inlined_call_operand.vmem [shape: f32[32,32], index: 5, kind: input, shape index: {}]   ;;  %s2283_s6 = inlined_call_operand.vmem [shape: f32[32,32], index: 6, kind: input, shape index: {}]   ;;  %s2284_s7 = inlined_call_operand.hbm [shape: f32[32,32], index: 7, kind: input, shape index: {}]   ;;  %s2285_s8 = inlined_call_operand.vmem [shape: f32[1,32], index: 8, kind: input, shape index: {}]   ;;  %s2286_s9 = inlined_call_operand.vmem [shape: f32[1,32], index: 9, kind: input, shape index: {}]   ;;  %s2287_s10 = inlined_call_operand.vmem [shape: f32[1,32], index: 10, kind: input, shape index: {}]   ;;  %s2288_s11 = inlined_call_operand.hbm [shape: f32[32,64], index: 11, kind: input, shape index: {}]   ;;  %s2289_s12 = inlined_call_operand.vmem [shape: f32[1,64], index: 12, kind: input, shape index: {}]   ;;  %s2290_s13 = inlined_call_operand.vmem [shape: f32[64,32], index: 13, kind: input, shape index: {}]   ;;  %s2291_s14 = inlined_call_operand.vmem [shape: f32[1,32], index: 14, kind: input, shape index: {}]   ;;  %s2292_s15 = inlined_call_operand.hbm [shape: f32[2,8,32], index: 15, kind: output, shape index: {0}]   ;;  %s2293_s16 = inlined_call_operand.hbm [shape: f32[2,4,8,8], index: 16, kind: output, shape index: {1}]  }
   0x1   :  { %2300 = sst [smem:[#allocation26_spill]] %s2277_s0 }
   0x2   :  { %2301 = sst [smem:[#allocation27_spill]] %s2278_s1 }
   0x3   :  { %2302 = sst [smem:[#allocation28_spill]] %s2279_s2 }
   0x4   :  { %2303 = sst [smem:[#allocation29_spill]] %s2280_s3 }
   0x5   :  { %2304 = sst [smem:[#allocation30_spill]] %s2284_s7 }
   0x6   :  { %2305 = sst [smem:[#allocation31_spill]] %s2287_s10 }
   0x7   :  { %2306 = sst [smem:[#allocation32_spill]] %s2288_s11 }
   0x8   :  { %2307 = sst [smem:[#allocation33_spill]] %s2292_s15 }
   0x9   :  { %s2308_s23 = sld [smem:[#allocation26_spill]] }
   0xf   :  { %s23_s10 = sshll.u32 %s2308_s23, 4  ;;  %s24_s10 = int_to_ptr.hbm [resolvable:$true] %s23_s10 }
  0x10   :  { %26 = dma.hbm_to_smem %s24_s10, 16, %s1812_s24, [#allocation3] }
  0x11   :  { %1774 = dma.done.wait [#allocation3], 16 }
  0x12   :  { %1775 = vsyncadd [#allocation3], 4294967280 }
  0x13   :  { %29 = sfence }
  0x14   :  { %30 = vsyncpa [#allocation6], 0 }
  0x15   :  { %32 = vsyncpa [#allocation6 + $0x1], 0 }
  0x16   :  { %33 = vsyncpa [#allocation9], 0 }
  0x17   :  { %34 = vsyncpa [#allocation12], 0 }
  0x18   :  { %35 = vsyncpa [#allocation7], 0 }
  0x19   :  { %37 = vsyncpa [#allocation7 + $0x1], 0 }
  0x1a   :  { %38 = vsyncpa [#allocation15], 0 }
  0x1b   :  { %40 = vsyncpa [#allocation15 + $0x1], 0  ;;  %s1916_s25 = smov 0   ;;  %s1918_s26 = smov 0  }
  0x1c   :  { %s1920_s27 = smov 0   ;;  %s1922_s28 = smov 0  }
  0x1d LB: > { %2309 = sst [smem:[#allocation22_spill]] %s1798_s25  ;;  %s1937_s10 = sadd.s32 4294967295, %s1810_s28   ;;  %s1810_s28 = sphi %s1922_s28, %s2335_s28   ;;  %s1806_s27 = sphi %s1920_s27, %s2332_s27   ;;  %s1802_s26 = sphi %s1918_s26, %s2334_s26   ;;  %s1798_s25 = sphi %s1916_s25, %s2333_s25  }
  0x1e   : > { %2310 = sst [smem:[#allocation23_spill]] %s1806_s27  ;;  %s1396_s29 = sadd.s32 4294967294, %s1810_s28  }
  0x1f   : > { %p66_p0 = scmp.ne.s32.totalorder %s1802_s26, %s1798_s25  ;;  %p67_p1 = scmp.eq.s32.totalorder %s1937_s10, 0 }
  0x20   : > { %p363_p2 = scmp.eq.s32.totalorder %s1937_s10, 1  ;;  %p369_p3 = scmp.eq.s32.totalorder %s1396_s29, 1 }
  0x21   : > { %p1946_p4 = por %p67_p1, %p66_p0  ;;  %p1397_p5 = scmp.ge.s32.totalorder %s1810_s28, 1 }
  0x22   : > { %p1951_p6 = por %p369_p3, %p66_p0  ;;  %p402_p7 = scmp.lt.s32.totalorder %s1810_s28, 3 }
  0x23   : > { %s2314_s3 = sld [smem:[#allocation29_spill]]  ;;  %s1813_s21 = smov [#allocation8]  }
  0x24   : > { %s2312_s0 = scalar_select %p1951_p6, 1, 0 }
  0x25   : > { %p1959_p8 = pnand %p1397_p5, %p402_p7  ;;  %s419_s22 = sshll.u32 %s1813_s21, 4  ;;  %s420_s22 = int_to_ptr.vmem [resolvable:$true] %s419_s22 }
  0x26   : > { %2313 = sst [smem:[#allocation24_spill]] %s2312_s0  ;;  %s1814_s18 = smov [#allocation10]  }
  0x27   : > { %p1460_p10 = pneg %p1959_p8  ;;  %s2316_s7 = sld [smem:[#allocation30_spill]] }
  0x28   : > { %s1815_s21 = smov 128   ;;  %s1816_s23 = smov 8  }
  0x29   : > { %s417_s19 = sshll.u32 %s2314_s3, 4  ;;  %p1971_p11 = pnand %p1460_p10, %p67_p1  ;;  %s418_s19 = int_to_ptr.hbm [resolvable:$true] %s417_s19 }
  0x2a   : > { %s439_s3 = sshll.u32 %s1814_s18, 4  ;;  %s2318_s11 = sld [smem:[#allocation32_spill]]  ;;  %s440_s3 = int_to_ptr.vmem [resolvable:$true] %s439_s3 }
  0x2b   : > { %1463 = dma.hbm_to_vmem [thread:$0]  (!%p1971_p11), %s418_s19, 16, %s420_s22, [#allocation9]  }
  0x2c   : > { %s1817_s18 = smov [#allocation11]   ;;  %s1985_s19 = sadd.s32 1, %s1810_s28  }
  0x2d   : > { %s437_s29 = sshll.u32 %s2316_s7, 4  ;;  %s462_s25 = sshll.u32 %s1817_s18, 4  ;;  %s438_s29 = int_to_ptr.hbm [resolvable:$true] %s437_s29  ;;  %s463_s25 = int_to_ptr.vmem [resolvable:$true] %s462_s25 }
  0x2e   : > { %1466 = dma.hbm_to_vmem [thread:$0]  (!%p1971_p11), %s438_s29, 512, %s440_s3, [#allocation9], %s1815_s21, %s1815_s21, %s1816_s23  }
  0x2f   : > { %s50_s22 = ssub.s32 %s1810_s28, %s1985_s19  ;;  %s53_s15 = sadd.s32 1, %s1806_s27 }
  0x30   : > { %s460_s0 = sshll.u32 %s2318_s11, 4  ;;  %p51_p12 = scmp.eq.s32.totalorder %s50_s22, 0  ;;  %s461_s0 = int_to_ptr.hbm [resolvable:$true] %s460_s0 }
  0x31   : > { %1469 = dma.hbm_to_vmem [thread:$0]  (!%p1971_p11), %s461_s0, 512, %s463_s25, [#allocation12], %s1815_s21, %s1815_s21, %s1816_s23  }
  0x32   : > { %p60_p13 = scmp.ne.s32.totalorder %s1806_s27, %s1802_s26  ;;  %p61_p0 = scmp.eq.s32.totalorder %s1810_s28, 0 }
  0x33   : > { %s1994_s3 = scalar_select %p51_p12, %s1806_s27, %s53_s15  }
  0x34   : > { %p1998_p3 = por %p363_p2, %p60_p13  ;;  %p1484_p5 = scmp.lt.s32.totalorder %s1810_s28, 2 }
  0x35   : > { %2319 = sst [smem:[#allocation25_spill]] %s1994_s3  ;;  %s485_s29 = sand.u32 1, %s1806_s27  }
  0x36   : > { %s1403_s24 = sshll.u32 %s1810_s28, 3  ;;  %p62_p7 = por %p61_p0, %p60_p13 }
  0x37   : > { %s1402_s25 = sshll.u32 %s485_s29, 3  ;;  %s2321_s1 = sld [smem:[#allocation27_spill]] }
  0x38   : > { %s489_s18 = scalar_lea.vmem [#allocation5], %s1402_s25  ;;  %p2008_p10 = pnand %p1484_p5, %p62_p7 }
  0x39   : > { %s497_s22 = sshll.u32 %s489_s18, 4  ;;  %s486_s11 = scalar_lea.sflag [#allocation6], %s485_s29  ;;  %s498_s22 = int_to_ptr.vmem [resolvable:$true] %s497_s22 }
  0x3a   : > { %p1676_p11 = pneg %p2008_p10 }
  0x3d   : > { %s493_s21 = scalar_lea.hbm %s2321_s1, %s1403_s24  ;;  %s1679_s25 = scalar_lea.hbm %s2321_s1, 16 }
  0x3e   : > { %s495_s23 = sshll.u32 %s493_s21, 4  ;;  %s496_s23 = int_to_ptr.hbm [resolvable:$true] %s495_s23 }
  0x3f   : > { %s1672_s3 = sshra.s32 %s496_s23, 4  ;;  %s1673_s3 = int_to_ptr.hbm [resolvable:$true] %s1672_s3 }
  0x40   : > { %s1674_s27 = scalar_lea.hbm %s1673_s3, 8  ;;  %p1680_p0 = scmp.lt.s32.totalorder %s1673_s3, %s2321_s1 }
  0x41   : > { %p1675_p2 = scmp.ne.s32.totalorder %s1673_s3, %s1674_s27  ;;  %p1681_p5 = scmp.lt.s32.totalorder %s1679_s25, %s1674_s27 }
  0x43   : > { %p1677_p12 = pnand %p1676_p11, %p1675_p2  ;;  %p1682_p7 = por %p1681_p5, %p1680_p0 }
  0x45   : > { %p1678_p13 = pneg %p1677_p12 }
  0x47   : > { %p1683_p9 = pnand %p1682_p7, %p1678_p13 }
  0x49   : > { %1686 = shalt.err (!%p1683_p9)
}
  0x4a   : > { %1473 = dma.hbm_to_vmem [thread:$0]  (!%p2008_p10), %s496_s23, 128, %s498_s22, %s486_s11  }
  0x4b   : > { %506 = sbr.rel (%p1959_p8) target bundleno = 1994 (0x7ca), region = 76  ;;  %s2025_s29 = sand.u32 (!%p1959_p8), 1, %s1802_s26  }
  0x4c   : > { %s2298_s18 = sshll.u32 (!%p1959_p8), %s2025_s29, 3  ;;  %s509_s24 = scalar_lea.sflag (!%p1959_p8), [#allocation6], %s2025_s29 }
  0x4d   : > { %s512_s27 = scalar_lea.vmem (!%p1959_p8), [#allocation5], %s2298_s18 }
  0x50   : > { %1777 = dma.done.wait (%p1946_p4), %s509_s24, 128  }
  0x51   : > { %1779 = vsyncadd (%p1946_p4), %s509_s24, 4294967168 }
  0x52   : > { %1781 = dma.done.wait (%p67_p1), [#allocation9], 528  }
  0x53   : > { %1783 = vsyncadd (%p67_p1), [#allocation9], 4294966768 }
  0x54   : > { %1785 = dma.done.wait (%p67_p1), [#allocation12], 512  }
  0x55   : > { %1787 = vsyncadd (%p67_p1), [#allocation12], 4294966784  ;;  %vm598_vm0 = vcmask 261120   ;;  %v2043_v0 = vld [vmem:[%s512_s27] sm:$0xff]  ;;  %v1818_v2 = vmov 32.0   ;;  %v639_v14 = vld [vmem:[%s2281_s4 + $0x18] sm:$0xff]  ;;  %v581_v48 = vlaneseq }
  0x56   : > { %v599_v1 = vsel %vm598_vm0, %v2043_v0, 0.0  ;;  %1544 = vrcp.f32 %v1818_v2  ;;  %v690_v15 = vld [vmem:[%s2283_s6 + $0x18] sm:$0xff]  ;;  %655 = vmatpush.msra.mxu1 %v639_v14  ;;  %v638_v16 = vld [vmem:[%s2281_s4 + $0x10] sm:$0xff]  ;;  %v637_v18 = vld [vmem:[%s2281_s4 + $0x8] sm:$0xff]  ;;  %s2323_s2 = sld [smem:[#allocation28_spill]]  ;;  %vm711_vm5 = vcmask 64512  }
  0x57   : > { %600 = vadd.xlane.f32.xlu0 %v599_v1  ;;  %703 = vmatpush.msra.mxu2 %v690_v15  ;;  %v689_v17 = vld [vmem:[%s2283_s6 + $0x10] sm:$0xff]  ;;  %v688_v19 = vld [vmem:[%s2283_s6 + $0x8] sm:$0xff]  ;;  %v636_v20 = vld [vmem:[%s2281_s4] sm:$0xff]  ;;  %s1819_s11 = smov 104   ;;  %s1820_s30 = smov 120   ;;  %v2113_v49 = vshrl.u32 %v581_v48, 7 }
  0x58   : > { %656 = vmatpush.msra.mxu1 %v638_v16  ;;  %v687_v21 = vld [vmem:[%s2283_s6] sm:$0xff]  ;;  %v666_v22 = vld [vmem:[%s2282_s5 + $0x18] sm:$0xff]  ;;  %v665_v23 = vld [vmem:[%s2282_s5 + $0x10] sm:$0xff]  ;;  %s1821_s20 = smov 112   ;;  %s2109_s3 = sld [smem:[#allocation4 + %s1937_s10]]  ;;  %v584_v50 = vand.u32 127, %v581_v48 }
  0x59   : > { %704 = vmatpush.msra.mxu2 %v689_v17  ;;  %v664_v24 = vld [vmem:[%s2282_s5 + $0x8] sm:$0xff]  ;;  %v663_v27 = vld [vmem:[%s2282_s5] sm:$0xff]  ;;  %v1538_v38 = vld [vmem:[#allocation8] ss:$0 sm:$0xff]  ;;  %v1822_v53 = vmov 0.0   ;;  %s1410_s23 = sshll.u32 %s2025_s29, 5 }
  0x5a   : > { %657 = vmatpush.msra.mxu1 %v637_v18  ;;  %vm586_vm6 = vcmp.gt.s32.totalorder %v584_v50, %v2113_v49  ;;  %s2143_s22 = scalar_lea.vmem [#allocation14], %s1410_s23  ;;  %s2299_s15 = smov 8  }
  0x5b   : > { %705 = vmatpush.msra.mxu2 %v688_v19  ;;  %s1824_s0 = smov 16   ;;  %s1825_s25 = smov 24  }
  0x5c   : > { %v1545_v3 = vpop.eup %1544  ;;  %658 = vmatpush.msra.mxu1 %v636_v20  ;;  %v1537_v35 = vld [vmem:[%s2323_s2] ss:$0 sm:$0xff]  ;;  %s1441_s27 = sshll.u32 %s1937_s10, 5  ;;  %s1722_s18 = scalar_lea.hbm %s2293_s16, 64 }
  0x5d   : > { %v603_v4 = vmul.f32 32.0, %v1545_v3  ;;  %vm607_vm1 = vweird.f32 %v1545_v3  ;;  %706 = vmatpush.msra.mxu2 %v687_v21 }
  0x5e   : > { %679 = vmatpush.msrb.mxu1 %v666_v22  ;;  %v587_v51 = vstv %s2109_s3  ;;  %s1258_s3 = sshll.u32 %s2143_s22, 4  ;;  %s1259_s3 = int_to_ptr.vmem [resolvable:$true] %s1258_s3 }
  0x5f   : > { %v604_v5 = vsub.f32 1.0, %v603_v4  ;;  %vm588_vm7 = vcmp.ge.s32.totalorder %v584_v50, %v587_v51 }
  0x60   : > { %680 = vmatpush.msrb.mxu1 %v665_v23  ;;  %vm589_vm8 = vmor %vm586_vm6, %vm588_vm7 }
  0x61   : > { %v605_v6 = vmul.f32 %v1545_v3, %v604_v5  ;;  %v1411_v54 = vsel %vm589_vm8, 1.0, %v1822_v53 }
  0x62   : > { %681 = vmatpush.msrb.mxu1 %v664_v24  ;;  %vm595_vm9 = vcmp.gt.f32.partialorder %v1411_v54, 0.5 }
  0x63   : > { %v606_v7 = vadd.f32 %v1545_v3, %v605_v6 }
  0x64   : > { %682 = vmatpush.msrb.mxu1 %v663_v27 }
  0x65   : > { %v2047_v8 = vsel %vm607_vm1, %v1545_v3, %v606_v7 }
  0xca   : > { %v601_v9 = vpop.xlane.xlu0 %600 }
  0xcb   : > { %v609_v10 = vmul.f32 %v2047_v8, %v601_v9 }
  0xcd   : > { %v610_v11 = vsub.f32 %v2043_v0, %v609_v10 }
  0xcf   : > { %v611_v12 = vmul.f32 %v610_v11, %v610_v11 }
  0xd1   : > { %v612_v13 = vsel %vm598_vm0, %v611_v12, 0.0 }
  0xd2   : > { %613 = vadd.xlane.f32.xlu0 %v612_v13 }
 0x145   : > { %v614_v25 = vpop.xlane.xlu0 %613 }
 0x146   : > { %v615_v26 = vmul.f32 %v614_v25, %v2047_v8 }
 0x148   : > { %v616_v28 = vadd.f32 1e-06, %v615_v26 }
 0x14a   : > { %1546 = vrsqrt.f32 %v616_v28  ;;  %vm623_vm3 = vweird.f32 %v616_v28 }
 0x150   : > { %v1547_v29 = vpop.eup %1546 }
 0x151   : > { %v618_v30 = vmul.f32 %v1547_v29, %v616_v28  ;;  %vm624_vm2 = vweird.f32 %v1547_v29 }
 0x152   : > { %vm625_vm4 = vmor %vm623_vm3, %vm624_vm2 }
 0x153   : > { %v619_v31 = vmul.f32 %v1547_v29, %v618_v30 }
 0x155   : > { %v620_v32 = vmul.f32 0.5, %v619_v31 }
 0x157   : > { %v621_v33 = vsub.f32 1.5, %v620_v32 }
 0x159   : > { %v622_v34 = vmul.f32 %v1547_v29, %v621_v33 }
 0x15b   : > { %v626_v36 = vsel %vm625_vm4, %v1547_v29, %v622_v34 }
 0x15c   : > { %v627_v37 = vmul.f32 %v626_v36, %v610_v11 }
 0x15e   : > { %v631_v39 = vmul.f32 %v1537_v35, %v627_v37 }
 0x160   : > { %v635_v40 = vadd.f32 %v1538_v38, %v631_v39 }
 0x162   : > { %1413 = vmatmul.msk.f32.vlgmr.msra.gmra.mxu1 %vm598_vm0, %v635_v40  ;;  %1415 = vmatmul.msk.f32.vlgmr.msra.gmra.mxu2 %vm598_vm0, %v635_v40 }
 0x16a   : > { %1414 = vmatmul.msk.f32.vlgmr.msrb.gmra.mxu1 %vm598_vm0, %v635_v40 }
 0x1df   : > { %v660_v41 = vpop.f32.mrf.mxu1 }
 0x1e5   : > { %v2097_v43 = vpop.f32.mrf.mxu2 }
 0x1e7   : > { %v684_v42 = vpop.f32.mrf.mxu1 }
 0x1e8   : > { %965 = vrot.lane.b32.xlu0 %v684_v42, %s1819_s11  ;;  %790 = vrot.lane.b32.xlu2 %v684_v42, %s1820_s30 }
 0x1e9   : > { %878 = vrot.lane.b32.xlu1 %v684_v42, %s1821_s20  ;;  %1416 = vmatpush.xpose.msk.msra.mxu3 %vm711_vm5, %v684_v42 }
 0x1ec   : > { %1417 = vmatmul.msk.f32.vlgmr.msra.gmra.mxu3 %vm711_vm5, %v660_v41 }
 0x1ed   : > { %782 = vmatpush.msrb.mxu3 %v2097_v43 }
 0x1f0   : > { %788 = vrot.lane.b32.xlu2 %v660_v41, %s1820_s30 }
 0x1f1   : > { %876 = vrot.lane.b32.xlu1 %v660_v41, %s1821_s20 }
 0x1f9   : > { %963 = vrot.lane.b32.xlu1 %v660_v41, %s1819_s11 }
 0x242   : > { %v791_v44 = vpop.permute.xlu2 %790 }
 0x243   : > { %1419 = vmatpush.xpose.msk.msra.mxu0 %vm711_vm5, %v791_v44 }
 0x24a   : > { %v789_v45 = vpop.permute.xlu2 %788 }
 0x24b   : > { %1420 = vmatmul.msk.f32.vlgmr.msra.gmra.mxu0 %vm711_vm5, %v789_v45 }
 0x25a   : > { %v966_v46 = vpop.permute.xlu0 %965 }
 0x25b   : > { %v879_v47 = vpop.permute.xlu1 %878  ;;  %1427 = vmatpush.xpose.msk.msrb.mxu0 %vm711_vm5, %v966_v46 }
 0x25c   : > { %1423 = vmatpush.xpose.msk.msrb.mxu2 %vm711_vm5, %v879_v47 }
 0x263   : > { %v877_v52 = vpop.permute.xlu1 %876 }
 0x264   : > { %1424 = vmatmul.msk.f32.vlgmr.msrb.gmra.mxu2 %vm711_vm5, %v877_v52 }
 0x26b   : > { %v964_v55 = vpop.permute.xlu1 %963 }
 0x26c   : > { %1428 = vmatmul.msk.f32.vlgmr.msrb.gmra.mxu0 %vm711_vm5, %v964_v55 }
 0x26f   : > { %v735_v56 = vpop.f32.mrf.mxu3 }
 0x270   : > { %v738_v57 = vsel %vm595_vm9, -1e+09, %v735_v56 }
 0x271   : > { %v739_v58 = vsel %vm711_vm5, %v738_v57, -inf }
 0x272   : > { %740 = vmax.xlane.f32.xlu2 %v739_v58 }
 0x2c8   : > { %v813_v59 = vpop.f32.mrf.mxu0 }
 0x2c9   : > { %v816_v60 = vsel %vm595_vm9, -1e+09, %v813_v59 }
 0x2ca   : > { %v817_v61 = vsel %vm711_vm5, %v816_v60, -inf }
 0x2cb   : > { %818 = vmax.xlane.f32.xlu1 %v817_v61 }
 0x2e5   : > { %v741_v62 = vpop.xlane.xlu2 %740 }
 0x2e6   : > { %v742_v63 = vsub.f32 %v738_v57, %v741_v62 }
 0x2e7   : > { %v901_v1 = vpop.f32.mrf.mxu2 }
 0x2e8   : > { %v743_v2 = vmul.f32 1.442695, %v742_v63  ;;  %v904_v3 = vsel %vm595_vm9, -1e+09, %v901_v1 }
 0x2e9   : > { %v988_v4 = vpop.f32.mrf.mxu0  ;;  %v905_v5 = vsel %vm711_vm5, %v904_v3, -inf }
 0x2ea   : > { %1548 = vpow2.f32 %v743_v2  ;;  %v991_v6 = vsel %vm595_vm9, -1e+09, %v988_v4  ;;  %906 = vmax.xlane.f32.xlu0 %v905_v5 }
 0x2eb   : > { %v992_v7 = vsel %vm711_vm5, %v991_v6, -inf }
 0x2ec   : > { %993 = vmax.xlane.f32.xlu2 %v992_v7 }
 0x2f0   : > { %v1549_v9 = vpop.eup %1548 }
 0x2f1   : > { %v745_v10 = vsel %vm711_vm5, %v1549_v9, 0.0 }
 0x2f4   : > { %746 = vadd.xlane.f32.xlu2 %v745_v10 }
 0x2fe   : > { %844 = vrot.lane.b32.xlu0 %v2097_v43, %s1820_s30 }
 0x33e   : > { %v819_v11 = vpop.xlane.xlu1 %818 }
 0x33f   : > { %v820_v12 = vsub.f32 %v816_v60, %v819_v11 }
 0x341   : > { %v821_v13 = vmul.f32 1.442695, %v820_v12 }
 0x343   : > { %1550 = vpow2.f32 %v821_v13 }
 0x349   : > { %v1551_v14 = vpop.eup %1550 }
 0x34a   : > { %v823_v15 = vsel %vm711_vm5, %v1551_v14, 0.0 }
 0x34b   : > { %824 = vadd.xlane.f32.xlu1 %v823_v15 }
 0x35d   : > { %v907_v16 = vpop.xlane.xlu0 %906 }
 0x35e   : > { %v908_v17 = vsub.f32 %v904_v3, %v907_v16 }
 0x35f   : > { %v994_v18 = vpop.xlane.xlu2 %993 }
 0x360   : > { %v909_v19 = vmul.f32 1.442695, %v908_v17  ;;  %v995_v20 = vsub.f32 %v991_v6, %v994_v18 }
 0x362   : > { %1552 = vpow2.f32 %v909_v19  ;;  %v996_v21 = vmul.f32 1.442695, %v995_v20 }
 0x364   : > { %1554 = vpow2.f32 %v996_v21 }
 0x367   : > { %v747_v22 = vpop.xlane.xlu2 %746 }
 0x368   : > { %v2134_v23 = vpop.eup %1552  ;;  %1556 = vrcp.f32 %v747_v22  ;;  %v759_v31 = vand.u32 2147483648, %v747_v22  ;;  %v757_v33 = vand.u32 2147483647, %v747_v22  ;;  %vm753_vm11 = vweird.f32 %v747_v22 }
 0x369   : > { %v911_v24 = vsel %vm711_vm5, %v2134_v23, 0.0 }
 0x36a   : > { %v2138_v25 = vpop.eup %1554  ;;  %912 = vadd.xlane.f32.xlu2 %v911_v24  ;;  %v760_v35 = vor.u32 1.1754944e-38, %v759_v31  ;;  %vm758_vm13 = vcmp.eq.f32.partialorder %v757_v33, 8.507059e+37  ;;  %v1053_v24 = vld [vmem:[#allocation10 + $0x10] sm:$0xff] }
 0x36b   : > { %v998_v26 = vsel %vm711_vm5, %v2138_v25, 0.0 }
 0x36c   : > { %999 = vadd.xlane.f32.xlu1 %v998_v26  ;;  %v1051_v26 = vld [vmem:[#allocation10] sm:$0xff] }
 0x36e   : > { %v1557_v27 = vpop.eup %1556 }
 0x36f   : > { %v749_v28 = vmul.f32 %v1557_v27, %v747_v22  ;;  %vm754_vm10 = vweird.f32 %v1557_v27 }
 0x370   : > { %v845_v29 = vpop.permute.xlu0 %844  ;;  %vm755_vm12 = vmor %vm753_vm11, %vm754_vm10 }
 0x371   : > { %v750_v30 = vsub.f32 1.0, %v749_v28  ;;  %865 = vmatpush.msra.mxu1 %v845_v29 }
 0x373   : > { %v751_v32 = vmul.f32 %v1557_v27, %v750_v30  ;;  %v1539_v30 = vld [vmem:[%s2285_s8] ss:$0 sm:$0xff] }
 0x375   : > { %v752_v34 = vadd.f32 %v1557_v27, %v751_v32 }
 0x377   : > { %v756_v36 = vsel %vm755_vm12, %v1557_v27, %v752_v34  ;;  %vm874_vm12 = vcmask 130112  }
 0x378   : > { %v761_v37 = vsel %vm758_vm13, %v760_v35, %v756_v36  ;;  %vm961_vm13 = vcmask 195712  }
 0x379   : > { %v762_v38 = vmul.f32 %v1549_v9, %v761_v37 }
 0x37b   : > { %763 = vst.msk [vmem:[%s2143_s22] sm:$0xff] %vm711_vm5, %v762_v38  ;;  %1418 = vmatmul.msk.f32.vlgmr.msrb.gmra.mxu3 %vm711_vm5, %v762_v38 }
 0x382   : > { %931 = vrot.lane.b32.xlu2 %v2097_v43, %s1821_s20  ;;  %s2324_s20 = sld [smem:[#allocation31_spill]] }
 0x385   : > { %1018 = vrot.lane.b32.xlu1 %v2097_v43, %s1819_s11 }
 0x3be   : > { %v825_v39 = vpop.xlane.xlu1 %824 }
 0x3bf   : > { %1558 = vrcp.f32 %v825_v39  ;;  %v837_v44 = vand.u32 2147483648, %v825_v39  ;;  %v835_v46 = vand.u32 2147483647, %v825_v39  ;;  %vm831_vm15 = vweird.f32 %v825_v39 }
 0x3c1   : > { %v838_v48 = vor.u32 1.1754944e-38, %v837_v44  ;;  %vm836_vm2 = vcmp.eq.f32.partialorder %v835_v46, 8.507059e+37 }
 0x3c5   : > { %v1559_v40 = vpop.eup %1558 }
 0x3c6   : > { %v827_v41 = vmul.f32 %v1559_v40, %v825_v39  ;;  %vm832_vm14 = vweird.f32 %v1559_v40 }
 0x3c7   : > { %vm833_vm1 = vmor %vm831_vm15, %vm832_vm14  ;;  %vm592_vm14 = vcmp.lt.s32.totalorder %v2113_v49, %v587_v51 }
 0x3c8   : > { %v828_v42 = vsub.f32 1.0, %v827_v41  ;;  %v2173_v33 = vsel %vm592_vm14, 1.0, %v1822_v53  ;;  %v1119_v53 = vld [vmem:[#allocation11 + $0x18] sm:$0xff]  ;;  %v1116_v41 = vld [vmem:[#allocation11] sm:$0xff] }
 0x3ca   : > { %v829_v45 = vmul.f32 %v1559_v40, %v828_v42 }
 0x3cc   : > { %v830_v47 = vadd.f32 %v1559_v40, %v829_v45 }
 0x3ce   : > { %v834_v50 = vsel %vm833_vm1, %v1559_v40, %v830_v47  ;;  %v1118_v40 = vld [vmem:[#allocation11 + $0x10] sm:$0xff] }
 0x3cf   : > { %v839_v52 = vsel %vm836_vm2, %v838_v48, %v834_v50 }
 0x3d0   : > { %v840_v54 = vmul.f32 %v1551_v14, %v839_v52 }
 0x3d2   : > { %1421 = vst.msk [vmem:[%s2143_s22 + $0x8] sm:$0xff] %vm711_vm5, %v840_v54  ;;  %1422 = vmatmul.msk.f32.vlgmr.msra.gmra.mxu1 %vm711_vm5, %v840_v54 }
 0x3dd   : > { %v913_v43 = vpop.xlane.xlu2 %912 }
 0x3de   : > { %1560 = vrcp.f32 %v913_v43  ;;  %v925_v62 = vand.u32 2147483648, %v913_v43  ;;  %v923_v1 = vand.u32 2147483647, %v913_v43  ;;  %vm919_vm4 = vweird.f32 %v913_v43 }
 0x3df   : > { %v1000_v55 = vpop.xlane.xlu1 %999 }
 0x3e0   : > { %1562 = vrcp.f32 %v1000_v55  ;;  %v1012_v3 = vand.u32 2147483648, %v1000_v55  ;;  %v1010_v6 = vand.u32 2147483647, %v1000_v55  ;;  %v926_v7 = vor.u32 1.1754944e-38, %v925_v62 }
 0x3e1   : > { %vm924_vm8 = vcmp.eq.f32.partialorder %v923_v1, 8.507059e+37  ;;  %vm1006_vm9 = vweird.f32 %v1000_v55 }
 0x3e2   : > { %v1013_v12 = vor.u32 1.1754944e-38, %v1012_v3  ;;  %vm1011_vm11 = vcmp.eq.f32.partialorder %v1010_v6, 8.507059e+37  ;;  %v1194_v3 = vld [vmem:[%s2290_s13 + $0x38] sm:$0xff]  ;;  %v1191_v6 = vld [vmem:[%s2290_s13 + $0x20] sm:$0xff] }
 0x3e3   : > { %1211 = vmatpush.msra.mxu0 %v1194_v3 }
 0x3e4   : > { %v1561_v56 = vpop.eup %1560 }
 0x3e5   : > { %v915_v57 = vmul.f32 %v1561_v56, %v913_v43  ;;  %v932_v58 = vpop.permute.xlu2 %931  ;;  %vm920_vm3 = vweird.f32 %v1561_v56  ;;  %v1540_v43 = vld [vmem:[%s2286_s9] ss:$0 sm:$0xff] }
 0x3e6   : > { %v1563_v59 = vpop.eup %1562  ;;  %952 = vmatpush.msra.mxu3 %v932_v58  ;;  %vm921_vm7 = vmor %vm919_vm4, %vm920_vm3 }
 0x3e7   : > { %v916_v60 = vsub.f32 1.0, %v915_v57  ;;  %v1002_v61 = vmul.f32 %v1563_v59, %v1000_v55  ;;  %vm1007_vm6 = vweird.f32 %v1563_v59 }
 0x3e8   : > { %vm1008_vm10 = vmor %vm1006_vm9, %vm1007_vm6  ;;  %1139 = vmatpush.msrb.mxu3 %v1119_v53  ;;  %vm1199_vm9 = vcmask 523264  }
 0x3e9   : > { %v917_v63 = vmul.f32 %v1561_v56, %v916_v60  ;;  %v1003_v2 = vsub.f32 1.0, %v1002_v61 }
 0x3ea   : > { %1140 = vmatpush.msrb.mxu3 %v1118_v40 }
 0x3eb   : > { %v918_v4 = vadd.f32 %v1561_v56, %v917_v63  ;;  %v1004_v5 = vmul.f32 %v1563_v59, %v1003_v2 }
 0x3ed   : > { %v922_v9 = vsel %vm921_vm7, %v1561_v56, %v918_v4  ;;  %v1005_v10 = vadd.f32 %v1563_v59, %v1004_v5  ;;  %v1193_v4 = vld [vmem:[%s2290_s13 + $0x30] sm:$0xff]  ;;  %v1192_v5 = vld [vmem:[%s2290_s13 + $0x28] sm:$0xff] }
 0x3ee   : > { %v927_v11 = vsel %vm924_vm8, %v926_v7, %v922_v9  ;;  %1212 = vmatpush.msra.mxu0 %v1193_v4  ;;  %v1190_v9 = vld [vmem:[%s2290_s13 + $0x18] sm:$0xff] }
 0x3ef   : > { %v1009_v13 = vsel %vm1008_vm10, %v1563_v59, %v1005_v10  ;;  %v928_v14 = vmul.f32 %v2134_v23, %v927_v11  ;;  %v1054_v23 = vld [vmem:[#allocation10 + $0x18] sm:$0xff]  ;;  %v1542_v59 = vld [vmem:[%s2289_s12] ss:$0 sm:$0xff] }
 0x3f0   : > { %v1014_v15 = vsel %vm1011_vm11, %v1013_v12, %v1009_v13  ;;  %1074 = vmatpush.msra.mxu2 %v1054_v23  ;;  %1213 = vmatpush.msra.mxu0 %v1192_v5  ;;  %v1189_v11 = vld [vmem:[%s2290_s13 + $0x10] sm:$0xff] }
 0x3f1   : > { %1425 = vst.msk [vmem:[%s2143_s22 + $0x10] sm:$0xff] %vm711_vm5, %v928_v14  ;;  %1426 = vmatmul.msk.f32.vlgmr.msra.gmra.mxu3 %vm711_vm5, %v928_v14  ;;  %v1015_v16 = vmul.f32 %v2138_v25, %v1014_v15  ;;  %v1052_v25 = vld [vmem:[#allocation10 + $0x8] sm:$0xff] }
 0x3f2   : > { %1075 = vmatpush.msra.mxu2 %v1053_v24  ;;  %1214 = vmatpush.msra.mxu0 %v1191_v6  ;;  %v1188_v14 = vld [vmem:[%s2290_s13 + $0x8] sm:$0xff] }
 0x3f3   : > { %1429 = vst.msk [vmem:[%s2143_s22 + $0x18] sm:$0xff] %vm711_vm5, %v1015_v16 }
 0x3f4   : > { %1076 = vmatpush.msra.mxu2 %v1052_v25  ;;  %1215 = vmatpush.msra.mxu0 %v1190_v9 }
 0x3f6   : > { %1077 = vmatpush.msra.mxu2 %v1051_v26  ;;  %1216 = vmatpush.msra.mxu0 %v1189_v11 }
 0x3f7   : > { %v1019_v17 = vpop.permute.xlu1 %1018 }
 0x3f8   : > { %1039 = vmatpush.msrb.mxu1 %v1019_v17  ;;  %1217 = vmatpush.msra.mxu0 %v1188_v14  ;;  %v1187_v17 = vld [vmem:[%s2290_s13] sm:$0xff] }
 0x3f9   : > { %1430 = vmatmul.msk.f32.vlgmr.msrb.gmra.mxu1 %vm711_vm5, %v1015_v16 }
 0x3fa   : > { %1218 = vmatpush.msra.mxu0 %v1187_v17 }
 0x3fe   : > { %v784_v18 = vpop.f32.mrf.mxu3 }
 0x3ff   : > { %787 = vst.msk [vmem:[#allocation2] sm:$0xff] %vm711_vm5, %v784_v18  ;;  %vm1048_vm5 = vcmask 261312  }
 0x44f   : > { %v867_v19 = vpop.f32.mrf.mxu1 }
 0x450   : > { %871 = vrot.lane.b32.xlu0 %v867_v19, %s2299_s15 }
 0x474   : > { %v954_v20 = vpop.f32.mrf.mxu3 }
 0x475   : > { %958 = vrot.lane.b32.xlu2 %v954_v20, %s1824_s0  ;;  %s1232_s0 = scalar_lea.sflag [#allocation15], %s2025_s29 }
 0x476   : > { %v1041_v21 = vpop.f32.mrf.mxu1 }
 0x477   : > { %1045 = vrot.lane.b32.xlu0 %v1041_v21, %s1825_s25 }
 0x4c2   : > { %v872_v22 = vpop.permute.xlu0 %871 }
 0x4c3   : > { %875 = vst.msk [vmem:[#allocation2] sm:$0xff] %vm874_vm12, %v872_v22 }
 0x4cf   : > { %v959_v27 = vpop.permute.xlu2 %958 }
 0x4d0   : > { %962 = vst.msk [vmem:[#allocation2] sm:$0xff] %vm961_vm13, %v959_v27 }
 0x4e9   : > { %v1046_v28 = vpop.permute.xlu0 %1045 }
 0x4ea   : > { %1049 = vst.msk [vmem:[#allocation2] sm:$0xff] %vm1048_vm5, %v1046_v28 }
 0x4f1   : > { %v1050_v29 = vld [vmem:[#allocation2] sm:$0xff] }
 0x4f2   : > { %1431 = vmatmul.msk.f32.vlgmr.msra.gmra.mxu2 %vm598_vm0, %v1050_v29 }
 0x575   : > { %v1079_v31 = vpop.f32.mrf.mxu2 }
 0x576   : > { %v1080_v32 = vadd.f32 %v1539_v30, %v1079_v31 }
 0x578   : > { %v1082_v34 = vadd.f32 %v1080_v32, %v2043_v0  ;;  %v1117_v0 = vld [vmem:[#allocation11 + $0x8] sm:$0xff] }
 0x579   : > { %1141 = vmatpush.msrb.mxu3 %v1117_v0 }
 0x57a   : > { %v2177_v35 = vmul.f32 %v2173_v33, %v1082_v34 }
 0x57b   : > { %1142 = vmatpush.msrb.mxu3 %v1116_v41 }
 0x57c   : > { %v1086_v36 = vsel %vm598_vm0, %v2177_v35, 0.0 }
 0x57d   : > { %1087 = vadd.xlane.f32.xlu1 %v1086_v36 }
 0x5f0   : > { %v1088_v37 = vpop.xlane.xlu1 %1087 }
 0x5f1   : > { %v1089_v38 = vmul.f32 %v1088_v37, %v2047_v8 }
 0x5f3   : > { %v1090_v39 = vsub.f32 %v2177_v35, %v1089_v38 }
 0x5f5   : > { %v1091_v49 = vmul.f32 %v1090_v39, %v1090_v39 }
 0x5f7   : > { %v1092_v51 = vsel %vm598_vm0, %v1091_v49, 0.0 }
 0x5f8   : > { %1093 = vadd.xlane.f32.xlu2 %v1092_v51 }
 0x66b   : > { %v1094_v42 = vpop.xlane.xlu2 %1093 }
 0x66c   : > { %v1095_v44 = vmul.f32 %v1094_v42, %v2047_v8  ;;  %v1541_v8 = vld [vmem:[%s2324_s20] ss:$0 sm:$0xff]  ;;  %s1257_s20 = scalar_lea.hbm %s2293_s16, %s1441_s27 }
 0x66d   : > { %s1260_s23 = sshll.u32 %s1257_s20, 4  ;;  %s1261_s23 = int_to_ptr.hbm [resolvable:$true] %s1260_s23 }
 0x66e   : > { %v1096_v45 = vadd.f32 1e-06, %v1095_v44  ;;  %s1716_s25 = sshra.s32 %s1261_s23, 4  ;;  %s1717_s25 = int_to_ptr.hbm [resolvable:$true] %s1716_s25 }
 0x66f   : > { %s1718_s17 = scalar_lea.hbm %s1717_s25, 32  ;;  %p1723_p9 = scmp.lt.s32.totalorder %s1717_s25, %s2293_s16 }
 0x670   : > { %1564 = vrsqrt.f32 %v1096_v45  ;;  %vm1103_vm1 = vweird.f32 %v1096_v45  ;;  %p1719_p1 = scmp.ne.s32.totalorder %s1717_s25, %s1718_s17  ;;  %p1724_p10 = scmp.lt.s32.totalorder %s1722_s18, %s1718_s17 }
 0x672   : > { %p1720_p4 = pnand %p1719_p1, %p1998_p3  ;;  %p1725_p2 = por %p1724_p10, %p1723_p9 }
 0x674   : > { %p1721_p8 = pneg %p1720_p4 }
 0x676   : > { %v1565_v46 = vpop.eup %1564  ;;  %p1726_p11 = pnand %p1725_p2, %p1721_p8 }
 0x677   : > { %v1098_v47 = vmul.f32 %v1565_v46, %v1096_v45  ;;  %vm1104_vm15 = vweird.f32 %v1565_v46 }
 0x678   : > { %vm1105_vm2 = vmor %vm1103_vm1, %vm1104_vm15 }
 0x679   : > { %v1099_v48 = vmul.f32 %v1565_v46, %v1098_v47 }
 0x67b   : > { %v1100_v50 = vmul.f32 0.5, %v1099_v48 }
 0x67d   : > { %v1101_v52 = vsub.f32 1.5, %v1100_v50 }
 0x67f   : > { %v1102_v54 = vmul.f32 %v1565_v46, %v1101_v52 }
 0x681   : > { %v1106_v55 = vsel %vm1105_vm2, %v1565_v46, %v1102_v54 }
 0x682   : > { %v1107_v56 = vmul.f32 %v1106_v55, %v1090_v39  ;;  %v1826_v39 = vmov -1.0  }
 0x684   : > { %v1111_v57 = vmul.f32 %v1540_v43, %v1107_v56 }
 0x686   : > { %v1115_v58 = vadd.f32 %v1541_v8, %v1111_v57 }
 0x688   : > { %1432 = vmatmul.msk.f32.vlgmr.msrb.gmra.mxu3 %vm598_vm0, %v1115_v58 }
 0x70b   : > { %v1144_v60 = vpop.f32.mrf.mxu3 }
 0x70c   : > { %v1145_v61 = vadd.f32 %v1542_v59, %v1144_v60 }
 0x70e   : > { %v1148_v62 = vmul.f32 0.70710677, %v1145_v61  ;;  %v1147_v53 = vmul.f32 0.5, %v1145_v61 }
 0x710   : > { %v1151_v63 = vand.u32 2147483647, %v1148_v62  ;;  %vm1149_vm8 = vcmp.ge.f32.partialorder %v1148_v62, 0.0 }
 0x711   : > { %v1150_v49 = vsel %vm1149_vm8, 1.0, %v1826_v39 }
 0x712   : > { %v1152_v1 = vmul.f32 0.3275911, %v1151_v63  ;;  %v1178_v22 = vsub.f32 0.0, %v1151_v63 }
 0x714   : > { %v1153_v2 = vadd.f32 1.0, %v1152_v1  ;;  %v1179_v25 = vmul.f32 %v1178_v22, %v1151_v63 }
 0x716   : > { %1566 = vrcp.f32 %v1153_v2  ;;  %v1165_v13 = vand.u32 2147483648, %v1153_v2  ;;  %v1163_v16 = vand.u32 2147483647, %v1153_v2  ;;  %vm1159_vm4 = vweird.f32 %v1153_v2 }
 0x717   : > { %v1180_v28 = vmul.f32 1.442695, %v1179_v25 }
 0x718   : > { %v1166_v19 = vor.u32 1.1754944e-38, %v1165_v13  ;;  %vm1164_vm7 = vcmp.eq.f32.partialorder %v1163_v16, 8.507059e+37 }
 0x719   : > { %1568 = vpow2.f32 %v1180_v28 }
 0x71c   : > { %v1567_v7 = vpop.eup %1566 }
 0x71d   : > { %v1155_v10 = vmul.f32 %v1567_v7, %v1153_v2  ;;  %vm1160_vm3 = vweird.f32 %v1567_v7 }
 0x71e   : > { %vm1161_vm6 = vmor %vm1159_vm4, %vm1160_vm3 }
 0x71f   : > { %v1156_v12 = vsub.f32 1.0, %v1155_v10  ;;  %v1569_v36 = vpop.eup %1568 }
 0x721   : > { %v1157_v15 = vmul.f32 %v1567_v7, %v1156_v12 }
 0x723   : > { %v1158_v18 = vadd.f32 %v1567_v7, %v1157_v15 }
 0x725   : > { %v1162_v20 = vsel %vm1161_vm6, %v1567_v7, %v1158_v18 }
 0x726   : > { %v1167_v21 = vsel %vm1164_vm7, %v1166_v19, %v1162_v20 }
 0x727   : > { %v1169_v23 = vmul.f32 1.0614054, %v1167_v21 }
 0x729   : > { %v1170_v24 = vadd.f32 -1.4531521, %v1169_v23 }
 0x72b   : > { %v1171_v26 = vmul.f32 %v1170_v24, %v1167_v21 }
 0x72d   : > { %v1172_v27 = vadd.f32 1.4214138, %v1171_v26 }
 0x72f   : > { %v1173_v29 = vmul.f32 %v1172_v27, %v1167_v21 }
 0x731   : > { %v1174_v30 = vadd.f32 -0.28449672, %v1173_v29 }
 0x733   : > { %v1175_v31 = vmul.f32 %v1174_v30, %v1167_v21 }
 0x735   : > { %v1176_v32 = vadd.f32 0.2548296, %v1175_v31 }
 0x737   : > { %v1177_v34 = vmul.f32 %v1176_v32, %v1167_v21 }
 0x739   : > { %v1182_v37 = vmul.f32 %v1569_v36, %v1177_v34 }
 0x73b   : > { %v1183_v38 = vsub.f32 1.0, %v1182_v37 }
 0x73d   : > { %v1184_v51 = vmul.f32 %v1183_v38, %v1150_v49 }
 0x73f   : > { %v1185_v40 = vadd.f32 1.0, %v1184_v51 }
 0x741   : > { %v1186_v0 = vmul.f32 %v1185_v40, %v1147_v53 }
 0x743   : > { %1433 = vmatmul.msk.f32.vlgmr.msra.gmra.mxu0 %vm1199_vm9, %v1186_v0 }
 0x744   : > { %1729 = shalt.err (!%p1726_p11)
}
 0x745   : > { %s1827_s22 = smov 128   ;;  %s2325_s27 = smov 8   ;;  %v1543_v41 = vld [vmem:[%s2291_s14] ss:$0 sm:$0xff] }
 0x746   : > { %1457 = dma.vmem_to_hbm [thread:$0]  (%p1998_p3), %s1259_s3, 512, %s1261_s23, %s1232_s0, %s1827_s22, %s1827_s22, %s2325_s27  }
 0x747   : > { %s1436_s11 = sshll.u32 %s1937_s10, 3  ;;  %s2326_s15 = sld [smem:[#allocation33_spill]] }
 0x748   : > { %s2327_s25 = sshll.u32 %s2025_s29, 3  ;;  %s1227_s10 = scalar_lea.sflag [#allocation7], %s2025_s29 }
 0x749   : > { %s572_s17 = scalar_lea.vmem [#allocation13], %s2327_s25 }
 0x74a   : > { %s1244_s24 = sshll.u32 %s572_s17, 4  ;;  %s1245_s24 = int_to_ptr.vmem [resolvable:$true] %s1244_s24 }
 0x74d   : > { %s1242_s18 = scalar_lea.hbm %s2326_s15, %s1436_s11  ;;  %s1750_s27 = scalar_lea.hbm %s2326_s15, 16 }
 0x74e   : > { %s1246_s2 = sshll.u32 %s1242_s18, 4  ;;  %s1247_s2 = int_to_ptr.hbm [resolvable:$true] %s1246_s2 }
 0x74f   : > { %s1744_s3 = sshra.s32 %s1247_s2, 4  ;;  %s1745_s3 = int_to_ptr.hbm [resolvable:$true] %s1744_s3 }
 0x750   : > { %s1746_s23 = scalar_lea.hbm %s1745_s3, 8  ;;  %p1751_p5 = scmp.lt.s32.totalorder %s1745_s3, %s2326_s15 }
 0x751   : > { %p1747_p12 = scmp.ne.s32.totalorder %s1745_s3, %s1746_s23  ;;  %p1752_p7 = scmp.lt.s32.totalorder %s1750_s27, %s1746_s23 }
 0x753   : > { %p1748_p13 = pnand %p1747_p12, %p1998_p3  ;;  %p1753_p1 = por %p1752_p7, %p1751_p5 }
 0x755   : > { %p1749_p0 = pneg %p1748_p13 }
 0x757   : > { %p1754_p4 = pnand %p1753_p1, %p1749_p0 }
 0x7c0   : > { %v1220_v42 = vpop.f32.mrf.mxu0 }
 0x7c1   : > { %v1221_v44 = vadd.f32 %v1543_v41, %v1220_v42 }
 0x7c3   : > { %v1223_v45 = vadd.f32 %v1221_v44, %v2177_v35 }
 0x7c5   : > { %v1224_v46 = vmul.f32 %v2173_v33, %v1223_v45 }
 0x7c7   : > { %1225 = vst.msk [vmem:[%s572_s17] sm:$0xff] %vm598_vm0, %v1224_v46 }
 0x7c8   : > { %1757 = shalt.err (!%p1754_p4)
}
 0x7c9   : > { %1456 = dma.vmem_to_hbm [thread:$0]  (%p1998_p3), %s1245_s24, 128, %s1247_s2, %s1227_s10  }
 0x7ca PF: > { %s2328_s29 = sld [smem:[#allocation22_spill]]  ;;  %p2330_p8 = scmp.ge.s32.totalorder %s1810_s28, 2 }
 0x7cc   : > { %p1475_p9 = pnand %p2330_p8, %p1951_p6 }
 0x7ce   : > { %p1476_p10 = pneg %p1475_p9 }
 0x7d0   : > { %s1275_s21 = sand.u32 1, %s2328_s29  }
 0x7d1   : > { %s1276_s1 = scalar_lea.sflag [#allocation7], %s1275_s21 }
 0x7d2   : > { %1789 = dma.done.wait (%p1476_p10), %s1276_s1, 128  }
 0x7d3   : > { %1791 = vsyncadd (%p1476_p10), %s1276_s1, 4294967168  ;;  %s1286_s18 = scalar_lea.sflag [#allocation15], %s1275_s21 }
 0x7d4   : > { %1793 = dma.done.wait (%p1476_p10), %s1286_s18, 512  }
 0x7d5   : > { %1795 = vsyncadd (%p1476_p10), %s1286_s18, 4294966784  ;;  %s2331_s17 = sld [smem:[#allocation23_spill]]  ;;  %p43_p3 = scmp.ge.s32.totalorder %s1985_s19, 4  }
 0x7d6   : > { %s2332_s27 = sld [smem:[#allocation25_spill]]  ;;  %s2333_s25 = smov %s1802_s26 }
 0x7d7   : > { %s2335_s28 = smov %s1985_s19  ;;  %45 = sbr.rel (!%p43_p3) target bundleno = 29 (0x1d), region = 153 }
 0x7db   : > { %s2334_s26 = smov %s2331_s17 }
 0x7dc   :  { %1292 = vsyncpa [#allocation6], 1 }
 0x7dd   :  { %1294 = vsyncpa [#allocation6 + $0x1], 1 }
 0x7de   :  { %1295 = vsyncpa [#allocation9], 1 }
 0x7df   :  { %1296 = vsyncpa [#allocation12], 1 }
 0x7e0   :  { %1297 = vsyncpa [#allocation7], 1 }
 0x7e1   :  { %1299 = vsyncpa [#allocation7 + $0x1], 1 }
 0x7e2   :  { %1300 = vsyncpa [#allocation15], 1 }
 0x7e3   :  { %1302 = vsyncpa [#allocation15 + $0x1], 1 }

</bundles_post_ra>
